<compile_context>
chip_gen: v6e
topology: v6e:2x2x1
jax: 0.10.0
libtpu: 0.0.40
codegen_flags: <defaults>
</compile_context>

<pallas_src>
import functools
import numpy as np
import jax
import jax.numpy as jnp
from jax.experimental import pallas as pl
from jax.experimental.pallas import tpu as pltpu


def _round_up(x, m):
    return ((x + m - 1) // m) * m


def _pad2d(x, rows, cols):
    r, c = x.shape
    if (r, c) == (rows, cols):
        return x  # already aligned: no HBM copy
    return jnp.pad(x, ((0, rows - r), (0, cols - c)))


def _choose_tiles(M, K, N):
    # M: single block when small (fits VMEM easily for our shapes).
    if M <= 512:
        tm = _round_up(M, 8)
    else:
        tm = 256
    Mp = _round_up(M, tm)

    # N: large lane-dense tiles, but keep >= 2 blocks along N when N is big so
    # the "parallel" j axis can be sharded across v7x's 2 TensorCores.
    Np0 = _round_up(N, 128)
    if Np0 <= 512:
        tn = Np0
    elif Np0 <= 1024:
        tn = 512
    else:
        tn = 1024 if Np0 % 1024 == 0 else 512
    Np = _round_up(N, tn)

    # K: full-K single block when it fits, else 1024/512 chunks.
    Kp0 = _round_up(K, 128)
    if Kp0 <= 1024:
        tk = Kp0
    else:
        tk = 1024 if Kp0 % 1024 == 0 else 512
    Kp = _round_up(K, tk)
    return tm, tk, tn, Mp, Kp, Np


# ----------------------------------------------------------------------------
# Pallas kernels: out = act(scale * A @ B + C)
# ----------------------------------------------------------------------------
def _mm_bias_kernel_k1(a_ref, b_ref, c_ref, o_ref, *, scale, relu):
    # Single K block: no accumulator scratch, no init/copy-out passes.
    acc = jnp.dot(a_ref[...], b_ref[...], preferred_element_type=jnp.float32)
    if scale != 1.0:
        acc = scale * acc
    out = acc + c_ref[...]          # c is (tm, tn) or (1, tn); broadcasting ok
    if relu:
        out = jnp.maximum(out, 0.0)
    o_ref[...] = out.astype(o_ref.dtype)


def _mm_bias_kernel(a_ref, b_ref, c_ref, o_ref, acc_ref, *, scale, relu, nk):
    k = pl.program_id(2)

    @pl.when(k == 0)
    def _():
        acc_ref[...] = jnp.zeros_like(acc_ref)

    acc_ref[...] += jnp.dot(a_ref[...], b_ref[...],
                            preferred_element_type=jnp.float32)

    @pl.when(k == nk - 1)
    def _():
        acc = acc_ref[...]
        if scale != 1.0:
            acc = scale * acc
        out = acc + c_ref[...]
        if relu:
            out = jnp.maximum(out, 0.0)
        o_ref[...] = out.astype(o_ref.dtype)


def matmul_addc(a, b, c, *, scale=1.0, relu=False):
    """act(scale * a @ b + c) via a Pallas TPU kernel.

    a: (M, K) f32, b: (K, N) f32.
    c: either (N,) / (1, N) row bias (broadcast in-kernel) or a full (M, N)
    residual (e.g. the KFLA mean matrix).
    Inputs are zero-padded up to TPU-friendly tiles only when needed and the
    result is sliced back to (M, N).
    """
    M, K = a.shape
    K2, N = b.shape
    assert K == K2
    a = a.astype(jnp.float32)
    b = b.astype(jnp.float32)
    c = jnp.asarray(c, jnp.float32)
    if c.ndim == 1:
        assert c.shape == (N,)
        c = c.reshape(1, N)
    row_bias = (c.shape[0] == 1 and M != 1) or c.shape == (1, N)
    if not row_bias:
        assert c.shape == (M, N)

    tm, tk, tn, Mp, Kp, Np = _choose_tiles(M, K, N)
    nk = Kp // tk

    a_p = _pad2d(a, Mp, Kp)
    b_p = _pad2d(b, Kp, Np)
    if row_bias:
        c_p = _pad2d(c, 1, Np)
        c_rows, c_block_rows = 1, 1
    else:
        c_p = _pad2d(c, Mp, Np)
        c_rows, c_block_rows = Mp, tm

    tk_eff = Kp if nk == 1 else tk
    est_vmem = 4 * (2 * (tm * tk_eff + tk_eff * tn + c_block_rows * tn + tm * tn)
                    + (tm * tn if nk > 1 else 0))

    if nk == 1:
        cp_kwargs = {"dimension_semantics": ("parallel", "parallel")}
    else:
        cp_kwargs = {"dimension_semantics": ("parallel", "parallel", "arbitrary")}
    if est_vmem > 12 * 1024 * 1024:
        # Keep headroom on v7x (64 MiB physical VMEM per TC); plenty on v5e/v6e.
        cp_kwargs["vmem_limit_bytes"] = int(min(2 * est_vmem, 48 * 1024 * 1024))

    if nk == 1:
        if row_bias:
            c_spec = pl.BlockSpec((1, tn), lambda i, j: (0, j))
        else:
            c_spec = pl.BlockSpec((tm, tn), lambda i, j: (i, j))
        out = pl.pallas_call(
            functools.partial(_mm_bias_kernel_k1, scale=scale, relu=relu),
            out_shape=jax.ShapeDtypeStruct((Mp, Np), jnp.float32),
            grid_spec=pltpu.PrefetchScalarGridSpec(
                num_scalar_prefetch=0,
                grid=(Mp // tm, Np // tn),
                in_specs=[
                    pl.BlockSpec((tm, Kp), lambda i, j: (i, 0)),
                    pl.BlockSpec((Kp, tn), lambda i, j: (0, j)),
                    c_spec,
                ],
                out_specs=pl.BlockSpec((tm, tn), lambda i, j: (i, j)),
            ),
            compiler_params=pltpu.CompilerParams(**cp_kwargs),
        )(a_p, b_p, c_p)
    else:
        if row_bias:
            c_spec = pl.BlockSpec((1, tn), lambda i, j, k: (0, j))
        else:
            c_spec = pl.BlockSpec((tm, tn), lambda i, j, k: (i, j))
        out = pl.pallas_call(
            functools.partial(_mm_bias_kernel, scale=scale, relu=relu, nk=nk),
            out_shape=jax.ShapeDtypeStruct((Mp, Np), jnp.float32),
            grid_spec=pltpu.PrefetchScalarGridSpec(
                num_scalar_prefetch=0,
                grid=(Mp // tm, Np // tn, nk),
                in_specs=[
                    pl.BlockSpec((tm, tk), lambda i, j, k: (i, k)),
                    pl.BlockSpec((tk, tn), lambda i, j, k: (k, j)),
                    c_spec,
                ],
                out_specs=pl.BlockSpec((tm, tn), lambda i, j, k: (i, j)),
                scratch_shapes=[pltpu.VMEM((tm, tn), jnp.float32)],
            ),
            compiler_params=pltpu.CompilerParams(**cp_kwargs),
        )(a_p, b_p, c_p)
    return out[:M, :N]


# ----------------------------------------------------------------------------
# KFLA.sample(): W = W_mean + scale * U_half @ E @ V_half
# ----------------------------------------------------------------------------
def kfla_sample_weight(mean, U_half, V_half, E, scale=1.0):
    m_mat = mean.reshape(mean.shape[0], -1)                  # (m, n) like torch M_
    # Tiny (m x m) @ (m x n) GEMM: plain XLA dot beats a padded MXU kernel.
    t = jnp.dot(U_half, E, precision=jax.lax.Precision.HIGHEST)
    # The big, HBM-bound GEMM (T @ V_half) + mean goes through Pallas.
    w = matmul_addc(t, V_half, m_mat, scale=scale)
    return w.reshape(mean.shape)


# ----------------------------------------------------------------------------
# Base network forward (Conv2d 3x3 same + ReLU  ->  flatten  ->  Linear)
# ----------------------------------------------------------------------------
def conv2d_3x3_same_relu(x, w, b):
    # x: (B, C, H, W) NCHW;  w: (F, C, 3, 3);  b: (F,)   -> out NCHW (B, F, H, W)
    B, C, H, W = x.shape
    F_out = w.shape[0]
    xp = jnp.pad(x, ((0, 0), (0, 0), (1, 1), (1, 1)))
    cols = []
    for kh in range(3):
        for kw in range(3):
            cols.append(xp[:, :, kh:kh + H, kw:kw + W])      # (B, C, H, W)
    patches = jnp.stack(cols, axis=2)                        # (B, C, 9, H, W)
    patches = patches.transpose(0, 3, 4, 1, 2).reshape(B * H * W, C * 9)
    w2 = w.reshape(F_out, C * 9).T                           # (C*9, F)
    out2 = matmul_addc(patches, w2, b, relu=True)            # bias broadcast in-kernel
    return out2.reshape(B, H, W, F_out).transpose(0, 3, 1, 2)


def linear(x2d, w, b, relu=False):
    # x2d: (B, in);  w: (out, in) (PyTorch layout);  b: (out,)
    return matmul_addc(x2d, w.T, b, relu=relu)


def base_forward(x, conv_w, conv_b, fc_w, fc_b):
    h = conv2d_3x3_same_relu(x, conv_w, conv_b)    # (B, F, H, W)
    h = h.reshape(h.shape[0], -1)                  # flatten NCHW, same as x.view(B, -1)
    return linear(h, fc_w, fc_b)                   # (B, n_classes)


@functools.partial(jax.jit, static_argnames=("scale",))
def kfla_forward_sample(x, buffers, E_conv, E_fc, scale=1.0):
    """Equivalent of KFLA.forward_sample(x): sample weights, then net.forward(x)."""
    conv_w = kfla_sample_weight(buffers["conv_w_mean"], buffers["conv_U_half"],
                                buffers["conv_V_half"], E_conv, scale)
    fc_w = kfla_sample_weight(buffers["fc_w_mean"], buffers["fc_U_half"],
                              buffers["fc_V_half"], E_fc, scale)
    # bias: sample() just copies the mean
    return base_forward(x, conv_w, buffers["conv_b_mean"],
                        fc_w, buffers["fc_b_mean"])


# ----------------------------------------------------------------------------
# Pure-JAX reference (high precision) for a sanity check
# ----------------------------------------------------------------------------
def _ref_forward(x, conv_w, conv_b, fc_w, fc_b):
    hp = jax.lax.Precision.HIGHEST
    h = jax.lax.conv_general_dilated(
        x, conv_w, (1, 1), "SAME",
        dimension_numbers=("NCHW", "OIHW", "NCHW"), precision=hp)
    h = jax.nn.relu(h + conv_b[None, :, None, None])
    h = h.reshape(h.shape[0], -1)
    return jnp.dot(h, fc_w.T, precision=hp) + fc_b


# TODO(synk): estimate_variance (Cholesky / cholesky_inverse), get_hessian
# (KFAC + autograd backward pass), and gridsearch_var0 (data-loader driven
# evaluation loop) are training/fit-time utilities with no forward-pass Pallas
# equivalent and are not implemented here.

if __name__ == "__main__":
    key = jax.random.PRNGKey(0)
    ks = jax.random.split(key, 12)

    B, C, H, W = 2, 4, 16, 16
    F_out, n_classes = 8, 10
    fc_in = F_out * H * W

    x = jax.random.normal(ks[0], (B, C, H, W), jnp.float32)

    # Deterministic synthetic KFLA buffers (means + Kronecker half-factors).
    buffers = {
        "conv_w_mean": 0.05 * jax.random.normal(ks[1], (F_out, C, 3, 3), jnp.float32),
        "conv_b_mean": 0.05 * jax.random.normal(ks[2], (F_out,), jnp.float32),
        "conv_U_half": 0.02 * jax.random.normal(ks[3], (F_out, F_out), jnp.float32),
        "conv_V_half": 0.02 * jax.random.normal(ks[4], (C * 9, C * 9), jnp.float32),
        "fc_w_mean": 0.02 * jax.random.normal(ks[5], (n_classes, fc_in), jnp.float32),
        "fc_b_mean": 0.02 * jax.random.normal(ks[6], (n_classes,), jnp.float32),
        "fc_U_half": 0.01 * jax.random.normal(ks[7], (n_classes, n_classes), jnp.float32),
        "fc_V_half": 0.01 * jax.random.normal(ks[8], (fc_in, fc_in), jnp.float32),
    }
    # Deterministic stand-ins for torch.randn(*M_.shape) inside sample().
    E_conv = jax.random.normal(ks[9], (F_out, C * 9), jnp.float32)
    E_fc = jax.random.normal(ks[10], (n_classes, fc_in), jnp.float32)

    scale = 1.0
    out = kfla_forward_sample(x, buffers, E_conv, E_fc, scale=scale)
    out = jax.block_until_ready(out)

    # Reference check (same sampled weights, pure JAX, highest precision).
    hp = jax.lax.Precision.HIGHEST
    conv_w_ref = buffers["conv_w_mean"] + scale * jnp.dot(
        jnp.dot(buffers["conv_U_half"], E_conv, precision=hp),
        buffers["conv_V_half"], precision=hp).reshape(F_out, C, 3, 3)
    fc_w_ref = buffers["fc_w_mean"] + scale * jnp.dot(
        jnp.dot(buffers["fc_U_half"], E_fc, precision=hp),
        buffers["fc_V_half"], precision=hp)
    ref = _ref_forward(x, conv_w_ref, buffers["conv_b_mean"],
                       fc_w_ref, buffers["fc_b_mean"])

    np.testing.assert_allclose(np.asarray(out), np.asarray(ref),
                               rtol=5e-2, atol=5e-2)
    assert out.shape == (B, n_classes) and out.dtype == jnp.float32
    print("KERNEL_OK")
</pallas_src>

<mosaic_0001>
module attributes {stable_mosaic.version = 11 : i64} {
  func.func @_mm_bias_kernel_k1(%arg0: i32, %arg1: i32, %arg2: memref<8x128xf32, #tpu.memory_space<vmem>>, %arg3: memref<128x128xf32, #tpu.memory_space<vmem>>, %arg4: memref<8x128xf32, #tpu.memory_space<vmem>>, %arg5: memref<8x128xf32, #tpu.memory_space<vmem>>) attributes {dimension_semantics = [#tpu.dimension_semantics<parallel>, #tpu.dimension_semantics<parallel>], iteration_bounds = array<i64: 1, 1>, scalar_prefetch = 0 : i64, scratch_operands = 0 : i64, tpu.core_type = #tpu.core_type<tc>, window_params = [{transform_indices = @transform_0, window_bounds = array<i64: 8, 128>}, {transform_indices = @transform_1, window_bounds = array<i64: 128, 128>}, {transform_indices = @transform_2, window_bounds = array<i64: 8, 128>}, {transform_indices = @transform_3, window_bounds = array<i64: 8, 128>}]} {
    %c0 = arith.constant 0 : index
    %c0_0 = arith.constant 0 : index
    %0 = vector.load %arg2[%c0, %c0_0] : memref<8x128xf32, #tpu.memory_space<vmem>>, vector<8x128xf32>
    %c0_1 = arith.constant 0 : index
    %c0_2 = arith.constant 0 : index
    %1 = vector.load %arg3[%c0_1, %c0_2] : memref<128x128xf32, #tpu.memory_space<vmem>>, vector<128x128xf32>
    %cst = arith.constant dense<0.000000e+00> : vector<8x128xf32>
    %2 = tpu.matmul %0, %1, %cst {dimension_numbers = #tpu.dot_dimension_numbers<[1], [0], [0], [1], [0, 0, 1, 1], [], []>} : vector<8x128xf32>, vector<128x128xf32>, vector<8x128xf32> -> vector<8x128xf32>
    %c0_3 = arith.constant 0 : index
    %c0_4 = arith.constant 0 : index
    %3 = vector.load %arg4[%c0_3, %c0_4] : memref<8x128xf32, #tpu.memory_space<vmem>>, vector<8x128xf32>
    %4 = arith.addf %2, %3 : vector<8x128xf32>
    %c0_5 = arith.constant 0 : index
    %c0_6 = arith.constant 0 : index
    %5 = vector.load %arg5[%c0_5, %c0_6] : memref<8x128xf32, #tpu.memory_space<vmem>>, vector<8x128xf32>
    tpu.vector_store %arg5[%c0_5, %c0_6], %4 {strides = array<i32>} : memref<8x128xf32, #tpu.memory_space<vmem>>, vector<8x128xf32>,
    return
  }
  func.func @transform_0(%arg0: i32, %arg1: i32) -> (i32, i32) {
    %c0_i32 = arith.constant 0 : i32
    %c0_i32_0 = arith.constant 0 : i32
    return %arg0, %c0_i32 : i32, i32
  }
  func.func @transform_1(%arg0: i32, %arg1: i32) -> (i32, i32) {
    %c0_i32 = arith.constant 0 : i32
    %c0_i32_0 = arith.constant 0 : i32
    return %c0_i32, %arg1 : i32, i32
  }
  func.func @transform_2(%arg0: i32, %arg1: i32) -> (i32, i32) {
    %c0_i32 = arith.constant 0 : i32
    return %arg0, %arg1 : i32, i32
  }
  func.func @transform_3(%arg0: i32, %arg1: i32) -> (i32, i32) {
    %c0_i32 = arith.constant 0 : i32
    return %arg0, %arg1 : i32, i32
  }
}

module attributes {stable_mosaic.version = 11 : i64} {
  func.func @_mm_bias_kernel_k1(%arg0: i32, %arg1: i32, %arg2: memref<512x128xf32, #tpu.memory_space<vmem>>, %arg3: memref<128x128xf32, #tpu.memory_space<vmem>>, %arg4: memref<1x128xf32, #tpu.memory_space<vmem>>, %arg5: memref<512x128xf32, #tpu.memory_space<vmem>>) attributes {dimension_semantics = [#tpu.dimension_semantics<parallel>, #tpu.dimension_semantics<parallel>], iteration_bounds = array<i64: 1, 1>, scalar_prefetch = 0 : i64, scratch_operands = 0 : i64, tpu.core_type = #tpu.core_type<tc>, window_params = [{transform_indices = @transform_0, window_bounds = array<i64: 512, 128>}, {transform_indices = @transform_1, window_bounds = array<i64: 128, 128>}, {transform_indices = @transform_2, window_bounds = array<i64: 1, 128>}, {transform_indices = @transform_3, window_bounds = array<i64: 512, 128>}]} {
    %c0 = arith.constant 0 : index
    %c0_0 = arith.constant 0 : index
    %0 = vector.load %arg2[%c0, %c0_0] : memref<512x128xf32, #tpu.memory_space<vmem>>, vector<512x128xf32>
    %c0_1 = arith.constant 0 : index
    %c0_2 = arith.constant 0 : index
    %1 = vector.load %arg3[%c0_1, %c0_2] : memref<128x128xf32, #tpu.memory_space<vmem>>, vector<128x128xf32>
    %cst = arith.constant dense<0.000000e+00> : vector<512x128xf32>
    %2 = tpu.matmul %0, %1, %cst {dimension_numbers = #tpu.dot_dimension_numbers<[1], [0], [0], [1], [0, 0, 1, 1], [], []>} : vector<512x128xf32>, vector<128x128xf32>, vector<512x128xf32> -> vector<512x128xf32>
    %c0_3 = arith.constant 0 : index
    %c0_4 = arith.constant 0 : index
    %3 = vector.load %arg4[%c0_3, %c0_4] : memref<1x128xf32, #tpu.memory_space<vmem>>, vector<1x128xf32>
    %4 = vector.broadcast %3 : vector<1x128xf32> to vector<512x128xf32>
    %5 = arith.addf %2, %4 : vector<512x128xf32>
    %cst_5 = arith.constant 0.000000e+00 : f32
    %6 = vector.broadcast %cst_5 : f32 to vector<512x128xf32>
    %7 = arith.maximumf %5, %6 : vector<512x128xf32>
    %c0_6 = arith.constant 0 : index
    %c0_7 = arith.constant 0 : index
    %8 = vector.load %arg5[%c0_6, %c0_7] : memref<512x128xf32, #tpu.memory_space<vmem>>, vector<512x128xf32>
    tpu.vector_store %arg5[%c0_6, %c0_7], %7 {strides = array<i32>} : memref<512x128xf32, #tpu.memory_space<vmem>>, vector<512x128xf32>,
    return
  }
  func.func @transform_0(%arg0: i32, %arg1: i32) -> (i32, i32) {
    %c0_i32 = arith.constant 0 : i32
    %c0_i32_0 = arith.constant 0 : i32
    return %arg0, %c0_i32 : i32, i32
  }
  func.func @transform_1(%arg0: i32, %arg1: i32) -> (i32, i32) {
    %c0_i32 = arith.constant 0 : i32
    %c0_i32_0 = arith.constant 0 : i32
    return %c0_i32, %arg1 : i32, i32
  }
  func.func @transform_2(%arg0: i32, %arg1: i32) -> (i32, i32) {
    %c0_i32 = arith.constant 0 : i32
    %c0_i32_0 = arith.constant 0 : i32
    return %c0_i32, %arg1 : i32, i32
  }
  func.func @transform_3(%arg0: i32, %arg1: i32) -> (i32, i32) {
    %c0_i32 = arith.constant 0 : i32
    return %arg0, %arg1 : i32, i32
  }
}

module attributes {stable_mosaic.version = 11 : i64} {
  func.func @_mm_bias_kernel(%arg0: i32, %arg1: i32, %arg2: i32, %arg3: memref<16x1024xf32, #tpu.memory_space<vmem>>, %arg4: memref<1024x1024xf32, #tpu.memory_space<vmem>>, %arg5: memref<16x1024xf32, #tpu.memory_space<vmem>>, %arg6: memref<16x1024xf32, #tpu.memory_space<vmem>>, %arg7: memref<16x1024xf32, #tpu.memory_space<vmem>>) attributes {dimension_semantics = [#tpu.dimension_semantics<parallel>, #tpu.dimension_semantics<parallel>, #tpu.dimension_semantics<arbitrary>], iteration_bounds = array<i64: 1, 2, 2>, scalar_prefetch = 0 : i64, scratch_operands = 1 : i64, tpu.core_type = #tpu.core_type<tc>, window_params = [{transform_indices = @transform_0, window_bounds = array<i64: 16, 1024>}, {transform_indices = @transform_1, window_bounds = array<i64: 1024, 1024>}, {transform_indices = @transform_2, window_bounds = array<i64: 16, 1024>}, {transform_indices = @transform_3, window_bounds = array<i64: 16, 1024>}]} {
    %c0_i32 = arith.constant 0 : i32
    %0 = arith.cmpi eq, %arg2, %c0_i32 : i32
    %1 = arith.extui %0 : i1 to i32
    %c0_i32_0 = arith.constant 0 : i32
    %2 = arith.cmpi ne, %1, %c0_i32_0 : i32
    scf.if %2 {
      %cst_9 = arith.constant 0.000000e+00 : f32
      %12 = vector.broadcast %cst_9 : f32 to vector<16x1024xf32>
      %c0_10 = arith.constant 0 : index
      %c0_11 = arith.constant 0 : index
      %13 = vector.load %arg7[%c0_10, %c0_11] : memref<16x1024xf32, #tpu.memory_space<vmem>>, vector<16x1024xf32>
      tpu.vector_store %arg7[%c0_10, %c0_11], %12 {strides = array<i32>} : memref<16x1024xf32, #tpu.memory_space<vmem>>, vector<16x1024xf32>,
    } else {
    }
    %c0 = arith.constant 0 : index
    %c0_1 = arith.constant 0 : index
    %3 = vector.load %arg7[%c0, %c0_1] : memref<16x1024xf32, #tpu.memory_space<vmem>>, vector<16x1024xf32>
    %c0_2 = arith.constant 0 : index
    %c0_3 = arith.constant 0 : index
    %4 = vector.load %arg3[%c0_2, %c0_3] : memref<16x1024xf32, #tpu.memory_space<vmem>>, vector<16x1024xf32>
    %c0_4 = arith.constant 0 : index
    %c0_5 = arith.constant 0 : index
    %5 = vector.load %arg4[%c0_4, %c0_5] : memref<1024x1024xf32, #tpu.memory_space<vmem>>, vector<1024x1024xf32>
    %cst = arith.constant dense<0.000000e+00> : vector<16x1024xf32>
    %6 = tpu.matmul %4, %5, %cst {dimension_numbers = #tpu.dot_dimension_numbers<[1], [0], [0], [1], [0, 0, 1, 1], [], []>} : vector<16x1024xf32>, vector<1024x1024xf32>, vector<16x1024xf32> -> vector<16x1024xf32>
    %7 = arith.addf %3, %6 : vector<16x1024xf32>
    %c0_6 = arith.constant 0 : index
    %c0_7 = arith.constant 0 : index
    %8 = vector.load %arg7[%c0_6, %c0_7] : memref<16x1024xf32, #tpu.memory_space<vmem>>, vector<16x1024xf32>
    tpu.vector_store %arg7[%c0_6, %c0_7], %7 {strides = array<i32>} : memref<16x1024xf32, #tpu.memory_space<vmem>>, vector<16x1024xf32>,
    %c1_i32 = arith.constant 1 : i32
    %9 = arith.cmpi eq, %arg2, %c1_i32 : i32
    %10 = arith.extui %9 : i1 to i32
    %c0_i32_8 = arith.constant 0 : i32
    %11 = arith.cmpi ne, %10, %c0_i32_8 : i32
    scf.if %11 {
      %c0_9 = arith.constant 0 : index
      %c0_10 = arith.constant 0 : index
      %12 = vector.load %arg7[%c0_9, %c0_10] : memref<16x1024xf32, #tpu.memory_space<vmem>>, vector<16x1024xf32>
      %c0_11 = arith.constant 0 : index
      %c0_12 = arith.constant 0 : index
      %13 = vector.load %arg5[%c0_11, %c0_12] : memref<16x1024xf32, #tpu.memory_space<vmem>>, vector<16x1024xf32>
      %14 = arith.addf %12, %13 : vector<16x1024xf32>
      %c0_13 = arith.constant 0 : index
      %c0_14 = arith.constant 0 : index
      %15 = vector.load %arg6[%c0_13, %c0_14] : memref<16x1024xf32, #tpu.memory_space<vmem>>, vector<16x1024xf32>
      tpu.vector_store %arg6[%c0_13, %c0_14], %14 {strides = array<i32>} : memref<16x1024xf32, #tpu.memory_space<vmem>>, vector<16x1024xf32>,
    } else {
    }
    return
  }
  func.func @transform_0(%arg0: i32, %arg1: i32, %arg2: i32) -> (i32, i32) {
    %c0_i32 = arith.constant 0 : i32
    return %arg0, %arg2 : i32, i32
  }
  func.func @transform_1(%arg0: i32, %arg1: i32, %arg2: i32) -> (i32, i32) {
    %c0_i32 = arith.constant 0 : i32
    return %arg2, %arg1 : i32, i32
  }
  func.func @transform_2(%arg0: i32, %arg1: i32, %arg2: i32) -> (i32, i32) {
    %c0_i32 = arith.constant 0 : i32
    return %arg0, %arg1 : i32, i32
  }
  func.func @transform_3(%arg0: i32, %arg1: i32, %arg2: i32) -> (i32, i32) {
    %c0_i32 = arith.constant 0 : i32
    return %arg0, %arg1 : i32, i32
  }
}

module attributes {stable_mosaic.version = 11 : i64} {
  func.func @_mm_bias_kernel(%arg0: i32, %arg1: i32, %arg2: i32, %arg3: memref<8x1024xf32, #tpu.memory_space<vmem>>, %arg4: memref<1024x128xf32, #tpu.memory_space<vmem>>, %arg5: memref<1x128xf32, #tpu.memory_space<vmem>>, %arg6: memref<8x128xf32, #tpu.memory_space<vmem>>, %arg7: memref<8x128xf32, #tpu.memory_space<vmem>>) attributes {dimension_semantics = [#tpu.dimension_semantics<parallel>, #tpu.dimension_semantics<parallel>, #tpu.dimension_semantics<arbitrary>], iteration_bounds = array<i64: 1, 1, 2>, scalar_prefetch = 0 : i64, scratch_operands = 1 : i64, tpu.core_type = #tpu.core_type<tc>, window_params = [{transform_indices = @transform_0, window_bounds = array<i64: 8, 1024>}, {transform_indices = @transform_1, window_bounds = array<i64: 1024, 128>}, {transform_indices = @transform_2, window_bounds = array<i64: 1, 128>}, {transform_indices = @transform_3, window_bounds = array<i64: 8, 128>}]} {
    %c0_i32 = arith.constant 0 : i32
    %0 = arith.cmpi eq, %arg2, %c0_i32 : i32
    %1 = arith.extui %0 : i1 to i32
    %c0_i32_0 = arith.constant 0 : i32
    %2 = arith.cmpi ne, %1, %c0_i32_0 : i32
    scf.if %2 {
      %cst_9 = arith.constant 0.000000e+00 : f32
      %12 = vector.broadcast %cst_9 : f32 to vector<8x128xf32>
      %c0_10 = arith.constant 0 : index
      %c0_11 = arith.constant 0 : index
      %13 = vector.load %arg7[%c0_10, %c0_11] : memref<8x128xf32, #tpu.memory_space<vmem>>, vector<8x128xf32>
      tpu.vector_store %arg7[%c0_10, %c0_11], %12 {strides = array<i32>} : memref<8x128xf32, #tpu.memory_space<vmem>>, vector<8x128xf32>,
    } else {
    }
    %c0 = arith.constant 0 : index
    %c0_1 = arith.constant 0 : index
    %3 = vector.load %arg7[%c0, %c0_1] : memref<8x128xf32, #tpu.memory_space<vmem>>, vector<8x128xf32>
    %c0_2 = arith.constant 0 : index
    %c0_3 = arith.constant 0 : index
    %4 = vector.load %arg3[%c0_2, %c0_3] : memref<8x1024xf32, #tpu.memory_space<vmem>>, vector<8x1024xf32>
    %c0_4 = arith.constant 0 : index
    %c0_5 = arith.constant 0 : index
    %5 = vector.load %arg4[%c0_4, %c0_5] : memref<1024x128xf32, #tpu.memory_space<vmem>>, vector<1024x128xf32>
    %cst = arith.constant dense<0.000000e+00> : vector<8x128xf32>
    %6 = tpu.matmul %4, %5, %cst {dimension_numbers = #tpu.dot_dimension_numbers<[1], [0], [0], [1], [0, 0, 1, 1], [], []>} : vector<8x1024xf32>, vector<1024x128xf32>, vector<8x128xf32> -> vector<8x128xf32>
    %7 = arith.addf %3, %6 : vector<8x128xf32>
    %c0_6 = arith.constant 0 : index
    %c0_7 = arith.constant 0 : index
    %8 = vector.load %arg7[%c0_6, %c0_7] : memref<8x128xf32, #tpu.memory_space<vmem>>, vector<8x128xf32>
    tpu.vector_store %arg7[%c0_6, %c0_7], %7 {strides = array<i32>} : memref<8x128xf32, #tpu.memory_space<vmem>>, vector<8x128xf32>,
    %c1_i32 = arith.constant 1 : i32
    %9 = arith.cmpi eq, %arg2, %c1_i32 : i32
    %10 = arith.extui %9 : i1 to i32
    %c0_i32_8 = arith.constant 0 : i32
    %11 = arith.cmpi ne, %10, %c0_i32_8 : i32
    scf.if %11 {
      %c0_9 = arith.constant 0 : index
      %c0_10 = arith.constant 0 : index
      %12 = vector.load %arg7[%c0_9, %c0_10] : memref<8x128xf32, #tpu.memory_space<vmem>>, vector<8x128xf32>
      %c0_11 = arith.constant 0 : index
      %c0_12 = arith.constant 0 : index
      %13 = vector.load %arg5[%c0_11, %c0_12] : memref<1x128xf32, #tpu.memory_space<vmem>>, vector<1x128xf32>
      %14 = vector.broadcast %13 : vector<1x128xf32> to vector<8x128xf32>
      %15 = arith.addf %12, %14 : vector<8x128xf32>
      %c0_13 = arith.constant 0 : index
      %c0_14 = arith.constant 0 : index
      %16 = vector.load %arg6[%c0_13, %c0_14] : memref<8x128xf32, #tpu.memory_space<vmem>>, vector<8x128xf32>
      tpu.vector_store %arg6[%c0_13, %c0_14], %15 {strides = array<i32>} : memref<8x128xf32, #tpu.memory_space<vmem>>, vector<8x128xf32>,
    } else {
    }
    return
  }
  func.func @transform_0(%arg0: i32, %arg1: i32, %arg2: i32) -> (i32, i32) {
    %c0_i32 = arith.constant 0 : i32
    return %arg0, %arg2 : i32, i32
  }
  func.func @transform_1(%arg0: i32, %arg1: i32, %arg2: i32) -> (i32, i32) {
    %c0_i32 = arith.constant 0 : i32
    return %arg2, %arg1 : i32, i32
  }
  func.func @transform_2(%arg0: i32, %arg1: i32, %arg2: i32) -> (i32, i32) {
    %c0_i32 = arith.constant 0 : i32
    %c0_i32_0 = arith.constant 0 : i32
    return %c0_i32, %arg1 : i32, i32
  }
  func.func @transform_3(%arg0: i32, %arg1: i32, %arg2: i32) -> (i32, i32) {
    %c0_i32 = arith.constant 0 : i32
    return %arg0, %arg1 : i32, i32
  }
}

</mosaic_0001>

<bundles_post_ra>
// kernel: kfla_forward_sample.4
= control target key start
LH: loop header
LB: loop body
LE: loop exit
PB: predicated region body
PF: predicated region fallthrough
CT: control target
= control target key end

     0   :  { %v161_v0 = vmov 0.0   ;;  %vm162_vm0 = vmmov 0   ;;  %s240_s1 = inlined_call_operand.vmem [shape: f32[128,128], index: 1, kind: input, shape index: {}]   ;;  %s241_s0 = inlined_call_operand.vmem [shape: f32[8,128], index: 0, kind: input, shape index: {}]   ;;  %s242_s2 = inlined_call_operand.vmem [shape: f32[8,128], index: 2, kind: input, shape index: {}]   ;;  %s243_s3 = inlined_call_operand.vmem [shape: f32[8,128], index: 3, kind: output, shape index: {}]  }
   0x1   :  { %124 = vmatprep.subr.mxu0 %v161_v0  ;;  %v30_v1 = vld [vmem:[%s240_s1 + $0x78] sm:$0xff]  ;;  %v29_v2 = vld [vmem:[%s240_s1 + $0x70] sm:$0xff]  ;;  %156 = vmatprep.mubr.msk.f32.mxu0 %vm162_vm0, %v161_v0  ;;  %v28_v3 = vld [vmem:[%s240_s1 + $0x68] sm:$0xff] }
   0x2   :  { %125 = vmatpush3.msra.mxu0 %v30_v1  ;;  %v27_v4 = vld [vmem:[%s240_s1 + $0x60] sm:$0xff]  ;;  %v26_v5 = vld [vmem:[%s240_s1 + $0x58] sm:$0xff]  ;;  %v25_v6 = vld [vmem:[%s240_s1 + $0x50] sm:$0xff] }
   0x3   :  { %126 = vmatprep.subr.mxu0 %v161_v0  ;;  %v24_v7 = vld [vmem:[%s240_s1 + $0x48] sm:$0xff]  ;;  %v23_v8 = vld [vmem:[%s240_s1 + $0x40] sm:$0xff]  ;;  %v22_v9 = vld [vmem:[%s240_s1 + $0x38] sm:$0xff] }
   0x4   :  { %127 = vmatpush3.msra.mxu0 %v29_v2  ;;  %v21_v10 = vld [vmem:[%s240_s1 + $0x30] sm:$0xff]  ;;  %v20_v11 = vld [vmem:[%s240_s1 + $0x28] sm:$0xff]  ;;  %v19_v12 = vld [vmem:[%s240_s1 + $0x20] sm:$0xff] }
   0x5   :  { %128 = vmatprep.subr.mxu0 %v161_v0  ;;  %v18_v13 = vld [vmem:[%s240_s1 + $0x18] sm:$0xff]  ;;  %v17_v14 = vld [vmem:[%s240_s1 + $0x10] sm:$0xff]  ;;  %v16_v15 = vld [vmem:[%s240_s1 + $0x8] sm:$0xff] }
   0x6   :  { %129 = vmatpush3.msra.mxu0 %v28_v3  ;;  %v15_v16 = vld [vmem:[%s240_s1] sm:$0xff] }
   0x7   :  { %130 = vmatprep.subr.mxu0 %v161_v0  ;;  %v14_v17 = vld [vmem:[%s241_s0] sm:$0xff] }
   0x8   :  { %131 = vmatpush3.msra.mxu0 %v27_v4  ;;  %v31_v18 = vld [vmem:[%s242_s2] sm:$0xff] }
   0x9   :  { %132 = vmatprep.subr.mxu0 %v161_v0 }
   0xa   :  { %133 = vmatpush3.msra.mxu0 %v26_v5 }
   0xb   :  { %134 = vmatprep.subr.mxu0 %v161_v0 }
   0xc   :  { %135 = vmatpush3.msra.mxu0 %v25_v6 }
   0xd   :  { %136 = vmatprep.subr.mxu0 %v161_v0 }
   0xe   :  { %137 = vmatpush3.msra.mxu0 %v24_v7 }
   0xf   :  { %138 = vmatprep.subr.mxu0 %v161_v0 }
  0x10   :  { %139 = vmatpush3.msra.mxu0 %v23_v8 }
  0x11   :  { %140 = vmatprep.subr.mxu0 %v161_v0 }
  0x12   :  { %141 = vmatpush3.msra.mxu0 %v22_v9 }
  0x13   :  { %142 = vmatprep.subr.mxu0 %v161_v0 }
  0x14   :  { %143 = vmatpush3.msra.mxu0 %v21_v10 }
  0x15   :  { %144 = vmatprep.subr.mxu0 %v161_v0 }
  0x16   :  { %145 = vmatpush3.msra.mxu0 %v20_v11 }
  0x17   :  { %146 = vmatprep.subr.mxu0 %v161_v0 }
  0x18   :  { %147 = vmatpush3.msra.mxu0 %v19_v12 }
  0x19   :  { %148 = vmatprep.subr.mxu0 %v161_v0 }
  0x1a   :  { %149 = vmatpush3.msra.mxu0 %v18_v13 }
  0x1b   :  { %150 = vmatprep.subr.mxu0 %v161_v0 }
  0x1c   :  { %151 = vmatpush3.msra.mxu0 %v17_v14 }
  0x1d   :  { %152 = vmatprep.subr.mxu0 %v161_v0 }
  0x1e   :  { %153 = vmatpush3.msra.mxu0 %v16_v15 }
  0x1f   :  { %154 = vmatprep.subr.mxu0 %v161_v0 }
  0x20   :  { %155 = vmatpush3.msra.mxu0 %v15_v16 }
  0x21   :  { %157 = vmatmul.mubr.f32.vlgmr.msra.gmra.mxu0 %v14_v17 }
  0xe1   :  { %v98_v19 = vpop.f32.mrf.mxu0 }
  0xe2   :  { %v99_v20 = vadd.f32 %v98_v19, %v31_v18 }
  0xe3   :  { %v158_v21 = vpop.f32.mrf.mxu0 }
  0xe4   :  { %102 = vst [vmem:[%s243_s3] sm:$0xff] %v99_v20 }

// kernel: kfla_forward_sample.6
= control target key start
LH: loop header
LB: loop body
LE: loop exit
PB: predicated region body
PF: predicated region fallthrough
CT: control target
= control target key end

     0   :  { %s1380_s1 = inlined_call_operand.vmem [shape: f32[128,128], index: 1, kind: input, shape index: {}]   ;;  %s1381_s0 = inlined_call_operand.vmem [shape: f32[512,128], index: 0, kind: input, shape index: {}]   ;;  %s1382_s2 = inlined_call_operand.vmem [shape: f32[1,128], index: 2, kind: input, shape index: {}]   ;;  %s1383_s3 = inlined_call_operand.vmem [shape: f32[512,128], index: 3, kind: output, shape index: {}]  }
   0x1   :  { %v93_v0 = vld [vmem:[%s1380_s1 + $0x78] sm:$0xff]  ;;  %v92_v1 = vld [vmem:[%s1380_s1 + $0x70] sm:$0xff]  ;;  %v91_v2 = vld [vmem:[%s1380_s1 + $0x68] sm:$0xff] }
   0x2   :  { %699 = vmatprep.subr.mxu0 %v93_v0  ;;  %827 = vmatprep.subr.mxu1 %v93_v0  ;;  %v90_v3 = vld [vmem:[%s1380_s1 + $0x60] sm:$0xff]  ;;  %v89_v4 = vld [vmem:[%s1380_s1 + $0x58] sm:$0xff]  ;;  %v88_v5 = vld [vmem:[%s1380_s1 + $0x50] sm:$0xff] }
   0x3   :  { %700 = vmatpush3.msra.mxu0 %v93_v0  ;;  %843 = vmatpush3.msra.mxu1 %v93_v0  ;;  %v87_v6 = vld [vmem:[%s1380_s1 + $0x48] sm:$0xff]  ;;  %v86_v7 = vld [vmem:[%s1380_s1 + $0x40] sm:$0xff]  ;;  %v85_v8 = vld [vmem:[%s1380_s1 + $0x38] sm:$0xff] }
   0x4   :  { %701 = vmatprep.subr.mxu0 %v92_v1  ;;  %828 = vmatprep.subr.mxu1 %v92_v1  ;;  %v84_v9 = vld [vmem:[%s1380_s1 + $0x30] sm:$0xff]  ;;  %v83_v10 = vld [vmem:[%s1380_s1 + $0x28] sm:$0xff]  ;;  %v82_v11 = vld [vmem:[%s1380_s1 + $0x20] sm:$0xff] }
   0x5   :  { %702 = vmatpush3.msra.mxu0 %v92_v1  ;;  %844 = vmatpush3.msra.mxu1 %v92_v1  ;;  %v81_v12 = vld [vmem:[%s1380_s1 + $0x18] sm:$0xff]  ;;  %v80_v13 = vld [vmem:[%s1380_s1 + $0x10] sm:$0xff]  ;;  %v79_v14 = vld [vmem:[%s1380_s1 + $0x8] sm:$0xff] }
   0x6   :  { %703 = vmatprep.subr.mxu0 %v91_v2  ;;  %829 = vmatprep.subr.mxu1 %v91_v2  ;;  %v78_v15 = vld [vmem:[%s1380_s1] sm:$0xff]  ;;  %v15_v18 = vld [vmem:[%s1381_s0 + $0x8] sm:$0xff]  ;;  %v16_v20 = vld [vmem:[%s1381_s0 + $0x10] sm:$0xff] }
   0x7   :  { %704 = vmatpush3.msra.mxu0 %v91_v2  ;;  %845 = vmatpush3.msra.mxu1 %v91_v2  ;;  %v14_v16 = vld [vmem:[%s1381_s0] sm:$0xff]  ;;  %v47_v19 = vld [vmem:[%s1381_s0 + $0x108] sm:$0xff]  ;;  %v48_v21 = vld [vmem:[%s1381_s0 + $0x110] sm:$0xff] }
   0x8   :  { %705 = vmatprep.subr.mxu0 %v90_v3  ;;  %830 = vmatprep.subr.mxu1 %v90_v3  ;;  %v46_v17 = vld [vmem:[%s1381_s0 + $0x100] sm:$0xff]  ;;  %v17_v22 = vld [vmem:[%s1381_s0 + $0x18] sm:$0xff]  ;;  %v19_v26 = vld [vmem:[%s1381_s0 + $0x28] sm:$0xff] }
   0x9   :  { %706 = vmatpush3.msra.mxu0 %v90_v3  ;;  %846 = vmatpush3.msra.mxu1 %v90_v3  ;;  %v49_v23 = vld [vmem:[%s1381_s0 + $0x118] sm:$0xff]  ;;  %v18_v24 = vld [vmem:[%s1381_s0 + $0x20] sm:$0xff]  ;;  %v51_v27 = vld [vmem:[%s1381_s0 + $0x128] sm:$0xff] }
   0xa   :  { %707 = vmatprep.subr.mxu0 %v89_v4  ;;  %831 = vmatprep.subr.mxu1 %v89_v4  ;;  %v50_v25 = vld [vmem:[%s1381_s0 + $0x120] sm:$0xff]  ;;  %v20_v28 = vld [vmem:[%s1381_s0 + $0x30] sm:$0xff]  ;;  %v21_v30 = vld [vmem:[%s1381_s0 + $0x38] sm:$0xff] }
   0xb   :  { %708 = vmatpush3.msra.mxu0 %v89_v4  ;;  %847 = vmatpush3.msra.mxu1 %v89_v4  ;;  %v52_v29 = vld [vmem:[%s1381_s0 + $0x130] sm:$0xff]  ;;  %v53_v31 = vld [vmem:[%s1381_s0 + $0x138] sm:$0xff]  ;;  %v22_v32 = vld [vmem:[%s1381_s0 + $0x40] sm:$0xff] }
   0xc   :  { %709 = vmatprep.subr.mxu0 %v88_v5  ;;  %832 = vmatprep.subr.mxu1 %v88_v5  ;;  %v54_v33 = vld [vmem:[%s1381_s0 + $0x140] sm:$0xff]  ;;  %v23_v34 = vld [vmem:[%s1381_s0 + $0x48] sm:$0xff]  ;;  %v24_v36 = vld [vmem:[%s1381_s0 + $0x50] sm:$0xff] }
   0xd   :  { %710 = vmatpush3.msra.mxu0 %v88_v5  ;;  %848 = vmatpush3.msra.mxu1 %v88_v5  ;;  %v55_v35 = vld [vmem:[%s1381_s0 + $0x148] sm:$0xff]  ;;  %v56_v37 = vld [vmem:[%s1381_s0 + $0x150] sm:$0xff]  ;;  %v25_v38 = vld [vmem:[%s1381_s0 + $0x58] sm:$0xff] }
   0xe   :  { %711 = vmatprep.subr.mxu0 %v87_v6  ;;  %833 = vmatprep.subr.mxu1 %v87_v6  ;;  %v57_v39 = vld [vmem:[%s1381_s0 + $0x158] sm:$0xff]  ;;  %v26_v40 = vld [vmem:[%s1381_s0 + $0x60] sm:$0xff]  ;;  %v27_v42 = vld [vmem:[%s1381_s0 + $0x68] sm:$0xff] }
   0xf   :  { %712 = vmatpush3.msra.mxu0 %v87_v6  ;;  %849 = vmatpush3.msra.mxu1 %v87_v6  ;;  %v58_v41 = vld [vmem:[%s1381_s0 + $0x160] sm:$0xff]  ;;  %v59_v43 = vld [vmem:[%s1381_s0 + $0x168] sm:$0xff]  ;;  %v28_v44 = vld [vmem:[%s1381_s0 + $0x70] sm:$0xff] }
  0x10   :  { %713 = vmatprep.subr.mxu0 %v86_v7  ;;  %834 = vmatprep.subr.mxu1 %v86_v7  ;;  %v60_v45 = vld [vmem:[%s1381_s0 + $0x170] sm:$0xff]  ;;  %v29_v46 = vld [vmem:[%s1381_s0 + $0x78] sm:$0xff]  ;;  %v30_v48 = vld [vmem:[%s1381_s0 + $0x80] sm:$0xff] }
  0x11   :  { %714 = vmatpush3.msra.mxu0 %v86_v7  ;;  %850 = vmatpush3.msra.mxu1 %v86_v7  ;;  %v61_v47 = vld [vmem:[%s1381_s0 + $0x178] sm:$0xff]  ;;  %v62_v49 = vld [vmem:[%s1381_s0 + $0x180] sm:$0xff]  ;;  %v31_v50 = vld [vmem:[%s1381_s0 + $0x88] sm:$0xff] }
  0x12   :  { %715 = vmatprep.subr.mxu0 %v85_v8  ;;  %835 = vmatprep.subr.mxu1 %v85_v8  ;;  %v63_v51 = vld [vmem:[%s1381_s0 + $0x188] sm:$0xff]  ;;  %v32_v52 = vld [vmem:[%s1381_s0 + $0x90] sm:$0xff]  ;;  %v33_v54 = vld [vmem:[%s1381_s0 + $0x98] sm:$0xff] }
  0x13   :  { %716 = vmatpush3.msra.mxu0 %v85_v8  ;;  %851 = vmatpush3.msra.mxu1 %v85_v8  ;;  %v64_v53 = vld [vmem:[%s1381_s0 + $0x190] sm:$0xff]  ;;  %v65_v55 = vld [vmem:[%s1381_s0 + $0x198] sm:$0xff]  ;;  %v34_v56 = vld [vmem:[%s1381_s0 + $0xa0] sm:$0xff] }
  0x14   :  { %717 = vmatprep.subr.mxu0 %v84_v9  ;;  %836 = vmatprep.subr.mxu1 %v84_v9  ;;  %v66_v57 = vld [vmem:[%s1381_s0 + $0x1a0] sm:$0xff]  ;;  %v35_v58 = vld [vmem:[%s1381_s0 + $0xa8] sm:$0xff]  ;;  %v36_v60 = vld [vmem:[%s1381_s0 + $0xb0] sm:$0xff] }
  0x15   :  { %718 = vmatpush3.msra.mxu0 %v84_v9  ;;  %852 = vmatpush3.msra.mxu1 %v84_v9  ;;  %v67_v59 = vld [vmem:[%s1381_s0 + $0x1a8] sm:$0xff]  ;;  %v68_v61 = vld [vmem:[%s1381_s0 + $0x1b0] sm:$0xff]  ;;  %v37_v62 = vld [vmem:[%s1381_s0 + $0xb8] sm:$0xff] }
  0x16   :  { %719 = vmatprep.subr.mxu0 %v83_v10  ;;  %837 = vmatprep.subr.mxu1 %v83_v10  ;;  %v69_v63 = vld [vmem:[%s1381_s0 + $0x1b8] sm:$0xff]  ;;  %v38_v0 = vld [vmem:[%s1381_s0 + $0xc0] sm:$0xff]  ;;  %v39_v2 = vld [vmem:[%s1381_s0 + $0xc8] sm:$0xff] }
  0x17   :  { %720 = vmatpush3.msra.mxu0 %v83_v10  ;;  %853 = vmatpush3.msra.mxu1 %v83_v10  ;;  %v70_v1 = vld [vmem:[%s1381_s0 + $0x1c0] sm:$0xff]  ;;  %v71_v3 = vld [vmem:[%s1381_s0 + $0x1c8] sm:$0xff]  ;;  %v40_v4 = vld [vmem:[%s1381_s0 + $0xd0] sm:$0xff] }
  0x18   :  { %721 = vmatprep.subr.mxu0 %v82_v11  ;;  %838 = vmatprep.subr.mxu1 %v82_v11  ;;  %v72_v5 = vld [vmem:[%s1381_s0 + $0x1d0] sm:$0xff]  ;;  %v41_v6 = vld [vmem:[%s1381_s0 + $0xd8] sm:$0xff]  ;;  %v42_v8 = vld [vmem:[%s1381_s0 + $0xe0] sm:$0xff] }
  0x19   :  { %722 = vmatpush3.msra.mxu0 %v82_v11  ;;  %854 = vmatpush3.msra.mxu1 %v82_v11  ;;  %v73_v7 = vld [vmem:[%s1381_s0 + $0x1d8] sm:$0xff]  ;;  %v74_v9 = vld [vmem:[%s1381_s0 + $0x1e0] sm:$0xff]  ;;  %v43_v10 = vld [vmem:[%s1381_s0 + $0xe8] sm:$0xff] }
  0x1a   :  { %723 = vmatprep.subr.mxu0 %v81_v12  ;;  %839 = vmatprep.subr.mxu1 %v81_v12  ;;  %v75_v11 = vld [vmem:[%s1381_s0 + $0x1e8] sm:$0xff] }
  0x1b   :  { %724 = vmatpush3.msra.mxu0 %v81_v12  ;;  %855 = vmatpush3.msra.mxu1 %v81_v12  ;;  %v44_v12 = vld [vmem:[%s1381_s0 + $0xf0] sm:$0xff] }
  0x1c   :  { %725 = vmatprep.subr.mxu0 %v80_v13  ;;  %840 = vmatprep.subr.mxu1 %v80_v13 }
  0x1d   :  { %726 = vmatpush3.msra.mxu0 %v80_v13  ;;  %856 = vmatpush3.msra.mxu1 %v80_v13  ;;  %v76_v13 = vld [vmem:[%s1381_s0 + $0x1f0] sm:$0xff] }
  0x1e   :  { %727 = vmatprep.subr.mxu0 %v79_v14  ;;  %841 = vmatprep.subr.mxu1 %v79_v14 }
  0x1f   :  { %728 = vmatpush3.msra.mxu0 %v79_v14  ;;  %857 = vmatpush3.msra.mxu1 %v79_v14  ;;  %v45_v14 = vld [vmem:[%s1381_s0 + $0xf8] sm:$0xff] }
  0x20   :  { %729 = vmatprep.subr.mxu0 %v78_v15  ;;  %842 = vmatprep.subr.mxu1 %v78_v15 }
  0x21   :  { %730 = vmatpush3.msra.mxu0 %v78_v15  ;;  %858 = vmatpush3.msra.mxu1 %v78_v15  ;;  %v77_v15 = vld [vmem:[%s1381_s0 + $0x1f8] sm:$0xff] }
  0x22   :  { %731 = vmatprep.mubr.f32.mxu0 %v14_v16  ;;  %779 = vmatprep.mubr.f32.mxu1 %v46_v17  ;;  %v1122_v16 = vld [vmem:[%s1382_s2] ss:$0 sm:$0xff] }
  0x23   :  { %732 = vmatmul.mubr.f32.vlgmr.msra.gmra.mxu0 %v15_v18  ;;  %780 = vmatmul.mubr.f32.vlgmr.msra.gmra.mxu1 %v47_v19 }
  0x24   :  { %734 = vmatprep.mubr.f32.mxu0 %v16_v20  ;;  %782 = vmatprep.mubr.f32.mxu1 %v48_v21 }
  0x27   :  { %735 = vmatmul.mubr.f32.gmra.mxu0 %v17_v22  ;;  %783 = vmatmul.mubr.f32.gmra.mxu1 %v49_v23 }
  0x28   :  { %737 = vmatprep.mubr.f32.mxu0 %v18_v24  ;;  %785 = vmatprep.mubr.f32.mxu1 %v50_v25 }
  0x2b   :  { %738 = vmatmul.mubr.f32.gmra.mxu0 %v19_v26  ;;  %786 = vmatmul.mubr.f32.gmra.mxu1 %v51_v27 }
  0x2c   :  { %740 = vmatprep.mubr.f32.mxu0 %v20_v28  ;;  %788 = vmatprep.mubr.f32.mxu1 %v52_v29 }
  0x2f   :  { %741 = vmatmul.mubr.f32.gmra.mxu0 %v21_v30  ;;  %789 = vmatmul.mubr.f32.gmra.mxu1 %v53_v31 }
  0x30   :  { %743 = vmatprep.mubr.f32.mxu0 %v22_v32  ;;  %791 = vmatprep.mubr.f32.mxu1 %v54_v33 }
  0x33   :  { %744 = vmatmul.mubr.f32.gmra.mxu0 %v23_v34  ;;  %792 = vmatmul.mubr.f32.gmra.mxu1 %v55_v35 }
  0x34   :  { %746 = vmatprep.mubr.f32.mxu0 %v24_v36  ;;  %794 = vmatprep.mubr.f32.mxu1 %v56_v37 }
  0x37   :  { %747 = vmatmul.mubr.f32.gmra.mxu0 %v25_v38  ;;  %795 = vmatmul.mubr.f32.gmra.mxu1 %v57_v39 }
  0x38   :  { %749 = vmatprep.mubr.f32.mxu0 %v26_v40  ;;  %797 = vmatprep.mubr.f32.mxu1 %v58_v41 }
  0x3b   :  { %750 = vmatmul.mubr.f32.gmra.mxu0 %v27_v42  ;;  %798 = vmatmul.mubr.f32.gmra.mxu1 %v59_v43 }
  0x3c   :  { %752 = vmatprep.mubr.f32.mxu0 %v28_v44  ;;  %800 = vmatprep.mubr.f32.mxu1 %v60_v45 }
  0x3f   :  { %753 = vmatmul.mubr.f32.gmra.mxu0 %v29_v46  ;;  %801 = vmatmul.mubr.f32.gmra.mxu1 %v61_v47 }
  0x40   :  { %755 = vmatprep.mubr.f32.mxu0 %v30_v48  ;;  %803 = vmatprep.mubr.f32.mxu1 %v62_v49 }
  0x43   :  { %756 = vmatmul.mubr.f32.gmra.mxu0 %v31_v50  ;;  %804 = vmatmul.mubr.f32.gmra.mxu1 %v63_v51 }
  0x44   :  { %758 = vmatprep.mubr.f32.mxu0 %v32_v52  ;;  %806 = vmatprep.mubr.f32.mxu1 %v64_v53 }
  0x47   :  { %759 = vmatmul.mubr.f32.gmra.mxu0 %v33_v54  ;;  %807 = vmatmul.mubr.f32.gmra.mxu1 %v65_v55 }
  0x48   :  { %761 = vmatprep.mubr.f32.mxu0 %v34_v56  ;;  %809 = vmatprep.mubr.f32.mxu1 %v66_v57 }
  0x4b   :  { %762 = vmatmul.mubr.f32.gmra.mxu0 %v35_v58  ;;  %810 = vmatmul.mubr.f32.gmra.mxu1 %v67_v59 }
  0x4c   :  { %764 = vmatprep.mubr.f32.mxu0 %v36_v60  ;;  %812 = vmatprep.mubr.f32.mxu1 %v68_v61 }
  0x4f   :  { %765 = vmatmul.mubr.f32.gmra.mxu0 %v37_v62  ;;  %813 = vmatmul.mubr.f32.gmra.mxu1 %v69_v63 }
  0x50   :  { %767 = vmatprep.mubr.f32.mxu0 %v38_v0  ;;  %815 = vmatprep.mubr.f32.mxu1 %v70_v1 }
  0x53   :  { %768 = vmatmul.mubr.f32.gmra.mxu0 %v39_v2  ;;  %816 = vmatmul.mubr.f32.gmra.mxu1 %v71_v3 }
  0x54   :  { %770 = vmatprep.mubr.f32.mxu0 %v40_v4  ;;  %818 = vmatprep.mubr.f32.mxu1 %v72_v5 }
  0x57   :  { %771 = vmatmul.mubr.f32.gmra.mxu0 %v41_v6  ;;  %819 = vmatmul.mubr.f32.gmra.mxu1 %v73_v7 }
  0x58   :  { %773 = vmatprep.mubr.f32.mxu0 %v42_v8  ;;  %821 = vmatprep.mubr.f32.mxu1 %v74_v9 }
  0x5b   :  { %774 = vmatmul.mubr.f32.gmra.mxu0 %v43_v10  ;;  %822 = vmatmul.mubr.f32.gmra.mxu1 %v75_v11 }
  0x5c   :  { %776 = vmatprep.mubr.f32.mxu0 %v44_v12  ;;  %824 = vmatprep.mubr.f32.mxu1 %v76_v13 }
  0x5f   :  { %777 = vmatmul.mubr.f32.gmra.mxu0 %v45_v14  ;;  %825 = vmatmul.mubr.f32.gmra.mxu1 %v77_v15 }
  0xe3   :  { %v733_v17 = vpop.f32.mrf.mxu0  ;;  %v781_v18 = vpop.f32.mrf.mxu1 }
  0xe4   :  { %v173_v19 = vadd.f32 %v733_v17, %v1122_v16  ;;  %v333_v20 = vadd.f32 %v781_v18, %v1122_v16 }
  0xe5   :  { %v167_v21 = vpop.f32.mrf.mxu0  ;;  %v327_v22 = vpop.f32.mrf.mxu1 }
  0xe6   :  { %v487_v23 = vmax.f32 %v173_v19, 0.0  ;;  %v519_v24 = vmax.f32 %v333_v20, 0.0  ;;  %v168_v25 = vadd.f32 %v1122_v16, %v167_v21  ;;  %v328_v26 = vadd.f32 %v1122_v16, %v327_v22 }
  0xe7   :  { %v736_v27 = vpop.f32.mrf.mxu0  ;;  %v784_v28 = vpop.f32.mrf.mxu1 }
  0xe8   :  { %551 = vst [vmem:[%s1383_s3 + $0x8] sm:$0xff] %v487_v23  ;;  %583 = vst [vmem:[%s1383_s3 + $0x108] sm:$0xff] %v519_v24  ;;  %v486_v29 = vmax.f32 %v168_v25, 0.0  ;;  %v518_v30 = vmax.f32 %v328_v26, 0.0  ;;  %v183_v31 = vadd.f32 %v736_v27, %v1122_v16  ;;  %v343_v32 = vadd.f32 %v784_v28, %v1122_v16 }
  0xe9   :  { %v177_v33 = vpop.f32.mrf.mxu0  ;;  %v337_v34 = vpop.f32.mrf.mxu1 }
  0xea   :  { %550 = vst [vmem:[%s1383_s3] sm:$0xff] %v486_v29  ;;  %582 = vst [vmem:[%s1383_s3 + $0x100] sm:$0xff] %v518_v30  ;;  %v489_v35 = vmax.f32 %v183_v31, 0.0  ;;  %v521_v36 = vmax.f32 %v343_v32, 0.0  ;;  %v178_v37 = vadd.f32 %v1122_v16, %v177_v33  ;;  %v338_v38 = vadd.f32 %v1122_v16, %v337_v34 }
  0xeb   :  { %v739_v39 = vpop.f32.mrf.mxu0  ;;  %v787_v40 = vpop.f32.mrf.mxu1 }
  0xec   :  { %553 = vst [vmem:[%s1383_s3 + $0x18] sm:$0xff] %v489_v35  ;;  %585 = vst [vmem:[%s1383_s3 + $0x118] sm:$0xff] %v521_v36  ;;  %v488_v41 = vmax.f32 %v178_v37, 0.0  ;;  %v520_v42 = vmax.f32 %v338_v38, 0.0  ;;  %v193_v43 = vadd.f32 %v739_v39, %v1122_v16  ;;  %v353_v44 = vadd.f32 %v787_v40, %v1122_v16 }
  0xed   :  { %v187_v45 = vpop.f32.mrf.mxu0  ;;  %v347_v46 = vpop.f32.mrf.mxu1 }
  0xee   :  { %552 = vst [vmem:[%s1383_s3 + $0x10] sm:$0xff] %v488_v41  ;;  %584 = vst [vmem:[%s1383_s3 + $0x110] sm:$0xff] %v520_v42  ;;  %v491_v47 = vmax.f32 %v193_v43, 0.0  ;;  %v523_v48 = vmax.f32 %v353_v44, 0.0  ;;  %v188_v49 = vadd.f32 %v1122_v16, %v187_v45  ;;  %v348_v50 = vadd.f32 %v1122_v16, %v347_v46 }
  0xef   :  { %v742_v51 = vpop.f32.mrf.mxu0  ;;  %v790_v52 = vpop.f32.mrf.mxu1 }
  0xf0   :  { %555 = vst [vmem:[%s1383_s3 + $0x28] sm:$0xff] %v491_v47  ;;  %587 = vst [vmem:[%s1383_s3 + $0x128] sm:$0xff] %v523_v48  ;;  %v490_v53 = vmax.f32 %v188_v49, 0.0  ;;  %v522_v54 = vmax.f32 %v348_v50, 0.0  ;;  %v203_v55 = vadd.f32 %v742_v51, %v1122_v16  ;;  %v363_v56 = vadd.f32 %v790_v52, %v1122_v16 }
  0xf1   :  { %v197_v57 = vpop.f32.mrf.mxu0  ;;  %v357_v58 = vpop.f32.mrf.mxu1 }
  0xf2   :  { %554 = vst [vmem:[%s1383_s3 + $0x20] sm:$0xff] %v490_v53  ;;  %586 = vst [vmem:[%s1383_s3 + $0x120] sm:$0xff] %v522_v54  ;;  %v493_v59 = vmax.f32 %v203_v55, 0.0  ;;  %v525_v60 = vmax.f32 %v363_v56, 0.0  ;;  %v198_v61 = vadd.f32 %v1122_v16, %v197_v57  ;;  %v358_v62 = vadd.f32 %v1122_v16, %v357_v58 }
  0xf3   :  { %v745_v63 = vpop.f32.mrf.mxu0  ;;  %v793_v0 = vpop.f32.mrf.mxu1 }
  0xf4   :  { %557 = vst [vmem:[%s1383_s3 + $0x38] sm:$0xff] %v493_v59  ;;  %589 = vst [vmem:[%s1383_s3 + $0x138] sm:$0xff] %v525_v60  ;;  %v492_v1 = vmax.f32 %v198_v61, 0.0  ;;  %v524_v2 = vmax.f32 %v358_v62, 0.0  ;;  %v213_v3 = vadd.f32 %v745_v63, %v1122_v16  ;;  %v373_v4 = vadd.f32 %v793_v0, %v1122_v16 }
  0xf5   :  { %v207_v5 = vpop.f32.mrf.mxu0  ;;  %v367_v6 = vpop.f32.mrf.mxu1 }
  0xf6   :  { %556 = vst [vmem:[%s1383_s3 + $0x30] sm:$0xff] %v492_v1  ;;  %588 = vst [vmem:[%s1383_s3 + $0x130] sm:$0xff] %v524_v2  ;;  %v495_v7 = vmax.f32 %v213_v3, 0.0  ;;  %v527_v8 = vmax.f32 %v373_v4, 0.0  ;;  %v208_v9 = vadd.f32 %v1122_v16, %v207_v5  ;;  %v368_v10 = vadd.f32 %v1122_v16, %v367_v6 }
  0xf7   :  { %v748_v11 = vpop.f32.mrf.mxu0  ;;  %v796_v12 = vpop.f32.mrf.mxu1 }
  0xf8   :  { %559 = vst [vmem:[%s1383_s3 + $0x48] sm:$0xff] %v495_v7  ;;  %591 = vst [vmem:[%s1383_s3 + $0x148] sm:$0xff] %v527_v8  ;;  %v494_v13 = vmax.f32 %v208_v9, 0.0  ;;  %v526_v14 = vmax.f32 %v368_v10, 0.0  ;;  %v223_v15 = vadd.f32 %v748_v11, %v1122_v16  ;;  %v383_v17 = vadd.f32 %v796_v12, %v1122_v16 }
  0xf9   :  { %v217_v18 = vpop.f32.mrf.mxu0  ;;  %v377_v19 = vpop.f32.mrf.mxu1 }
  0xfa   :  { %558 = vst [vmem:[%s1383_s3 + $0x40] sm:$0xff] %v494_v13  ;;  %590 = vst [vmem:[%s1383_s3 + $0x140] sm:$0xff] %v526_v14  ;;  %v497_v20 = vmax.f32 %v223_v15, 0.0  ;;  %v529_v21 = vmax.f32 %v383_v17, 0.0  ;;  %v218_v22 = vadd.f32 %v1122_v16, %v217_v18  ;;  %v378_v23 = vadd.f32 %v1122_v16, %v377_v19 }
  0xfb   :  { %v751_v24 = vpop.f32.mrf.mxu0  ;;  %v799_v25 = vpop.f32.mrf.mxu1 }
  0xfc   :  { %561 = vst [vmem:[%s1383_s3 + $0x58] sm:$0xff] %v497_v20  ;;  %593 = vst [vmem:[%s1383_s3 + $0x158] sm:$0xff] %v529_v21  ;;  %v496_v26 = vmax.f32 %v218_v22, 0.0  ;;  %v528_v27 = vmax.f32 %v378_v23, 0.0  ;;  %v233_v28 = vadd.f32 %v751_v24, %v1122_v16  ;;  %v393_v29 = vadd.f32 %v799_v25, %v1122_v16 }
  0xfd   :  { %v227_v30 = vpop.f32.mrf.mxu0  ;;  %v387_v31 = vpop.f32.mrf.mxu1 }
  0xfe   :  { %560 = vst [vmem:[%s1383_s3 + $0x50] sm:$0xff] %v496_v26  ;;  %592 = vst [vmem:[%s1383_s3 + $0x150] sm:$0xff] %v528_v27  ;;  %v499_v32 = vmax.f32 %v233_v28, 0.0  ;;  %v531_v33 = vmax.f32 %v393_v29, 0.0  ;;  %v228_v34 = vadd.f32 %v1122_v16, %v227_v30  ;;  %v388_v35 = vadd.f32 %v1122_v16, %v387_v31 }
  0xff   :  { %v754_v36 = vpop.f32.mrf.mxu0  ;;  %v802_v37 = vpop.f32.mrf.mxu1 }
 0x100   :  { %563 = vst [vmem:[%s1383_s3 + $0x68] sm:$0xff] %v499_v32  ;;  %595 = vst [vmem:[%s1383_s3 + $0x168] sm:$0xff] %v531_v33  ;;  %v498_v38 = vmax.f32 %v228_v34, 0.0  ;;  %v530_v39 = vmax.f32 %v388_v35, 0.0  ;;  %v243_v40 = vadd.f32 %v754_v36, %v1122_v16  ;;  %v403_v41 = vadd.f32 %v802_v37, %v1122_v16 }
 0x101   :  { %v237_v42 = vpop.f32.mrf.mxu0  ;;  %v397_v43 = vpop.f32.mrf.mxu1 }
 0x102   :  { %562 = vst [vmem:[%s1383_s3 + $0x60] sm:$0xff] %v498_v38  ;;  %594 = vst [vmem:[%s1383_s3 + $0x160] sm:$0xff] %v530_v39  ;;  %v501_v44 = vmax.f32 %v243_v40, 0.0  ;;  %v533_v45 = vmax.f32 %v403_v41, 0.0  ;;  %v238_v46 = vadd.f32 %v1122_v16, %v237_v42  ;;  %v398_v47 = vadd.f32 %v1122_v16, %v397_v43 }
 0x103   :  { %v757_v48 = vpop.f32.mrf.mxu0  ;;  %v805_v49 = vpop.f32.mrf.mxu1 }
 0x104   :  { %565 = vst [vmem:[%s1383_s3 + $0x78] sm:$0xff] %v501_v44  ;;  %597 = vst [vmem:[%s1383_s3 + $0x178] sm:$0xff] %v533_v45  ;;  %v500_v50 = vmax.f32 %v238_v46, 0.0  ;;  %v532_v51 = vmax.f32 %v398_v47, 0.0  ;;  %v253_v52 = vadd.f32 %v757_v48, %v1122_v16  ;;  %v413_v53 = vadd.f32 %v805_v49, %v1122_v16 }
 0x105   :  { %v247_v54 = vpop.f32.mrf.mxu0  ;;  %v407_v55 = vpop.f32.mrf.mxu1 }
 0x106   :  { %564 = vst [vmem:[%s1383_s3 + $0x70] sm:$0xff] %v500_v50  ;;  %596 = vst [vmem:[%s1383_s3 + $0x170] sm:$0xff] %v532_v51  ;;  %v503_v56 = vmax.f32 %v253_v52, 0.0  ;;  %v535_v57 = vmax.f32 %v413_v53, 0.0  ;;  %v248_v58 = vadd.f32 %v1122_v16, %v247_v54  ;;  %v408_v59 = vadd.f32 %v1122_v16, %v407_v55 }
 0x107   :  { %v760_v60 = vpop.f32.mrf.mxu0  ;;  %v808_v61 = vpop.f32.mrf.mxu1 }
 0x108   :  { %567 = vst [vmem:[%s1383_s3 + $0x88] sm:$0xff] %v503_v56  ;;  %599 = vst [vmem:[%s1383_s3 + $0x188] sm:$0xff] %v535_v57  ;;  %v502_v62 = vmax.f32 %v248_v58, 0.0  ;;  %v534_v63 = vmax.f32 %v408_v59, 0.0  ;;  %v263_v0 = vadd.f32 %v760_v60, %v1122_v16  ;;  %v423_v1 = vadd.f32 %v808_v61, %v1122_v16 }
 0x109   :  { %v257_v2 = vpop.f32.mrf.mxu0  ;;  %v417_v3 = vpop.f32.mrf.mxu1 }
 0x10a   :  { %566 = vst [vmem:[%s1383_s3 + $0x80] sm:$0xff] %v502_v62  ;;  %598 = vst [vmem:[%s1383_s3 + $0x180] sm:$0xff] %v534_v63  ;;  %v505_v4 = vmax.f32 %v263_v0, 0.0  ;;  %v537_v5 = vmax.f32 %v423_v1, 0.0  ;;  %v258_v6 = vadd.f32 %v1122_v16, %v257_v2  ;;  %v418_v7 = vadd.f32 %v1122_v16, %v417_v3 }
 0x10b   :  { %v763_v8 = vpop.f32.mrf.mxu0  ;;  %v811_v9 = vpop.f32.mrf.mxu1 }
 0x10c   :  { %569 = vst [vmem:[%s1383_s3 + $0x98] sm:$0xff] %v505_v4  ;;  %601 = vst [vmem:[%s1383_s3 + $0x198] sm:$0xff] %v537_v5  ;;  %v504_v10 = vmax.f32 %v258_v6, 0.0  ;;  %v536_v11 = vmax.f32 %v418_v7, 0.0  ;;  %v273_v12 = vadd.f32 %v763_v8, %v1122_v16  ;;  %v433_v13 = vadd.f32 %v811_v9, %v1122_v16 }
 0x10d   :  { %v267_v14 = vpop.f32.mrf.mxu0  ;;  %v427_v15 = vpop.f32.mrf.mxu1 }
 0x10e   :  { %568 = vst [vmem:[%s1383_s3 + $0x90] sm:$0xff] %v504_v10  ;;  %600 = vst [vmem:[%s1383_s3 + $0x190] sm:$0xff] %v536_v11  ;;  %v507_v17 = vmax.f32 %v273_v12, 0.0  ;;  %v539_v18 = vmax.f32 %v433_v13, 0.0  ;;  %v268_v19 = vadd.f32 %v1122_v16, %v267_v14  ;;  %v428_v20 = vadd.f32 %v1122_v16, %v427_v15 }
 0x10f   :  { %v766_v21 = vpop.f32.mrf.mxu0  ;;  %v814_v22 = vpop.f32.mrf.mxu1 }
 0x110   :  { %571 = vst [vmem:[%s1383_s3 + $0xa8] sm:$0xff] %v507_v17  ;;  %603 = vst [vmem:[%s1383_s3 + $0x1a8] sm:$0xff] %v539_v18  ;;  %v506_v23 = vmax.f32 %v268_v19, 0.0  ;;  %v538_v24 = vmax.f32 %v428_v20, 0.0  ;;  %v283_v25 = vadd.f32 %v766_v21, %v1122_v16  ;;  %v443_v26 = vadd.f32 %v814_v22, %v1122_v16 }
 0x111   :  { %v277_v27 = vpop.f32.mrf.mxu0  ;;  %v437_v28 = vpop.f32.mrf.mxu1 }
 0x112   :  { %570 = vst [vmem:[%s1383_s3 + $0xa0] sm:$0xff] %v506_v23  ;;  %602 = vst [vmem:[%s1383_s3 + $0x1a0] sm:$0xff] %v538_v24  ;;  %v509_v29 = vmax.f32 %v283_v25, 0.0  ;;  %v541_v30 = vmax.f32 %v443_v26, 0.0  ;;  %v278_v31 = vadd.f32 %v1122_v16, %v277_v27  ;;  %v438_v32 = vadd.f32 %v1122_v16, %v437_v28 }
 0x113   :  { %v769_v33 = vpop.f32.mrf.mxu0  ;;  %v817_v34 = vpop.f32.mrf.mxu1 }
 0x114   :  { %573 = vst [vmem:[%s1383_s3 + $0xb8] sm:$0xff] %v509_v29  ;;  %605 = vst [vmem:[%s1383_s3 + $0x1b8] sm:$0xff] %v541_v30  ;;  %v508_v35 = vmax.f32 %v278_v31, 0.0  ;;  %v540_v36 = vmax.f32 %v438_v32, 0.0  ;;  %v293_v37 = vadd.f32 %v769_v33, %v1122_v16  ;;  %v453_v38 = vadd.f32 %v817_v34, %v1122_v16 }
 0x115   :  { %v287_v39 = vpop.f32.mrf.mxu0  ;;  %v447_v40 = vpop.f32.mrf.mxu1 }
 0x116   :  { %572 = vst [vmem:[%s1383_s3 + $0xb0] sm:$0xff] %v508_v35  ;;  %604 = vst [vmem:[%s1383_s3 + $0x1b0] sm:$0xff] %v540_v36  ;;  %v511_v41 = vmax.f32 %v293_v37, 0.0  ;;  %v543_v42 = vmax.f32 %v453_v38, 0.0  ;;  %v288_v43 = vadd.f32 %v1122_v16, %v287_v39  ;;  %v448_v44 = vadd.f32 %v1122_v16, %v447_v40 }
 0x117   :  { %v772_v45 = vpop.f32.mrf.mxu0  ;;  %v820_v46 = vpop.f32.mrf.mxu1 }
 0x118   :  { %575 = vst [vmem:[%s1383_s3 + $0xc8] sm:$0xff] %v511_v41  ;;  %607 = vst [vmem:[%s1383_s3 + $0x1c8] sm:$0xff] %v543_v42  ;;  %v510_v47 = vmax.f32 %v288_v43, 0.0  ;;  %v542_v48 = vmax.f32 %v448_v44, 0.0  ;;  %v303_v49 = vadd.f32 %v772_v45, %v1122_v16  ;;  %v463_v50 = vadd.f32 %v820_v46, %v1122_v16 }
 0x119   :  { %v297_v51 = vpop.f32.mrf.mxu0  ;;  %v457_v52 = vpop.f32.mrf.mxu1 }
 0x11a   :  { %574 = vst [vmem:[%s1383_s3 + $0xc0] sm:$0xff] %v510_v47  ;;  %606 = vst [vmem:[%s1383_s3 + $0x1c0] sm:$0xff] %v542_v48  ;;  %v513_v53 = vmax.f32 %v303_v49, 0.0  ;;  %v545_v54 = vmax.f32 %v463_v50, 0.0  ;;  %v298_v55 = vadd.f32 %v1122_v16, %v297_v51  ;;  %v458_v56 = vadd.f32 %v1122_v16, %v457_v52 }
 0x11b   :  { %v775_v57 = vpop.f32.mrf.mxu0  ;;  %v823_v58 = vpop.f32.mrf.mxu1 }
 0x11c   :  { %577 = vst [vmem:[%s1383_s3 + $0xd8] sm:$0xff] %v513_v53  ;;  %609 = vst [vmem:[%s1383_s3 + $0x1d8] sm:$0xff] %v545_v54  ;;  %v512_v59 = vmax.f32 %v298_v55, 0.0  ;;  %v544_v60 = vmax.f32 %v458_v56, 0.0  ;;  %v313_v61 = vadd.f32 %v775_v57, %v1122_v16  ;;  %v473_v62 = vadd.f32 %v823_v58, %v1122_v16 }
 0x11d   :  { %v307_v63 = vpop.f32.mrf.mxu0  ;;  %v467_v0 = vpop.f32.mrf.mxu1 }
 0x11e   :  { %576 = vst [vmem:[%s1383_s3 + $0xd0] sm:$0xff] %v512_v59  ;;  %608 = vst [vmem:[%s1383_s3 + $0x1d0] sm:$0xff] %v544_v60  ;;  %v515_v1 = vmax.f32 %v313_v61, 0.0  ;;  %v547_v2 = vmax.f32 %v473_v62, 0.0  ;;  %v308_v3 = vadd.f32 %v1122_v16, %v307_v63  ;;  %v468_v4 = vadd.f32 %v1122_v16, %v467_v0 }
 0x11f   :  { %v778_v5 = vpop.f32.mrf.mxu0  ;;  %v826_v6 = vpop.f32.mrf.mxu1 }
 0x120   :  { %579 = vst [vmem:[%s1383_s3 + $0xe8] sm:$0xff] %v515_v1  ;;  %611 = vst [vmem:[%s1383_s3 + $0x1e8] sm:$0xff] %v547_v2  ;;  %v514_v7 = vmax.f32 %v308_v3, 0.0  ;;  %v546_v8 = vmax.f32 %v468_v4, 0.0  ;;  %v323_v9 = vadd.f32 %v778_v5, %v1122_v16  ;;  %v483_v10 = vadd.f32 %v826_v6, %v1122_v16 }
 0x121   :  { %v317_v11 = vpop.f32.mrf.mxu0  ;;  %v477_v12 = vpop.f32.mrf.mxu1 }
 0x122   :  { %578 = vst [vmem:[%s1383_s3 + $0xe0] sm:$0xff] %v514_v7  ;;  %610 = vst [vmem:[%s1383_s3 + $0x1e0] sm:$0xff] %v546_v8  ;;  %v517_v13 = vmax.f32 %v323_v9, 0.0  ;;  %v549_v14 = vmax.f32 %v483_v10, 0.0  ;;  %v318_v15 = vadd.f32 %v1122_v16, %v317_v11  ;;  %v478_v17 = vadd.f32 %v1122_v16, %v477_v12 }
 0x124   :  { %581 = vst [vmem:[%s1383_s3 + $0xf8] sm:$0xff] %v517_v13  ;;  %613 = vst [vmem:[%s1383_s3 + $0x1f8] sm:$0xff] %v549_v14  ;;  %v516_v18 = vmax.f32 %v318_v15, 0.0  ;;  %v548_v19 = vmax.f32 %v478_v17, 0.0 }
 0x126   :  { %580 = vst [vmem:[%s1383_s3 + $0xf0] sm:$0xff] %v516_v18  ;;  %612 = vst [vmem:[%s1383_s3 + $0x1f0] sm:$0xff] %v548_v19 }

// kernel: kfla_forward_sample.7
= control target key start
LH: loop header
LB: loop body
LE: loop exit
PB: predicated region body
PF: predicated region fallthrough
CT: control target
= control target key end

     0   :  { %s1027_s12 = smov 0   ;;  %s1029_s13 = smov 0   ;;  %s1212_s0 = inlined_call_operand.vmem [shape: f32[8,2048], index: 0, kind: input, shape index: {}]   ;;  %s1213_s1 = inlined_call_operand.vmem [shape: f32[2048,128], index: 1, kind: input, shape index: {}]   ;;  %s1214_s2 = inlined_call_operand.vmem [shape: f32[1,128], index: 2, kind: input, shape index: {}]   ;;  %s1215_s3 = inlined_call_operand.vmem [shape: f32[8,128], index: 3, kind: output, shape index: {}]  }
   0x1   :  { %s1031_s14 = smov 0  }
   0x2 LB: > { %s25_s15 = sadd.s32 1, %s1000_s13  ;;  %p806_p0 = scmp.ge.s32.totalorder %s1004_s14, 1  ;;  %s1004_s14 = sphi %s1031_s14, %s13_s14   ;;  %s1000_s13 = sphi %s1029_s13, %s1217_s13   ;;  %s996_s12 = sphi %s1027_s12, %s1216_s12  }
   0x3   : > { %p26_p1 = scmp.ge.s32.totalorder %s25_s15, 2  ;;  %p189_p2 = scmp.lt.s32.totalorder %s1004_s14, 3 }
   0x5   : > { %s1219_s15 = smov (%p26_p1, %s25_s15), 0  ;;  %p190_p3 = pnand %p806_p0, %p189_p2 }
   0x6   : > { %s807_s16 = sshll.u32 (!%p190_p3), %s996_s12, 3  ;;  %s809_s17 = sshll.u32 (!%p190_p3), %s996_s12, 7 }
   0x7   : > { %193 = sbr.rel (%p190_p3) target bundleno = 305 (0x131), region = 32  ;;  %p233_p4 = scmp.lt.s32.totalorder (!%p190_p3), %s807_s16, 15 }
   0x8   : > { %p241_p5 = scmp.lt.s32.totalorder (!%p190_p3), %s809_s17, 255  ;;  %p811_p6 = scmp.ne.s32.totalorder (!%p190_p3), %s996_s12, 0 }
   0xc   : > { %s1221_s16 = smov (!%p233_p4, %s807_s16), 15  ;;  %s1223_s17 = smov (!%p241_p5, %s809_s17), 255 }
   0xd   : > { %s808_s18 = sshll.u32 %s1221_s16, 3  ;;  %s810_s22 = sshll.u32 %s1223_s17, 3 }
   0xe   : > { %s1052_s21 = scalar_lea.vmem %s1212_s0, %s808_s18  ;;  %s1057_s25 = scalar_lea.vmem %s1213_s1, %s810_s22 }
   0xf   : > { %262 = sbr.rel (%p811_p6) target bundleno = 22 (0x16), region = 36 }
  0x14   : > { %v1006_v0 = vmov 0.0  }
  0x15   : > { %263 = vst [vmem:[#allocation2] sm:$0xff] %v1006_v0 }
  0x16 PF: > { %v304_v1 = vld [vmem:[%s1057_s25 + $0xf8] sm:$0xff]  ;;  %v303_v5 = vld [vmem:[%s1057_s25 + $0xf0] sm:$0xff]  ;;  %v302_v9 = vld [vmem:[%s1057_s25 + $0xe8] sm:$0xff]  ;;  %p812_p7 = scmp.ne.s32.totalorder %s996_s12, 1 }
  0x17   : > { %v336_v2 = vld [vmem:[%s1057_s25 + $0x1f8] sm:$0xff]  ;;  %817 = vmatprep.subr.mxu0 %v304_v1  ;;  %v335_v6 = vld [vmem:[%s1057_s25 + $0x1f0] sm:$0xff]  ;;  %v334_v10 = vld [vmem:[%s1057_s25 + $0x1e8] sm:$0xff] }
  0x18   : > { %v288_v3 = vld [vmem:[%s1057_s25 + $0x78] sm:$0xff]  ;;  %852 = vmatprep.subr.mxu1 %v336_v2  ;;  %v287_v7 = vld [vmem:[%s1057_s25 + $0x70] sm:$0xff]  ;;  %v286_v11 = vld [vmem:[%s1057_s25 + $0x68] sm:$0xff] }
  0x19   : > { %v320_v4 = vld [vmem:[%s1057_s25 + $0x178] sm:$0xff]  ;;  %818 = vmatpush3.msra.mxu0 %v288_v3  ;;  %v319_v8 = vld [vmem:[%s1057_s25 + $0x170] sm:$0xff]  ;;  %v318_v12 = vld [vmem:[%s1057_s25 + $0x168] sm:$0xff] }
  0x1a   : > { %853 = vmatpush3.msra.mxu1 %v320_v4  ;;  %819 = vmatprep.subr.mxu0 %v303_v5  ;;  %v301_v13 = vld [vmem:[%s1057_s25 + $0xe0] sm:$0xff]  ;;  %v300_v17 = vld [vmem:[%s1057_s25 + $0xd8] sm:$0xff]  ;;  %v299_v21 = vld [vmem:[%s1057_s25 + $0xd0] sm:$0xff] }
  0x1b   : > { %854 = vmatprep.subr.mxu1 %v335_v6  ;;  %820 = vmatpush3.msra.mxu0 %v287_v7  ;;  %v333_v14 = vld [vmem:[%s1057_s25 + $0x1e0] sm:$0xff]  ;;  %v332_v18 = vld [vmem:[%s1057_s25 + $0x1d8] sm:$0xff]  ;;  %v331_v22 = vld [vmem:[%s1057_s25 + $0x1d0] sm:$0xff] }
  0x1c   : > { %855 = vmatpush3.msra.mxu1 %v319_v8  ;;  %821 = vmatprep.subr.mxu0 %v302_v9  ;;  %v285_v15 = vld [vmem:[%s1057_s25 + $0x60] sm:$0xff]  ;;  %v284_v19 = vld [vmem:[%s1057_s25 + $0x58] sm:$0xff]  ;;  %v283_v23 = vld [vmem:[%s1057_s25 + $0x50] sm:$0xff] }
  0x1d   : > { %856 = vmatprep.subr.mxu1 %v334_v10  ;;  %v317_v16 = vld [vmem:[%s1057_s25 + $0x160] sm:$0xff]  ;;  %822 = vmatpush3.msra.mxu0 %v286_v11  ;;  %v316_v20 = vld [vmem:[%s1057_s25 + $0x158] sm:$0xff]  ;;  %v315_v24 = vld [vmem:[%s1057_s25 + $0x150] sm:$0xff] }
  0x1e   : > { %857 = vmatpush3.msra.mxu1 %v318_v12  ;;  %823 = vmatprep.subr.mxu0 %v301_v13  ;;  %v298_v25 = vld [vmem:[%s1057_s25 + $0xc8] sm:$0xff]  ;;  %v297_v29 = vld [vmem:[%s1057_s25 + $0xc0] sm:$0xff]  ;;  %v296_v33 = vld [vmem:[%s1057_s25 + $0xb8] sm:$0xff] }
  0x1f   : > { %858 = vmatprep.subr.mxu1 %v333_v14  ;;  %824 = vmatpush3.msra.mxu0 %v285_v15  ;;  %v330_v26 = vld [vmem:[%s1057_s25 + $0x1c8] sm:$0xff]  ;;  %v329_v30 = vld [vmem:[%s1057_s25 + $0x1c0] sm:$0xff]  ;;  %v328_v34 = vld [vmem:[%s1057_s25 + $0x1b8] sm:$0xff] }
  0x20   : > { %859 = vmatpush3.msra.mxu1 %v317_v16  ;;  %825 = vmatprep.subr.mxu0 %v300_v17  ;;  %v282_v27 = vld [vmem:[%s1057_s25 + $0x48] sm:$0xff]  ;;  %v281_v31 = vld [vmem:[%s1057_s25 + $0x40] sm:$0xff]  ;;  %v280_v35 = vld [vmem:[%s1057_s25 + $0x38] sm:$0xff] }
  0x21   : > { %860 = vmatprep.subr.mxu1 %v332_v18  ;;  %826 = vmatpush3.msra.mxu0 %v284_v19  ;;  %v314_v28 = vld [vmem:[%s1057_s25 + $0x148] sm:$0xff]  ;;  %v313_v32 = vld [vmem:[%s1057_s25 + $0x140] sm:$0xff]  ;;  %v312_v36 = vld [vmem:[%s1057_s25 + $0x138] sm:$0xff] }
  0x22   : > { %861 = vmatpush3.msra.mxu1 %v316_v20  ;;  %827 = vmatprep.subr.mxu0 %v299_v21  ;;  %v295_v37 = vld [vmem:[%s1057_s25 + $0xb0] sm:$0xff]  ;;  %v294_v41 = vld [vmem:[%s1057_s25 + $0xa8] sm:$0xff]  ;;  %v293_v45 = vld [vmem:[%s1057_s25 + $0xa0] sm:$0xff] }
  0x23   : > { %862 = vmatprep.subr.mxu1 %v331_v22  ;;  %828 = vmatpush3.msra.mxu0 %v283_v23  ;;  %v327_v38 = vld [vmem:[%s1057_s25 + $0x1b0] sm:$0xff]  ;;  %v326_v42 = vld [vmem:[%s1057_s25 + $0x1a8] sm:$0xff]  ;;  %v325_v46 = vld [vmem:[%s1057_s25 + $0x1a0] sm:$0xff] }
  0x24   : > { %863 = vmatpush3.msra.mxu1 %v315_v24  ;;  %829 = vmatprep.subr.mxu0 %v298_v25  ;;  %v279_v39 = vld [vmem:[%s1057_s25 + $0x30] sm:$0xff]  ;;  %v278_v43 = vld [vmem:[%s1057_s25 + $0x28] sm:$0xff]  ;;  %v277_v47 = vld [vmem:[%s1057_s25 + $0x20] sm:$0xff] }
  0x25   : > { %864 = vmatprep.subr.mxu1 %v330_v26  ;;  %830 = vmatpush3.msra.mxu0 %v282_v27  ;;  %v311_v40 = vld [vmem:[%s1057_s25 + $0x130] sm:$0xff]  ;;  %v310_v44 = vld [vmem:[%s1057_s25 + $0x128] sm:$0xff]  ;;  %v309_v48 = vld [vmem:[%s1057_s25 + $0x120] sm:$0xff] }
  0x26   : > { %865 = vmatpush3.msra.mxu1 %v314_v28  ;;  %831 = vmatprep.subr.mxu0 %v297_v29  ;;  %v292_v49 = vld [vmem:[%s1057_s25 + $0x98] sm:$0xff]  ;;  %v291_v53 = vld [vmem:[%s1057_s25 + $0x90] sm:$0xff]  ;;  %v290_v57 = vld [vmem:[%s1057_s25 + $0x88] sm:$0xff] }
  0x27   : > { %866 = vmatprep.subr.mxu1 %v329_v30  ;;  %832 = vmatpush3.msra.mxu0 %v281_v31  ;;  %v324_v50 = vld [vmem:[%s1057_s25 + $0x198] sm:$0xff]  ;;  %v323_v54 = vld [vmem:[%s1057_s25 + $0x190] sm:$0xff]  ;;  %v322_v58 = vld [vmem:[%s1057_s25 + $0x188] sm:$0xff] }
  0x28   : > { %867 = vmatpush3.msra.mxu1 %v313_v32  ;;  %833 = vmatprep.subr.mxu0 %v296_v33  ;;  %v276_v51 = vld [vmem:[%s1057_s25 + $0x18] sm:$0xff]  ;;  %v275_v55 = vld [vmem:[%s1057_s25 + $0x10] sm:$0xff]  ;;  %v274_v59 = vld [vmem:[%s1057_s25 + $0x8] sm:$0xff] }
  0x29   : > { %868 = vmatprep.subr.mxu1 %v328_v34  ;;  %834 = vmatpush3.msra.mxu0 %v280_v35  ;;  %v308_v52 = vld [vmem:[%s1057_s25 + $0x118] sm:$0xff]  ;;  %v307_v56 = vld [vmem:[%s1057_s25 + $0x110] sm:$0xff]  ;;  %v306_v60 = vld [vmem:[%s1057_s25 + $0x108] sm:$0xff] }
  0x2a   : > { %869 = vmatpush3.msra.mxu1 %v312_v36  ;;  %835 = vmatprep.subr.mxu0 %v295_v37  ;;  %v289_v61 = vld [vmem:[%s1057_s25 + $0x80] sm:$0xff]  ;;  %v266_v0 = vld [vmem:[%s1052_s21 + $0x8] sm:$0xff]  ;;  %v268_v2 = vld [vmem:[%s1052_s21 + $0x18] sm:$0xff] }
  0x2b   : > { %870 = vmatprep.subr.mxu1 %v327_v38  ;;  %836 = vmatpush3.msra.mxu0 %v279_v39  ;;  %v321_v62 = vld [vmem:[%s1057_s25 + $0x180] sm:$0xff]  ;;  %v267_v4 = vld [vmem:[%s1052_s21 + $0x10] sm:$0xff]  ;;  %v368_v5 = vld [vmem:[%s1057_s25 + $0x2f8] sm:$0xff] }
  0x2c   : > { %871 = vmatpush3.msra.mxu1 %v311_v40  ;;  %837 = vmatprep.subr.mxu0 %v294_v41  ;;  %v273_v63 = vld [vmem:[%s1057_s25] sm:$0xff]  ;;  %v400_v6 = vld [vmem:[%s1057_s25 + $0x3f8] sm:$0xff]  ;;  %v367_v9 = vld [vmem:[%s1057_s25 + $0x2f0] sm:$0xff] }
  0x2d   : > { %872 = vmatprep.subr.mxu1 %v326_v42  ;;  %838 = vmatpush3.msra.mxu0 %v278_v43  ;;  %v305_v1 = vld [vmem:[%s1057_s25 + $0x100] sm:$0xff]  ;;  %v352_v7 = vld [vmem:[%s1057_s25 + $0x278] sm:$0xff]  ;;  %v399_v10 = vld [vmem:[%s1057_s25 + $0x3f0] sm:$0xff] }
  0x2e   : > { %873 = vmatpush3.msra.mxu1 %v310_v44  ;;  %839 = vmatprep.subr.mxu0 %v293_v45  ;;  %v265_v3 = vld [vmem:[%s1052_s21] sm:$0xff]  ;;  %v384_v8 = vld [vmem:[%s1057_s25 + $0x378] sm:$0xff]  ;;  %v351_v11 = vld [vmem:[%s1057_s25 + $0x270] sm:$0xff] }
  0x2f   : > { %874 = vmatprep.subr.mxu1 %v325_v46  ;;  %840 = vmatpush3.msra.mxu0 %v277_v47  ;;  %v383_v12 = vld [vmem:[%s1057_s25 + $0x370] sm:$0xff]  ;;  %v366_v13 = vld [vmem:[%s1057_s25 + $0x2e8] sm:$0xff]  ;;  %v365_v17 = vld [vmem:[%s1057_s25 + $0x2e0] sm:$0xff] }
  0x30   : > { %875 = vmatpush3.msra.mxu1 %v309_v48  ;;  %841 = vmatprep.subr.mxu0 %v292_v49  ;;  %v398_v14 = vld [vmem:[%s1057_s25 + $0x3e8] sm:$0xff]  ;;  %v397_v18 = vld [vmem:[%s1057_s25 + $0x3e0] sm:$0xff]  ;;  %v364_v21 = vld [vmem:[%s1057_s25 + $0x2d8] sm:$0xff] }
  0x31   : > { %876 = vmatprep.subr.mxu1 %v324_v50  ;;  %842 = vmatpush3.msra.mxu0 %v276_v51  ;;  %v350_v15 = vld [vmem:[%s1057_s25 + $0x268] sm:$0xff]  ;;  %v349_v19 = vld [vmem:[%s1057_s25 + $0x260] sm:$0xff]  ;;  %v396_v22 = vld [vmem:[%s1057_s25 + $0x3d8] sm:$0xff] }
  0x32   : > { %877 = vmatpush3.msra.mxu1 %v308_v52  ;;  %843 = vmatprep.subr.mxu0 %v291_v53  ;;  %v382_v16 = vld [vmem:[%s1057_s25 + $0x368] sm:$0xff]  ;;  %v381_v20 = vld [vmem:[%s1057_s25 + $0x360] sm:$0xff]  ;;  %v348_v23 = vld [vmem:[%s1057_s25 + $0x258] sm:$0xff] }
  0x33   : > { %878 = vmatprep.subr.mxu1 %v323_v54  ;;  %844 = vmatpush3.msra.mxu0 %v275_v55  ;;  %v380_v24 = vld [vmem:[%s1057_s25 + $0x358] sm:$0xff]  ;;  %v363_v25 = vld [vmem:[%s1057_s25 + $0x2d0] sm:$0xff]  ;;  %v362_v29 = vld [vmem:[%s1057_s25 + $0x2c8] sm:$0xff] }
  0x34   : > { %879 = vmatpush3.msra.mxu1 %v307_v56  ;;  %845 = vmatprep.subr.mxu0 %v290_v57  ;;  %v395_v26 = vld [vmem:[%s1057_s25 + $0x3d0] sm:$0xff]  ;;  %v394_v30 = vld [vmem:[%s1057_s25 + $0x3c8] sm:$0xff]  ;;  %v361_v33 = vld [vmem:[%s1057_s25 + $0x2c0] sm:$0xff] }
  0x35   : > { %880 = vmatprep.subr.mxu1 %v322_v58  ;;  %846 = vmatpush3.msra.mxu0 %v274_v59  ;;  %v347_v27 = vld [vmem:[%s1057_s25 + $0x250] sm:$0xff]  ;;  %v346_v31 = vld [vmem:[%s1057_s25 + $0x248] sm:$0xff]  ;;  %v393_v34 = vld [vmem:[%s1057_s25 + $0x3c0] sm:$0xff] }
  0x36   : > { %881 = vmatpush3.msra.mxu1 %v306_v60  ;;  %847 = vmatprep.subr.mxu0 %v289_v61  ;;  %v379_v28 = vld [vmem:[%s1057_s25 + $0x350] sm:$0xff]  ;;  %v378_v32 = vld [vmem:[%s1057_s25 + $0x348] sm:$0xff]  ;;  %v345_v35 = vld [vmem:[%s1057_s25 + $0x240] sm:$0xff] }
  0x37   : > { %882 = vmatprep.subr.mxu1 %v321_v62  ;;  %848 = vmatpush3.msra.mxu0 %v273_v63  ;;  %v377_v36 = vld [vmem:[%s1057_s25 + $0x340] sm:$0xff]  ;;  %v360_v37 = vld [vmem:[%s1057_s25 + $0x2b8] sm:$0xff]  ;;  %v359_v41 = vld [vmem:[%s1057_s25 + $0x2b0] sm:$0xff] }
  0x38   : > { %465 = vmatprep.mubr.f32.mxu0 %v266_v0  ;;  %883 = vmatpush3.msra.mxu1 %v305_v1  ;;  %v392_v38 = vld [vmem:[%s1057_s25 + $0x3b8] sm:$0xff]  ;;  %v391_v42 = vld [vmem:[%s1057_s25 + $0x3b0] sm:$0xff]  ;;  %v358_v45 = vld [vmem:[%s1057_s25 + $0x2a8] sm:$0xff] }
  0x39   : > { %535 = vmatprep.mubr.f32.mxu1 %v268_v2  ;;  %466 = vmatmul.mubr.f32.vlgmr.msra.gmra.mxu0 %v265_v3  ;;  %v344_v39 = vld [vmem:[%s1057_s25 + $0x238] sm:$0xff]  ;;  %v343_v43 = vld [vmem:[%s1057_s25 + $0x230] sm:$0xff]  ;;  %v390_v46 = vld [vmem:[%s1057_s25 + $0x3a8] sm:$0xff] }
  0x3a   : > { %536 = vmatmul.mubr.f32.vlgmr.msra.gmra.mxu1 %v267_v4  ;;  %887 = vmatprep.subr.mxu0 %v368_v5  ;;  %v376_v40 = vld [vmem:[%s1057_s25 + $0x338] sm:$0xff]  ;;  %v375_v44 = vld [vmem:[%s1057_s25 + $0x330] sm:$0xff]  ;;  %v342_v47 = vld [vmem:[%s1057_s25 + $0x228] sm:$0xff] }
  0x3b   : > { %922 = vmatprep.subr.mxu1 %v400_v6  ;;  %888 = vmatpush3.msra.mxu0 %v352_v7  ;;  %v374_v48 = vld [vmem:[%s1057_s25 + $0x328] sm:$0xff]  ;;  %v357_v49 = vld [vmem:[%s1057_s25 + $0x2a0] sm:$0xff]  ;;  %v356_v53 = vld [vmem:[%s1057_s25 + $0x298] sm:$0xff] }
  0x3c   : > { %923 = vmatpush3.msra.mxu1 %v384_v8  ;;  %889 = vmatprep.subr.mxu0 %v367_v9  ;;  %v389_v50 = vld [vmem:[%s1057_s25 + $0x3a0] sm:$0xff]  ;;  %v388_v54 = vld [vmem:[%s1057_s25 + $0x398] sm:$0xff]  ;;  %v355_v57 = vld [vmem:[%s1057_s25 + $0x290] sm:$0xff] }
  0x3d   : > { %924 = vmatprep.subr.mxu1 %v399_v10  ;;  %890 = vmatpush3.msra.mxu0 %v351_v11  ;;  %v341_v51 = vld [vmem:[%s1057_s25 + $0x220] sm:$0xff]  ;;  %v340_v55 = vld [vmem:[%s1057_s25 + $0x218] sm:$0xff]  ;;  %v387_v58 = vld [vmem:[%s1057_s25 + $0x390] sm:$0xff] }
  0x3e   : > { %925 = vmatpush3.msra.mxu1 %v383_v12  ;;  %891 = vmatprep.subr.mxu0 %v366_v13  ;;  %v373_v52 = vld [vmem:[%s1057_s25 + $0x320] sm:$0xff]  ;;  %v372_v56 = vld [vmem:[%s1057_s25 + $0x318] sm:$0xff]  ;;  %v339_v59 = vld [vmem:[%s1057_s25 + $0x210] sm:$0xff] }
  0x3f   : > { %926 = vmatprep.subr.mxu1 %v398_v14  ;;  %892 = vmatpush3.msra.mxu0 %v350_v15  ;;  %v371_v60 = vld [vmem:[%s1057_s25 + $0x310] sm:$0xff]  ;;  %v354_v61 = vld [vmem:[%s1057_s25 + $0x288] sm:$0xff]  ;;  %v353_v1 = vld [vmem:[%s1057_s25 + $0x280] sm:$0xff] }
  0x40   : > { %927 = vmatpush3.msra.mxu1 %v382_v16  ;;  %893 = vmatprep.subr.mxu0 %v365_v17  ;;  %v386_v62 = vld [vmem:[%s1057_s25 + $0x388] sm:$0xff]  ;;  %v385_v2 = vld [vmem:[%s1057_s25 + $0x380] sm:$0xff]  ;;  %v272_v6 = vld [vmem:[%s1052_s21 + $0x38] sm:$0xff] }
  0x41   : > { %928 = vmatprep.subr.mxu1 %v397_v18  ;;  %894 = vmatpush3.msra.mxu0 %v349_v19  ;;  %v338_v63 = vld [vmem:[%s1057_s25 + $0x208] sm:$0xff]  ;;  %v337_v3 = vld [vmem:[%s1057_s25 + $0x200] sm:$0xff]  ;;  %v271_v8 = vld [vmem:[%s1052_s21 + $0x30] sm:$0xff] }
  0x42   : > { %929 = vmatpush3.msra.mxu1 %v381_v20  ;;  %895 = vmatprep.subr.mxu0 %v364_v21  ;;  %v370_v0 = vld [vmem:[%s1057_s25 + $0x308] sm:$0xff]  ;;  %v369_v5 = vld [vmem:[%s1057_s25 + $0x300] sm:$0xff] }
  0x43   : > { %930 = vmatprep.subr.mxu1 %v396_v22  ;;  %896 = vmatpush3.msra.mxu0 %v348_v23  ;;  %v270_v4 = vld [vmem:[%s1052_s21 + $0x28] sm:$0xff]  ;;  %v269_v7 = vld [vmem:[%s1052_s21 + $0x20] sm:$0xff] }
  0x44   : > { %931 = vmatpush3.msra.mxu1 %v380_v24  ;;  %897 = vmatprep.subr.mxu0 %v363_v25  ;;  %v264_v23 = vld [vmem:[#allocation2] sm:$0xff] }
  0x45   : > { %932 = vmatprep.subr.mxu1 %v395_v26  ;;  %898 = vmatpush3.msra.mxu0 %v347_v27 }
  0x46   : > { %933 = vmatpush3.msra.mxu1 %v379_v28  ;;  %899 = vmatprep.subr.mxu0 %v362_v29 }
  0x47   : > { %934 = vmatprep.subr.mxu1 %v394_v30  ;;  %900 = vmatpush3.msra.mxu0 %v346_v31 }
  0x48   : > { %935 = vmatpush3.msra.mxu1 %v378_v32  ;;  %901 = vmatprep.subr.mxu0 %v361_v33 }
  0x49   : > { %936 = vmatprep.subr.mxu1 %v393_v34  ;;  %902 = vmatpush3.msra.mxu0 %v345_v35 }
  0x4a   : > { %937 = vmatpush3.msra.mxu1 %v377_v36  ;;  %903 = vmatprep.subr.mxu0 %v360_v37 }
  0x4b   : > { %938 = vmatprep.subr.mxu1 %v392_v38  ;;  %904 = vmatpush3.msra.mxu0 %v344_v39 }
  0x4c   : > { %939 = vmatpush3.msra.mxu1 %v376_v40  ;;  %905 = vmatprep.subr.mxu0 %v359_v41 }
  0x4d   : > { %940 = vmatprep.subr.mxu1 %v391_v42  ;;  %906 = vmatpush3.msra.mxu0 %v343_v43 }
  0x4e   : > { %941 = vmatpush3.msra.mxu1 %v375_v44  ;;  %907 = vmatprep.subr.mxu0 %v358_v45 }
  0x4f   : > { %942 = vmatprep.subr.mxu1 %v390_v46  ;;  %908 = vmatpush3.msra.mxu0 %v342_v47 }
  0x50   : > { %943 = vmatpush3.msra.mxu1 %v374_v48  ;;  %909 = vmatprep.subr.mxu0 %v357_v49 }
  0x51   : > { %944 = vmatprep.subr.mxu1 %v389_v50  ;;  %910 = vmatpush3.msra.mxu0 %v341_v51 }
  0x52   : > { %945 = vmatpush3.msra.mxu1 %v373_v52  ;;  %911 = vmatprep.subr.mxu0 %v356_v53 }
  0x53   : > { %946 = vmatprep.subr.mxu1 %v388_v54  ;;  %912 = vmatpush3.msra.mxu0 %v340_v55 }
  0x54   : > { %947 = vmatpush3.msra.mxu1 %v372_v56  ;;  %913 = vmatprep.subr.mxu0 %v355_v57 }
  0x55   : > { %948 = vmatprep.subr.mxu1 %v387_v58  ;;  %914 = vmatpush3.msra.mxu0 %v339_v59 }
  0x56   : > { %949 = vmatpush3.msra.mxu1 %v371_v60  ;;  %915 = vmatprep.subr.mxu0 %v354_v61 }
  0x57   : > { %950 = vmatprep.subr.mxu1 %v386_v62  ;;  %916 = vmatpush3.msra.mxu0 %v338_v63 }
  0x58   : > { %951 = vmatpush3.msra.mxu1 %v370_v0  ;;  %917 = vmatprep.subr.mxu0 %v353_v1 }
  0x59   : > { %952 = vmatprep.subr.mxu1 %v385_v2  ;;  %918 = vmatpush3.msra.mxu0 %v337_v3 }
  0x5a   : > { %605 = vmatprep.mubr.f32.mxu0 %v270_v4  ;;  %953 = vmatpush3.msra.mxu1 %v369_v5 }
  0x5b   : > { %675 = vmatprep.mubr.f32.mxu1 %v272_v6  ;;  %606 = vmatmul.mubr.f32.vlgmr.msra.gmra.mxu0 %v269_v7 }
  0x5c   : > { %676 = vmatmul.mubr.f32.vlgmr.msra.gmra.mxu1 %v271_v8 }
  0xf9   : > { %v849_v9 = vpop.f32.mrf.mxu0 }
  0xfa   : > { %v884_v10 = vpop.f32.mrf.mxu1 }
  0xfb   : > { %v850_v11 = vpop.f32.mrf.mxu0 }
  0xfc   : > { %v885_v12 = vpop.f32.mrf.mxu1  ;;  %v851_v13 = vadd.f32 %v850_v11, %v849_v9 }
  0xfd   : > { %v886_v14 = vadd.f32 %v885_v12, %v884_v10 }
  0xff   : > { %v538_v19 = vadd.f32 %v886_v14, %v851_v13 }
 0x11b   : > { %v919_v15 = vpop.f32.mrf.mxu0 }
 0x11c   : > { %v954_v16 = vpop.f32.mrf.mxu1 }
 0x11d   : > { %v920_v17 = vpop.f32.mrf.mxu0 }
 0x11e   : > { %v955_v18 = vpop.f32.mrf.mxu1  ;;  %v921_v20 = vadd.f32 %v920_v17, %v919_v15 }
 0x11f   : > { %v956_v22 = vadd.f32 %v955_v18, %v954_v16 }
 0x120   : > { %v608_v21 = vadd.f32 %v921_v20, %v538_v19 }
 0x122   : > { %v678_v24 = vadd.f32 %v956_v22, %v608_v21  ;;  %686 = sbr.rel (%p812_p7) target bundleno = 305 (0x131), region = 40 }
 0x124   : > { %v681_v25 = vadd.f32 %v678_v24, %v264_v23 }
 0x126   : > { %682 = vst [vmem:[#allocation2] sm:$0xff] %v681_v25 }
 0x127   : > { %v813_v27 = vld [vmem:[%s1214_s2] ss:$0 sm:$0xff] }
 0x12d   : > { %v687_v26 = vld [vmem:[#allocation2] sm:$0xff] }
 0x12e   : > { %v695_v28 = vadd.f32 %v813_v27, %v687_v26 }
 0x130   : > { %696 = vst [vmem:[%s1215_s3] sm:$0xff] %v695_v28 }
 0x131 PF: > { %s13_s14 = sadd.s32 1, %s1004_s14   ;;  %s1216_s12 = smov %s1000_s13 }
 0x132   : > { %p10_p8 = scmp.ge.s32.totalorder %s13_s14, 4   ;;  %s1217_s13 = smov %s1219_s15 }
 0x134   :  { %12 = sbr.rel (!%p10_p8) target bundleno = 2 (0x2), region = 76 }

// kernel: kfla_forward_sample.5
= control target key start
LH: loop header
LB: loop body
LE: loop exit
PB: predicated region body
PF: predicated region fallthrough
CT: control target
= control target key end

     0   :  { %s4674_s0 = inlined_call_operand.vmem [shape: f32[16,2048], index: 0, kind: input, shape index: {}]   ;;  %s4675_s1 = inlined_call_operand.hbm [shape: f32[2048,2048], index: 1, kind: input, shape index: {}]   ;;  %s4676_s2 = inlined_call_operand.vmem [shape: f32[16,2048], index: 2, kind: input, shape index: {}]   ;;  %s4677_s3 = inlined_call_operand.vmem [shape: f32[16,2048], index: 3, kind: output, shape index: {}]  }
   0x1   :  { %4682 = sst [smem:[#allocation16_spill]] %s4674_s0 }
   0x2   :  { %4683 = sst [smem:[#allocation17_spill]] %s4677_s3 }
   0x3   :  { %8 = vsyncpa [#allocation5], 0 }
   0x4   :  { %10 = vsyncpa [#allocation5 + $0x1], 0  ;;  %s3293_s12 = smov 0   ;;  %s3295_s13 = smov 0  }
   0x5   :  { %s3297_s14 = smov 0   ;;  %s3299_s15 = smov 0  }
   0x6   :  { %s3301_s16 = smov 0   ;;  %s3303_s17 = smov 0  }
   0x7   :  { %s3305_s18 = smov 0   ;;  %s3307_s19 = smov 0  }
   0x8   :  { %s3309_s20 = smov 0   ;;  %s3311_s21 = smov 0  }
   0x9   :  { %s3313_s22 = smov 0   ;;  %s3315_s23 = smov 0  }
   0xa LB: > { %4684 = sst [smem:[#allocation9_spill]] %s3238_s16  ;;  %s2961_s24 = sadd.s32 4294967295, %s3266_s23   ;;  %s3266_s23 = sphi %s3315_s23, %s16_s23   ;;  %s3262_s22 = sphi %s3313_s22, %s4712_s22   ;;  %s3258_s21 = sphi %s3311_s21, %s4711_s21   ;;  %s3254_s20 = sphi %s3309_s20, %s4710_s20   ;;  %s3250_s19 = sphi %s3307_s19, %s4709_s19   ;;  %s3246_s18 = sphi %s3305_s18, %s4702_s18   ;;  %s3242_s17 = sphi %s3303_s17, %s4701_s17   ;;  %s3238_s16 = sphi %s3301_s16, %s4700_s16   ;;  %s3234_s15 = sphi %s3299_s15, %s4708_s15   ;;  %s3230_s14 = sphi %s3297_s14, %s4707_s14   ;;  %s3226_s13 = sphi %s3295_s13, %s4706_s13   ;;  %s3222_s12 = sphi %s3293_s12, %s4705_s12  }
   0xb   : > { %4685 = sst [smem:[#allocation10_spill]] %s3246_s18  ;;  %s28_s25 = sadd.s32 1, %s3258_s21 }
   0xc   : > { %p29_p0 = scmp.ge.s32.totalorder %s28_s25, 2  ;;  %s31_s26 = sadd.s32 1, %s3262_s22 }
   0xd   : > { %s44_s27 = sadd.s32 1, %s3246_s18  ;;  %p51_p1 = scmp.ne.s32.totalorder %s3246_s18, %s3242_s17 }
   0xe   : > { %s4714_s25 = smov (%p29_p0, %s28_s25), 0  ;;  %s4716_s26 = smov (!%p29_p0, %s31_s26), %s3262_s22 }
   0xf   : > { %4686 = sst [smem:[#allocation11_spill]] %s4714_s25  ;;  %s40_s28 = ssub.s32 %s3258_s21, %s4714_s25 }
  0x10   : > { %p52_p2 = scmp.eq.s32.totalorder %s3266_s23, 0  ;;  %p33_p3 = scmp.ge.s32.totalorder %s4716_s26, 2 }
  0x11   : > { %p42_p4 = scmp.eq.s32.totalorder %s40_s28, 0  ;;  %s72_s30 = sadd.s32 1, %s3238_s16 }
  0x12   : > { %p3367_p5 = por %p52_p2, %p51_p1  ;;  %s4718_s26 = smov (%p33_p3, %s4716_s26), 0 }
  0x13   : > { %4688 = sst [smem:[#allocation12_spill]] %s4718_s26  ;;  %s68_s5 = ssub.s32 %s3262_s22, %s4718_s26 }
  0x14   : > { %s3375_s4 = scalar_select %p42_p4, %s3246_s18, %s44_s27  }
  0x15   : > { %p79_p6 = scmp.ne.s32.totalorder %s3238_s16, %s3234_s15  ;;  %s69_s6 = sor.u32 %s68_s5, %s40_s28 }
  0x16   : > { %4689 = sst [smem:[#allocation13_spill]] %s3375_s4  ;;  %p85_p7 = scmp.ne.s32.totalorder %s3234_s15, %s3230_s14 }
  0x17   : > { %p70_p8 = scmp.eq.s32.totalorder %s69_s6, 0  ;;  %p3385_p9 = por %p79_p6, %p52_p2 }
  0x18   : > { %p86_p10 = scmp.eq.s32.totalorder %s2961_s24, 0  ;;  %p98_p11 = scmp.eq.s32.totalorder %s68_s5, 0 }
  0x19   : > { %s3392_s8 = scalar_select %p70_p8, %s3238_s16, %s72_s30  }
  0x1a   : > { %p3394_p12 = por %p86_p10, %p85_p7  ;;  %s100_s10 = sadd.s32 1, %s3226_s13 }
  0x1b   : > { %4691 = sst [smem:[#allocation14_spill]] %s3392_s8  ;;  %p107_p13 = scmp.ne.s32.totalorder %s3226_s13, %s3222_s12 }
  0x1c   : > { %s3400_s11 = scalar_select %p98_p11, %s3226_s13, %s100_s10  }
  0x1d   : > { %p139_p0 = scmp.eq.s32.totalorder %s2961_s24, 3  ;;  %p3408_p1 = por %p107_p13, %p52_p2 }
  0x1e   : > { %4693 = sst [smem:[#allocation15_spill]] %s3400_s11  ;;  %p2964_p4 = scmp.ge.s32.totalorder %s3266_s23, 4 }
  0x1f   : > { %p3412_p3 = por %p139_p0, %p107_p13 }
  0x20   : > { %161 = sbr.rel (%p2964_p4) target bundleno = 84 (0x54), region = 16 }
  0x25   : > { %164 = sbr.rel (!%p3367_p5) target bundleno = 55 (0x37), region = 20  ;;  %s166_s28 = sand.u32 (%p3367_p5), 1, %s3246_s18  }
  0x26   : > { %s2988_s30 = sshll.u32 (%p3367_p5), %s3258_s21, 6  ;;  %s2965_s24 = sshll.u32 (%p3367_p5), %s166_s28, 7 }
  0x27   : > { %s4696_s0 = sld [smem:[#allocation16_spill]] (%p3367_p5)  ;;  %s168_s29 = scalar_lea.vmem (%p3367_p5), [#allocation3], %s2965_s24 }
  0x2d   : > { %s3424_s10 = scalar_lea.vmem %s4696_s0, %s2988_s30 }
  0x2e   : > { %v187_v0 = vld [vmem:[%s3424_s10] sm:$0xff]  ;;  %v189_v1 = vld [vmem:[%s3424_s10 + $0x8] sm:$0xff]  ;;  %v191_v2 = vld [vmem:[%s3424_s10 + $0x10] sm:$0xff] }
  0x2f   : > { %188 = vst [vmem:[%s168_s29] sm:$0xff] %v187_v0  ;;  %190 = vst [vmem:[%s168_s29 + $0x8] sm:$0xff] %v189_v1  ;;  %v193_v3 = vld [vmem:[%s3424_s10 + $0x18] sm:$0xff]  ;;  %v195_v4 = vld [vmem:[%s3424_s10 + $0x20] sm:$0xff] }
  0x30   : > { %192 = vst [vmem:[%s168_s29 + $0x10] sm:$0xff] %v191_v2  ;;  %v197_v5 = vld [vmem:[%s3424_s10 + $0x28] sm:$0xff]  ;;  %194 = vst [vmem:[%s168_s29 + $0x18] sm:$0xff] %v193_v3  ;;  %v199_v6 = vld [vmem:[%s3424_s10 + $0x30] sm:$0xff] }
  0x31   : > { %196 = vst [vmem:[%s168_s29 + $0x20] sm:$0xff] %v195_v4  ;;  %198 = vst [vmem:[%s168_s29 + $0x28] sm:$0xff] %v197_v5  ;;  %v201_v7 = vld [vmem:[%s3424_s10 + $0x38] sm:$0xff]  ;;  %v203_v8 = vld [vmem:[%s3424_s10 + $0x80] sm:$0xff] }
  0x32   : > { %200 = vst [vmem:[%s168_s29 + $0x30] sm:$0xff] %v199_v6  ;;  %202 = vst [vmem:[%s168_s29 + $0x38] sm:$0xff] %v201_v7  ;;  %v205_v9 = vld [vmem:[%s3424_s10 + $0x88] sm:$0xff]  ;;  %v207_v10 = vld [vmem:[%s3424_s10 + $0x90] sm:$0xff] }
  0x33   : > { %204 = vst [vmem:[%s168_s29 + $0x40] sm:$0xff] %v203_v8  ;;  %v209_v11 = vld [vmem:[%s3424_s10 + $0x98] sm:$0xff]  ;;  %206 = vst [vmem:[%s168_s29 + $0x48] sm:$0xff] %v205_v9  ;;  %v211_v12 = vld [vmem:[%s3424_s10 + $0xa0] sm:$0xff] }
  0x34   : > { %208 = vst [vmem:[%s168_s29 + $0x50] sm:$0xff] %v207_v10  ;;  %210 = vst [vmem:[%s168_s29 + $0x58] sm:$0xff] %v209_v11  ;;  %v213_v13 = vld [vmem:[%s3424_s10 + $0xa8] sm:$0xff]  ;;  %v215_v14 = vld [vmem:[%s3424_s10 + $0xb0] sm:$0xff] }
  0x35   : > { %212 = vst [vmem:[%s168_s29 + $0x60] sm:$0xff] %v211_v12  ;;  %214 = vst [vmem:[%s168_s29 + $0x68] sm:$0xff] %v213_v13  ;;  %v217_v15 = vld [vmem:[%s3424_s10 + $0xb8] sm:$0xff] }
  0x36   : > { %216 = vst [vmem:[%s168_s29 + $0x70] sm:$0xff] %v215_v14  ;;  %218 = vst [vmem:[%s168_s29 + $0x78] sm:$0xff] %v217_v15 }
  0x37 PF: > { %s225_s28 = sand.u32 1, %s3238_s16   ;;  %s2970_s30 = sshll.u32 %s3262_s22, 3 }
  0x38   : > { %s2968_s24 = sshll.u32 %s225_s28, 13  ;;  %s2989_s5 = sshll.u32 %s3258_s21, 11 }
  0x39   : > { %s236_s6 = sadd.s32 %s2989_s5, %s2970_s30  ;;  %s229_s0 = scalar_lea.vmem [#allocation4], %s2968_s24 }
  0x3a   : > { %s239_s26 = sshll.u32 %s229_s0, 4  ;;  %s2972_s25 = sshll.u32 %s236_s6, 7  ;;  %s240_s26 = int_to_ptr.vmem [resolvable:$true] %s239_s26 }
  0x3b   : > { %s238_s8 = scalar_lea.hbm %s4675_s1, %s2972_s25  ;;  %s226_s10 = scalar_lea.sflag [#allocation5], %s225_s28 }
  0x3c   : > { %s3154_s29 = scalar_lea.vmem %s240_s26, 131072  ;;  %s3268_s11 = smov [#allocation4]  }
  0x3d   : > { %p3155_p2 = scmp.ne.s32.totalorder %s240_s26, %s3154_s29  ;;  %s3158_s16 = sshll.u32 %s3268_s11, 4  ;;  %s3159_s16 = int_to_ptr.vmem [resolvable:$false] %s3158_s16 }
  0x3e   : > { %s3160_s3 = scalar_lea.vmem %s3159_s16, 262144  ;;  %p3161_p7 = scmp.lt.s32.totalorder %s240_s26, %s3159_s16 }
  0x3f   : > { %p3156_p5 = pnand %p3155_p2, %p3385_p9  ;;  %p3162_p8 = scmp.lt.s32.totalorder %s3160_s3, %s3154_s29 }
  0x41   : > { %p3157_p6 = pneg %p3156_p5  ;;  %p3163_p10 = por %p3162_p8, %p3161_p7 }
  0x43   : > { %p3164_p11 = pnand %p3163_p10, %p3157_p6 }
  0x45   : > { %3167 = shalt.err (!%p3164_p11)
}
  0x46   : > { %s3269_s0 = smov 2048   ;;  %s3270_s30 = smov 1024  }
  0x47   : > { %s3271_s18 = smov 64   ;;  %248 = sbr.rel (!%p3408_p1) target bundleno = 84 (0x54), region = 47 }
  0x48   : > { %2992 = dma.hbm_to_vmem [thread:$0]  (%p3385_p9), %s238_s8, 131072, %s240_s26, %s226_s10, %s3269_s0, %s3270_s30, %s3271_s18  }
  0x49   : > { %s250_s25 = sand.u32 (%p3408_p1), 1, %s3226_s13   ;;  %s2990_s4 = sshll.u32 (%p3408_p1), %s3262_s22, 6 }
  0x4a   : > { %s2973_s11 = sshll.u32 (%p3408_p1), %s250_s25, 7  ;;  %s3459_s3 = scalar_lea.vmem (%p3408_p1), %s4676_s2, %s2990_s4 }
  0x4b   : > { %v271_v16 = vld [vmem:[%s3459_s3] sm:$0xff] (%p3408_p1)  ;;  %v273_v17 = vld [vmem:[%s3459_s3 + $0x8] sm:$0xff] (%p3408_p1)  ;;  %v275_v18 = vld [vmem:[%s3459_s3 + $0x10] sm:$0xff] (%p3408_p1)  ;;  %s252_s26 = scalar_lea.vmem (%p3408_p1), [#allocation6], %s2973_s11 }
  0x4c   : > { %272 = vst [vmem:[%s252_s26] sm:$0xff] %v271_v16  ;;  %274 = vst [vmem:[%s252_s26 + $0x8] sm:$0xff] %v273_v17  ;;  %v277_v19 = vld [vmem:[%s3459_s3 + $0x18] sm:$0xff]  ;;  %v279_v20 = vld [vmem:[%s3459_s3 + $0x20] sm:$0xff] }
  0x4d   : > { %276 = vst [vmem:[%s252_s26 + $0x10] sm:$0xff] %v275_v18  ;;  %v281_v21 = vld [vmem:[%s3459_s3 + $0x28] sm:$0xff]  ;;  %278 = vst [vmem:[%s252_s26 + $0x18] sm:$0xff] %v277_v19  ;;  %v283_v22 = vld [vmem:[%s3459_s3 + $0x30] sm:$0xff] }
  0x4e   : > { %280 = vst [vmem:[%s252_s26 + $0x20] sm:$0xff] %v279_v20  ;;  %282 = vst [vmem:[%s252_s26 + $0x28] sm:$0xff] %v281_v21  ;;  %v285_v23 = vld [vmem:[%s3459_s3 + $0x38] sm:$0xff]  ;;  %v287_v24 = vld [vmem:[%s3459_s3 + $0x80] sm:$0xff] }
  0x4f   : > { %284 = vst [vmem:[%s252_s26 + $0x30] sm:$0xff] %v283_v22  ;;  %286 = vst [vmem:[%s252_s26 + $0x38] sm:$0xff] %v285_v23  ;;  %v289_v25 = vld [vmem:[%s3459_s3 + $0x88] sm:$0xff]  ;;  %v291_v26 = vld [vmem:[%s3459_s3 + $0x90] sm:$0xff] }
  0x50   : > { %288 = vst [vmem:[%s252_s26 + $0x40] sm:$0xff] %v287_v24  ;;  %v293_v27 = vld [vmem:[%s3459_s3 + $0x98] sm:$0xff]  ;;  %290 = vst [vmem:[%s252_s26 + $0x48] sm:$0xff] %v289_v25  ;;  %v295_v28 = vld [vmem:[%s3459_s3 + $0xa0] sm:$0xff] }
  0x51   : > { %292 = vst [vmem:[%s252_s26 + $0x50] sm:$0xff] %v291_v26  ;;  %294 = vst [vmem:[%s252_s26 + $0x58] sm:$0xff] %v293_v27  ;;  %v297_v29 = vld [vmem:[%s3459_s3 + $0xa8] sm:$0xff]  ;;  %v299_v30 = vld [vmem:[%s3459_s3 + $0xb0] sm:$0xff] }
  0x52   : > { %296 = vst [vmem:[%s252_s26 + $0x60] sm:$0xff] %v295_v28  ;;  %298 = vst [vmem:[%s252_s26 + $0x68] sm:$0xff] %v297_v29  ;;  %v301_v31 = vld [vmem:[%s3459_s3 + $0xb8] sm:$0xff] }
  0x53   : > { %300 = vst [vmem:[%s252_s26 + $0x70] sm:$0xff] %v299_v30  ;;  %302 = vst [vmem:[%s252_s26 + $0x78] sm:$0xff] %v301_v31 }
  0x54 PF: > { %p2976_p9 = scmp.ge.s32.totalorder %s3266_s23, 1  ;;  %p307_p13 = scmp.lt.s32.totalorder %s3266_s23, 5 }
  0x56   : > { %p308_p0 = pnand %p2976_p9, %p307_p13 }
  0x57   : > { %s314_s7 = sand.u32 (!%p308_p0), 1, %s3242_s17   ;;  %s320_s8 = sand.u32 (!%p308_p0), 1, %s3234_s15  }
  0x58   : > { %311 = sbr.rel (%p308_p0) target bundleno = 890 (0x37a), region = 70  ;;  %s2977_s14 = sshll.u32 (!%p308_p0), %s314_s7, 7 }
  0x59   : > { %s2978_s24 = sshll.u32 (!%p308_p0), %s320_s8, 13  ;;  %s3481_s5 = scalar_lea.vmem (!%p308_p0), [#allocation3], %s2977_s14 }
  0x5a   : > { %s321_s6 = scalar_lea.sflag (!%p308_p0), [#allocation5], %s320_s8  ;;  %s3483_s10 = scalar_lea.vmem (!%p308_p0), [#allocation4], %s2978_s24 }
  0x5d   : > { %3217 = dma.done.wait (%p3394_p12), %s321_s6, 131072  }
  0x5e   : > { %3219 = vsyncadd (%p3394_p12), %s321_s6, 4294836224  ;;  %s330_s29 = sand.u32 1, %s3222_s12   ;;  %p2981_p1 = scmp.ne.s32.totalorder %s3250_s19, 0 }
  0x5f   : > { %s2979_s0 = sshll.u32 %s330_s29, 7 }
  0x60   : > { %s3490_s30 = scalar_lea.vmem [#allocation6], %s2979_s0  ;;  %s3492_s18 = scalar_lea.vmem [#allocation7], %s2979_s0 }
  0x61   : > { %372 = sbr.rel (%p2981_p1) target bundleno = 111 (0x6f), region = 86 }
  0x66   : > { %v3272_v32 = vmov 0.0  }
  0x67   : > { %373 = vst [vmem:[#allocation2 + $0x30] sm:$0xff] %v3272_v32  ;;  %374 = vst [vmem:[#allocation2] sm:$0xff] %v3272_v32 }
  0x68   : > { %375 = vst [vmem:[#allocation2 + $0x58] sm:$0xff] %v3272_v32  ;;  %376 = vst [vmem:[#allocation2 + $0x18] sm:$0xff] %v3272_v32 }
  0x69   : > { %377 = vst [vmem:[#allocation2 + $0x50] sm:$0xff] %v3272_v32  ;;  %378 = vst [vmem:[#allocation2 + $0x68] sm:$0xff] %v3272_v32 }
  0x6a   : > { %379 = vst [vmem:[#allocation2 + $0x8] sm:$0xff] %v3272_v32  ;;  %380 = vst [vmem:[#allocation2 + $0x48] sm:$0xff] %v3272_v32 }
  0x6b   : > { %381 = vst [vmem:[#allocation2 + $0x40] sm:$0xff] %v3272_v32  ;;  %382 = vst [vmem:[#allocation2 + $0x20] sm:$0xff] %v3272_v32 }
  0x6c   : > { %383 = vst [vmem:[#allocation2 + $0x10] sm:$0xff] %v3272_v32  ;;  %384 = vst [vmem:[#allocation2 + $0x38] sm:$0xff] %v3272_v32 }
  0x6d   : > { %385 = vst [vmem:[#allocation2 + $0x60] sm:$0xff] %v3272_v32  ;;  %386 = vst [vmem:[#allocation2 + $0x70] sm:$0xff] %v3272_v32 }
  0x6e   : > { %387 = vst [vmem:[#allocation2 + $0x78] sm:$0xff] %v3272_v32  ;;  %388 = vst [vmem:[#allocation2 + $0x28] sm:$0xff] %v3272_v32 }
  0x6f PF: > { %v542_v33 = vld [vmem:[%s3483_s10 + $0x3c8] sm:$0xff]  ;;  %v541_v35 = vld [vmem:[%s3483_s10 + $0x3c0] sm:$0xff]  ;;  %p2982_p12 = scmp.ne.s32.totalorder %s3250_s19, 1 }
  0x70   : > { %v798_v34 = vld [vmem:[%s3483_s10 + $0xbc8] sm:$0xff]  ;;  %1445 = vmatprep.subr.mxu0 %v542_v33  ;;  %v797_v36 = vld [vmem:[%s3483_s10 + $0xbc0] sm:$0xff] }
  0x71   : > { %1522 = vmatprep.subr.mxu1 %v798_v34  ;;  %v534_v37 = vld [vmem:[%s3483_s10 + $0x388] sm:$0xff]  ;;  %1446 = vmatpush1.msra.mxu0 %v541_v35  ;;  %v533_v39 = vld [vmem:[%s3483_s10 + $0x380] sm:$0xff] }
  0x72   : > { %v790_v38 = vld [vmem:[%s3483_s10 + $0xb88] sm:$0xff]  ;;  %1523 = vmatpush1.msra.mxu1 %v797_v36  ;;  %v789_v40 = vld [vmem:[%s3483_s10 + $0xb80] sm:$0xff]  ;;  %1447 = vmatprep.subr.mxu0 %v534_v37 }
  0x73   : > { %v526_v41 = vld [vmem:[%s3483_s10 + $0x348] sm:$0xff]  ;;  %1524 = vmatprep.subr.mxu1 %v790_v38  ;;  %v525_v43 = vld [vmem:[%s3483_s10 + $0x340] sm:$0xff]  ;;  %1448 = vmatpush1.msra.mxu0 %v533_v39 }
  0x74   : > { %v782_v42 = vld [vmem:[%s3483_s10 + $0xb48] sm:$0xff]  ;;  %v781_v44 = vld [vmem:[%s3483_s10 + $0xb40] sm:$0xff]  ;;  %1525 = vmatpush1.msra.mxu1 %v789_v40  ;;  %1449 = vmatprep.subr.mxu0 %v526_v41 }
  0x75   : > { %v518_v45 = vld [vmem:[%s3483_s10 + $0x308] sm:$0xff]  ;;  %1526 = vmatprep.subr.mxu1 %v782_v42  ;;  %v517_v47 = vld [vmem:[%s3483_s10 + $0x300] sm:$0xff]  ;;  %1450 = vmatpush1.msra.mxu0 %v525_v43 }
  0x76   : > { %v774_v46 = vld [vmem:[%s3483_s10 + $0xb08] sm:$0xff]  ;;  %v773_v48 = vld [vmem:[%s3483_s10 + $0xb00] sm:$0xff]  ;;  %1527 = vmatpush1.msra.mxu1 %v781_v44  ;;  %1451 = vmatprep.subr.mxu0 %v518_v45 }
  0x77   : > { %v510_v49 = vld [vmem:[%s3483_s10 + $0x2c8] sm:$0xff]  ;;  %1528 = vmatprep.subr.mxu1 %v774_v46  ;;  %v509_v51 = vld [vmem:[%s3483_s10 + $0x2c0] sm:$0xff]  ;;  %1452 = vmatpush1.msra.mxu0 %v517_v47 }
  0x78   : > { %v766_v50 = vld [vmem:[%s3483_s10 + $0xac8] sm:$0xff]  ;;  %v765_v52 = vld [vmem:[%s3483_s10 + $0xac0] sm:$0xff]  ;;  %1529 = vmatpush1.msra.mxu1 %v773_v48  ;;  %1453 = vmatprep.subr.mxu0 %v510_v49 }
  0x79   : > { %v502_v53 = vld [vmem:[%s3483_s10 + $0x288] sm:$0xff]  ;;  %1530 = vmatprep.subr.mxu1 %v766_v50  ;;  %v501_v55 = vld [vmem:[%s3483_s10 + $0x280] sm:$0xff]  ;;  %1454 = vmatpush1.msra.mxu0 %v509_v51 }
  0x7a   : > { %v758_v54 = vld [vmem:[%s3483_s10 + $0xa88] sm:$0xff]  ;;  %v757_v56 = vld [vmem:[%s3483_s10 + $0xa80] sm:$0xff]  ;;  %1531 = vmatpush1.msra.mxu1 %v765_v52  ;;  %1455 = vmatprep.subr.mxu0 %v502_v53 }
  0x7b   : > { %v494_v57 = vld [vmem:[%s3483_s10 + $0x248] sm:$0xff]  ;;  %1532 = vmatprep.subr.mxu1 %v758_v54  ;;  %v493_v59 = vld [vmem:[%s3483_s10 + $0x240] sm:$0xff]  ;;  %1456 = vmatpush1.msra.mxu0 %v501_v55 }
  0x7c   : > { %v750_v58 = vld [vmem:[%s3483_s10 + $0xa48] sm:$0xff]  ;;  %v749_v60 = vld [vmem:[%s3483_s10 + $0xa40] sm:$0xff]  ;;  %1533 = vmatpush1.msra.mxu1 %v757_v56  ;;  %1457 = vmatprep.subr.mxu0 %v494_v57 }
  0x7d   : > { %v486_v61 = vld [vmem:[%s3483_s10 + $0x208] sm:$0xff]  ;;  %1534 = vmatprep.subr.mxu1 %v750_v58  ;;  %v485_v63 = vld [vmem:[%s3483_s10 + $0x200] sm:$0xff]  ;;  %1458 = vmatpush1.msra.mxu0 %v493_v59 }
  0x7e   : > { %v742_v62 = vld [vmem:[%s3483_s10 + $0xa08] sm:$0xff]  ;;  %v741_v0 = vld [vmem:[%s3483_s10 + $0xa00] sm:$0xff]  ;;  %1535 = vmatpush1.msra.mxu1 %v749_v60  ;;  %1459 = vmatprep.subr.mxu0 %v486_v61 }
  0x7f   : > { %v478_v1 = vld [vmem:[%s3483_s10 + $0x1c8] sm:$0xff]  ;;  %1536 = vmatprep.subr.mxu1 %v742_v62  ;;  %v477_v3 = vld [vmem:[%s3483_s10 + $0x1c0] sm:$0xff]  ;;  %1460 = vmatpush1.msra.mxu0 %v485_v63 }
  0x80   : > { %v734_v2 = vld [vmem:[%s3483_s10 + $0x9c8] sm:$0xff]  ;;  %v733_v4 = vld [vmem:[%s3483_s10 + $0x9c0] sm:$0xff]  ;;  %1537 = vmatpush1.msra.mxu1 %v741_v0  ;;  %1461 = vmatprep.subr.mxu0 %v478_v1 }
  0x81   : > { %v470_v5 = vld [vmem:[%s3483_s10 + $0x188] sm:$0xff]  ;;  %1538 = vmatprep.subr.mxu1 %v734_v2  ;;  %v469_v7 = vld [vmem:[%s3483_s10 + $0x180] sm:$0xff]  ;;  %1462 = vmatpush1.msra.mxu0 %v477_v3 }
  0x82   : > { %v726_v6 = vld [vmem:[%s3483_s10 + $0x988] sm:$0xff]  ;;  %v725_v8 = vld [vmem:[%s3483_s10 + $0x980] sm:$0xff]  ;;  %1539 = vmatpush1.msra.mxu1 %v733_v4  ;;  %1463 = vmatprep.subr.mxu0 %v470_v5 }
  0x83   : > { %v462_v9 = vld [vmem:[%s3483_s10 + $0x148] sm:$0xff]  ;;  %1540 = vmatprep.subr.mxu1 %v726_v6  ;;  %v461_v11 = vld [vmem:[%s3483_s10 + $0x140] sm:$0xff]  ;;  %1464 = vmatpush1.msra.mxu0 %v469_v7 }
  0x84   : > { %v718_v10 = vld [vmem:[%s3483_s10 + $0x948] sm:$0xff]  ;;  %v717_v12 = vld [vmem:[%s3483_s10 + $0x940] sm:$0xff]  ;;  %1541 = vmatpush1.msra.mxu1 %v725_v8  ;;  %1465 = vmatprep.subr.mxu0 %v462_v9 }
  0x85   : > { %v454_v13 = vld [vmem:[%s3483_s10 + $0x108] sm:$0xff]  ;;  %1542 = vmatprep.subr.mxu1 %v718_v10  ;;  %v453_v15 = vld [vmem:[%s3483_s10 + $0x100] sm:$0xff]  ;;  %1466 = vmatpush1.msra.mxu0 %v461_v11 }
  0x86   : > { %v710_v14 = vld [vmem:[%s3483_s10 + $0x908] sm:$0xff]  ;;  %v709_v16 = vld [vmem:[%s3483_s10 + $0x900] sm:$0xff]  ;;  %1543 = vmatpush1.msra.mxu1 %v717_v12  ;;  %1467 = vmatprep.subr.mxu0 %v454_v13 }
  0x87   : > { %v446_v17 = vld [vmem:[%s3483_s10 + $0xc8] sm:$0xff]  ;;  %1544 = vmatprep.subr.mxu1 %v710_v14  ;;  %v445_v19 = vld [vmem:[%s3483_s10 + $0xc0] sm:$0xff]  ;;  %1468 = vmatpush1.msra.mxu0 %v453_v15 }
  0x88   : > { %v702_v18 = vld [vmem:[%s3483_s10 + $0x8c8] sm:$0xff]  ;;  %v701_v20 = vld [vmem:[%s3483_s10 + $0x8c0] sm:$0xff]  ;;  %1545 = vmatpush1.msra.mxu1 %v709_v16  ;;  %1469 = vmatprep.subr.mxu0 %v446_v17 }
  0x89   : > { %v438_v21 = vld [vmem:[%s3483_s10 + $0x88] sm:$0xff]  ;;  %1546 = vmatprep.subr.mxu1 %v702_v18  ;;  %v437_v23 = vld [vmem:[%s3483_s10 + $0x80] sm:$0xff]  ;;  %1470 = vmatpush1.msra.mxu0 %v445_v19 }
  0x8a   : > { %v694_v22 = vld [vmem:[%s3483_s10 + $0x888] sm:$0xff]  ;;  %v693_v24 = vld [vmem:[%s3483_s10 + $0x880] sm:$0xff]  ;;  %1547 = vmatpush1.msra.mxu1 %v701_v20  ;;  %1471 = vmatprep.subr.mxu0 %v438_v21 }
  0x8b   : > { %v430_v25 = vld [vmem:[%s3483_s10 + $0x48] sm:$0xff]  ;;  %1548 = vmatprep.subr.mxu1 %v694_v22  ;;  %v429_v27 = vld [vmem:[%s3483_s10 + $0x40] sm:$0xff]  ;;  %1472 = vmatpush1.msra.mxu0 %v437_v23 }
  0x8c   : > { %v686_v26 = vld [vmem:[%s3483_s10 + $0x848] sm:$0xff]  ;;  %v685_v28 = vld [vmem:[%s3483_s10 + $0x840] sm:$0xff]  ;;  %1549 = vmatpush1.msra.mxu1 %v693_v24  ;;  %1473 = vmatprep.subr.mxu0 %v430_v25 }
  0x8d   : > { %v422_v29 = vld [vmem:[%s3483_s10 + $0x8] sm:$0xff]  ;;  %1550 = vmatprep.subr.mxu1 %v686_v26  ;;  %v421_v31 = vld [vmem:[%s3483_s10] sm:$0xff]  ;;  %1474 = vmatpush1.msra.mxu0 %v429_v27 }
  0x8e   : > { %v678_v30 = vld [vmem:[%s3483_s10 + $0x808] sm:$0xff]  ;;  %v677_v32 = vld [vmem:[%s3483_s10 + $0x800] sm:$0xff]  ;;  %1551 = vmatpush1.msra.mxu1 %v685_v28  ;;  %1475 = vmatprep.subr.mxu0 %v422_v29 }
  0x8f   : > { %v670_v33 = vld [vmem:[%s3483_s10 + $0x7c8] sm:$0xff]  ;;  %1552 = vmatprep.subr.mxu1 %v678_v30  ;;  %v669_v35 = vld [vmem:[%s3483_s10 + $0x7c0] sm:$0xff]  ;;  %1476 = vmatpush1.msra.mxu0 %v421_v31 }
  0x90   : > { %v926_v34 = vld [vmem:[%s3483_s10 + $0xfc8] sm:$0xff]  ;;  %v925_v36 = vld [vmem:[%s3483_s10 + $0xfc0] sm:$0xff]  ;;  %1553 = vmatpush1.msra.mxu1 %v677_v32  ;;  %1477 = vmatprep.subr.mxu0 %v670_v33 }
  0x91   : > { %v662_v37 = vld [vmem:[%s3483_s10 + $0x788] sm:$0xff]  ;;  %1554 = vmatprep.subr.mxu1 %v926_v34  ;;  %v661_v39 = vld [vmem:[%s3483_s10 + $0x780] sm:$0xff]  ;;  %1478 = vmatpush2.msra.mxu0 %v669_v35  ;;  %v408_v34 = vld [vmem:[%s3481_s5 + $0x18] sm:$0xff] }
  0x92   : > { %v918_v38 = vld [vmem:[%s3483_s10 + $0xf88] sm:$0xff]  ;;  %v917_v40 = vld [vmem:[%s3483_s10 + $0xf80] sm:$0xff]  ;;  %1555 = vmatpush2.msra.mxu1 %v925_v36  ;;  %1479 = vmatprep.subr.mxu0 %v662_v37  ;;  %v407_v36 = vld [vmem:[%s3481_s5 + $0x10] sm:$0xff] }
  0x93   : > { %v654_v41 = vld [vmem:[%s3483_s10 + $0x748] sm:$0xff]  ;;  %1556 = vmatprep.subr.mxu1 %v918_v38  ;;  %v653_v43 = vld [vmem:[%s3483_s10 + $0x740] sm:$0xff]  ;;  %1480 = vmatpush2.msra.mxu0 %v661_v39 }
  0x94   : > { %v910_v42 = vld [vmem:[%s3483_s10 + $0xf48] sm:$0xff]  ;;  %v909_v44 = vld [vmem:[%s3483_s10 + $0xf40] sm:$0xff]  ;;  %1557 = vmatpush2.msra.mxu1 %v917_v40  ;;  %1481 = vmatprep.subr.mxu0 %v654_v41 }
  0x95   : > { %v646_v45 = vld [vmem:[%s3483_s10 + $0x708] sm:$0xff]  ;;  %1558 = vmatprep.subr.mxu1 %v910_v42  ;;  %v645_v47 = vld [vmem:[%s3483_s10 + $0x700] sm:$0xff]  ;;  %1482 = vmatpush2.msra.mxu0 %v653_v43 }
  0x96   : > { %v902_v46 = vld [vmem:[%s3483_s10 + $0xf08] sm:$0xff]  ;;  %v901_v48 = vld [vmem:[%s3483_s10 + $0xf00] sm:$0xff]  ;;  %1559 = vmatpush2.msra.mxu1 %v909_v44  ;;  %1483 = vmatprep.subr.mxu0 %v646_v45 }
  0x97   : > { %v638_v49 = vld [vmem:[%s3483_s10 + $0x6c8] sm:$0xff]  ;;  %1560 = vmatprep.subr.mxu1 %v902_v46  ;;  %v637_v51 = vld [vmem:[%s3483_s10 + $0x6c0] sm:$0xff]  ;;  %1484 = vmatpush2.msra.mxu0 %v645_v47 }
  0x98   : > { %v894_v50 = vld [vmem:[%s3483_s10 + $0xec8] sm:$0xff]  ;;  %v893_v52 = vld [vmem:[%s3483_s10 + $0xec0] sm:$0xff]  ;;  %1561 = vmatpush2.msra.mxu1 %v901_v48  ;;  %1485 = vmatprep.subr.mxu0 %v638_v49 }
  0x99   : > { %v630_v53 = vld [vmem:[%s3483_s10 + $0x688] sm:$0xff]  ;;  %1562 = vmatprep.subr.mxu1 %v894_v50  ;;  %v629_v55 = vld [vmem:[%s3483_s10 + $0x680] sm:$0xff]  ;;  %1486 = vmatpush2.msra.mxu0 %v637_v51 }
  0x9a   : > { %v886_v54 = vld [vmem:[%s3483_s10 + $0xe88] sm:$0xff]  ;;  %v885_v56 = vld [vmem:[%s3483_s10 + $0xe80] sm:$0xff]  ;;  %1563 = vmatpush2.msra.mxu1 %v893_v52  ;;  %1487 = vmatprep.subr.mxu0 %v630_v53 }
  0x9b   : > { %v622_v57 = vld [vmem:[%s3483_s10 + $0x648] sm:$0xff]  ;;  %1564 = vmatprep.subr.mxu1 %v886_v54  ;;  %v621_v59 = vld [vmem:[%s3483_s10 + $0x640] sm:$0xff]  ;;  %1488 = vmatpush2.msra.mxu0 %v629_v55 }
  0x9c   : > { %v878_v58 = vld [vmem:[%s3483_s10 + $0xe48] sm:$0xff]  ;;  %v877_v60 = vld [vmem:[%s3483_s10 + $0xe40] sm:$0xff]  ;;  %1565 = vmatpush2.msra.mxu1 %v885_v56  ;;  %1489 = vmatprep.subr.mxu0 %v622_v57 }
  0x9d   : > { %v614_v61 = vld [vmem:[%s3483_s10 + $0x608] sm:$0xff]  ;;  %1566 = vmatprep.subr.mxu1 %v878_v58  ;;  %v613_v63 = vld [vmem:[%s3483_s10 + $0x600] sm:$0xff]  ;;  %1490 = vmatpush2.msra.mxu0 %v621_v59 }
  0x9e   : > { %v870_v62 = vld [vmem:[%s3483_s10 + $0xe08] sm:$0xff]  ;;  %v869_v0 = vld [vmem:[%s3483_s10 + $0xe00] sm:$0xff]  ;;  %1567 = vmatpush2.msra.mxu1 %v877_v60  ;;  %1491 = vmatprep.subr.mxu0 %v614_v61 }
  0x9f   : > { %v606_v1 = vld [vmem:[%s3483_s10 + $0x5c8] sm:$0xff]  ;;  %1568 = vmatprep.subr.mxu1 %v870_v62  ;;  %v605_v3 = vld [vmem:[%s3483_s10 + $0x5c0] sm:$0xff]  ;;  %1492 = vmatpush2.msra.mxu0 %v613_v63 }
  0xa0   : > { %v862_v2 = vld [vmem:[%s3483_s10 + $0xdc8] sm:$0xff]  ;;  %v861_v4 = vld [vmem:[%s3483_s10 + $0xdc0] sm:$0xff]  ;;  %1569 = vmatpush2.msra.mxu1 %v869_v0  ;;  %1493 = vmatprep.subr.mxu0 %v606_v1 }
  0xa1   : > { %v598_v5 = vld [vmem:[%s3483_s10 + $0x588] sm:$0xff]  ;;  %1570 = vmatprep.subr.mxu1 %v862_v2  ;;  %v597_v7 = vld [vmem:[%s3483_s10 + $0x580] sm:$0xff]  ;;  %1494 = vmatpush2.msra.mxu0 %v605_v3 }
  0xa2   : > { %v854_v6 = vld [vmem:[%s3483_s10 + $0xd88] sm:$0xff]  ;;  %v853_v8 = vld [vmem:[%s3483_s10 + $0xd80] sm:$0xff]  ;;  %1571 = vmatpush2.msra.mxu1 %v861_v4  ;;  %1495 = vmatprep.subr.mxu0 %v598_v5 }
  0xa3   : > { %v590_v9 = vld [vmem:[%s3483_s10 + $0x548] sm:$0xff]  ;;  %1572 = vmatprep.subr.mxu1 %v854_v6  ;;  %v589_v11 = vld [vmem:[%s3483_s10 + $0x540] sm:$0xff]  ;;  %1496 = vmatpush2.msra.mxu0 %v597_v7 }
  0xa4   : > { %v846_v10 = vld [vmem:[%s3483_s10 + $0xd48] sm:$0xff]  ;;  %v845_v12 = vld [vmem:[%s3483_s10 + $0xd40] sm:$0xff]  ;;  %1573 = vmatpush2.msra.mxu1 %v853_v8  ;;  %1497 = vmatprep.subr.mxu0 %v590_v9 }
  0xa5   : > { %v582_v13 = vld [vmem:[%s3483_s10 + $0x508] sm:$0xff]  ;;  %1574 = vmatprep.subr.mxu1 %v846_v10  ;;  %v581_v15 = vld [vmem:[%s3483_s10 + $0x500] sm:$0xff]  ;;  %1498 = vmatpush2.msra.mxu0 %v589_v11 }
  0xa6   : > { %v838_v14 = vld [vmem:[%s3483_s10 + $0xd08] sm:$0xff]  ;;  %v837_v16 = vld [vmem:[%s3483_s10 + $0xd00] sm:$0xff]  ;;  %1575 = vmatpush2.msra.mxu1 %v845_v12  ;;  %1499 = vmatprep.subr.mxu0 %v582_v13 }
  0xa7   : > { %v574_v17 = vld [vmem:[%s3483_s10 + $0x4c8] sm:$0xff]  ;;  %1576 = vmatprep.subr.mxu1 %v838_v14  ;;  %v573_v19 = vld [vmem:[%s3483_s10 + $0x4c0] sm:$0xff]  ;;  %1500 = vmatpush2.msra.mxu0 %v581_v15 }
  0xa8   : > { %v830_v18 = vld [vmem:[%s3483_s10 + $0xcc8] sm:$0xff]  ;;  %v829_v20 = vld [vmem:[%s3483_s10 + $0xcc0] sm:$0xff]  ;;  %1577 = vmatpush2.msra.mxu1 %v837_v16  ;;  %1501 = vmatprep.subr.mxu0 %v574_v17 }
  0xa9   : > { %v566_v21 = vld [vmem:[%s3483_s10 + $0x488] sm:$0xff]  ;;  %1578 = vmatprep.subr.mxu1 %v830_v18  ;;  %v565_v23 = vld [vmem:[%s3483_s10 + $0x480] sm:$0xff]  ;;  %1502 = vmatpush2.msra.mxu0 %v573_v19 }
  0xaa   : > { %v822_v22 = vld [vmem:[%s3483_s10 + $0xc88] sm:$0xff]  ;;  %v821_v24 = vld [vmem:[%s3483_s10 + $0xc80] sm:$0xff]  ;;  %1579 = vmatpush2.msra.mxu1 %v829_v20  ;;  %1503 = vmatprep.subr.mxu0 %v566_v21 }
  0xab   : > { %v558_v25 = vld [vmem:[%s3483_s10 + $0x448] sm:$0xff]  ;;  %1580 = vmatprep.subr.mxu1 %v822_v22  ;;  %v557_v27 = vld [vmem:[%s3483_s10 + $0x440] sm:$0xff]  ;;  %1504 = vmatpush2.msra.mxu0 %v565_v23 }
  0xac   : > { %v814_v26 = vld [vmem:[%s3483_s10 + $0xc48] sm:$0xff]  ;;  %v813_v28 = vld [vmem:[%s3483_s10 + $0xc40] sm:$0xff]  ;;  %1581 = vmatpush2.msra.mxu1 %v821_v24  ;;  %1505 = vmatprep.subr.mxu0 %v558_v25 }
  0xad   : > { %v550_v29 = vld [vmem:[%s3483_s10 + $0x408] sm:$0xff]  ;;  %1582 = vmatprep.subr.mxu1 %v814_v26  ;;  %v549_v31 = vld [vmem:[%s3483_s10 + $0x400] sm:$0xff]  ;;  %1506 = vmatpush2.msra.mxu0 %v557_v27 }
  0xae   : > { %v806_v30 = vld [vmem:[%s3483_s10 + $0xc08] sm:$0xff]  ;;  %1583 = vmatpush2.msra.mxu1 %v813_v28  ;;  %v805_v33 = vld [vmem:[%s3483_s10 + $0xc00] sm:$0xff]  ;;  %1507 = vmatprep.subr.mxu0 %v550_v29 }
  0xaf   : > { %v406_v32 = vld [vmem:[%s3481_s5 + $0x8] sm:$0xff]  ;;  %1584 = vmatprep.subr.mxu1 %v806_v30  ;;  %v405_v35 = vld [vmem:[%s3481_s5] sm:$0xff]  ;;  %1508 = vmatpush2.msra.mxu0 %v549_v31 }
  0xb0   : > { %1509 = vmatprep.mubr.f32.mxu0 %v406_v32  ;;  %v1054_v37 = vld [vmem:[%s3483_s10 + $0x13c8] sm:$0xff]  ;;  %1585 = vmatpush2.msra.mxu1 %v805_v33  ;;  %v1053_v39 = vld [vmem:[%s3483_s10 + $0x13c0] sm:$0xff] }
  0xb1   : > { %v1310_v38 = vld [vmem:[%s3483_s10 + $0x1bc8] sm:$0xff]  ;;  %1586 = vmatprep.mubr.f32.mxu1 %v408_v34  ;;  %v1309_v40 = vld [vmem:[%s3483_s10 + $0x1bc0] sm:$0xff]  ;;  %1510 = vmatmul.mubr.f32.vlgmr.msra.gmra.mxu0 %v405_v35 }
  0xb2   : > { %1587 = vmatmul.mubr.f32.vlgmr.msra.gmra.mxu1 %v407_v36  ;;  %v1046_v41 = vld [vmem:[%s3483_s10 + $0x1388] sm:$0xff]  ;;  %1599 = vmatprep.subr.mxu0 %v1054_v37  ;;  %v1045_v43 = vld [vmem:[%s3483_s10 + $0x1380] sm:$0xff] }
  0xb3   : > { %v1302_v42 = vld [vmem:[%s3483_s10 + $0x1b88] sm:$0xff]  ;;  %1676 = vmatprep.subr.mxu1 %v1310_v38  ;;  %v1301_v44 = vld [vmem:[%s3483_s10 + $0x1b80] sm:$0xff]  ;;  %1600 = vmatpush1.msra.mxu0 %v1053_v39 }
  0xb4   : > { %1677 = vmatpush1.msra.mxu1 %v1309_v40  ;;  %v1038_v45 = vld [vmem:[%s3483_s10 + $0x1348] sm:$0xff]  ;;  %1601 = vmatprep.subr.mxu0 %v1046_v41  ;;  %v1037_v47 = vld [vmem:[%s3483_s10 + $0x1340] sm:$0xff] }
  0xb5   : > { %v1294_v46 = vld [vmem:[%s3483_s10 + $0x1b48] sm:$0xff]  ;;  %1678 = vmatprep.subr.mxu1 %v1302_v42  ;;  %v1293_v48 = vld [vmem:[%s3483_s10 + $0x1b40] sm:$0xff]  ;;  %1602 = vmatpush1.msra.mxu0 %v1045_v43 }
  0xb6   : > { %1679 = vmatpush1.msra.mxu1 %v1301_v44  ;;  %v1030_v49 = vld [vmem:[%s3483_s10 + $0x1308] sm:$0xff]  ;;  %1603 = vmatprep.subr.mxu0 %v1038_v45  ;;  %v1029_v51 = vld [vmem:[%s3483_s10 + $0x1300] sm:$0xff] }
  0xb7   : > { %v1286_v50 = vld [vmem:[%s3483_s10 + $0x1b08] sm:$0xff]  ;;  %1680 = vmatprep.subr.mxu1 %v1294_v46  ;;  %v1285_v52 = vld [vmem:[%s3483_s10 + $0x1b00] sm:$0xff]  ;;  %1604 = vmatpush1.msra.mxu0 %v1037_v47 }
  0xb8   : > { %1681 = vmatpush1.msra.mxu1 %v1293_v48  ;;  %v1022_v53 = vld [vmem:[%s3483_s10 + $0x12c8] sm:$0xff]  ;;  %1605 = vmatprep.subr.mxu0 %v1030_v49  ;;  %v1021_v55 = vld [vmem:[%s3483_s10 + $0x12c0] sm:$0xff] }
  0xb9   : > { %v1278_v54 = vld [vmem:[%s3483_s10 + $0x1ac8] sm:$0xff]  ;;  %1682 = vmatprep.subr.mxu1 %v1286_v50  ;;  %v1277_v56 = vld [vmem:[%s3483_s10 + $0x1ac0] sm:$0xff]  ;;  %1606 = vmatpush1.msra.mxu0 %v1029_v51 }
  0xba   : > { %1683 = vmatpush1.msra.mxu1 %v1285_v52  ;;  %v1014_v57 = vld [vmem:[%s3483_s10 + $0x1288] sm:$0xff]  ;;  %1607 = vmatprep.subr.mxu0 %v1022_v53  ;;  %v1013_v59 = vld [vmem:[%s3483_s10 + $0x1280] sm:$0xff] }
  0xbb   : > { %v1270_v58 = vld [vmem:[%s3483_s10 + $0x1a88] sm:$0xff]  ;;  %1684 = vmatprep.subr.mxu1 %v1278_v54  ;;  %v1269_v60 = vld [vmem:[%s3483_s10 + $0x1a80] sm:$0xff]  ;;  %1608 = vmatpush1.msra.mxu0 %v1021_v55 }
  0xbc   : > { %1685 = vmatpush1.msra.mxu1 %v1277_v56  ;;  %v1006_v61 = vld [vmem:[%s3483_s10 + $0x1248] sm:$0xff]  ;;  %1609 = vmatprep.subr.mxu0 %v1014_v57  ;;  %v1005_v63 = vld [vmem:[%s3483_s10 + $0x1240] sm:$0xff] }
  0xbd   : > { %v1262_v62 = vld [vmem:[%s3483_s10 + $0x1a48] sm:$0xff]  ;;  %1686 = vmatprep.subr.mxu1 %v1270_v58  ;;  %v1261_v0 = vld [vmem:[%s3483_s10 + $0x1a40] sm:$0xff]  ;;  %1610 = vmatpush1.msra.mxu0 %v1013_v59 }
  0xbe   : > { %1687 = vmatpush1.msra.mxu1 %v1269_v60  ;;  %v998_v1 = vld [vmem:[%s3483_s10 + $0x1208] sm:$0xff]  ;;  %1611 = vmatprep.subr.mxu0 %v1006_v61  ;;  %v997_v3 = vld [vmem:[%s3483_s10 + $0x1200] sm:$0xff] }
  0xbf   : > { %v1254_v2 = vld [vmem:[%s3483_s10 + $0x1a08] sm:$0xff]  ;;  %1688 = vmatprep.subr.mxu1 %v1262_v62  ;;  %v1253_v4 = vld [vmem:[%s3483_s10 + $0x1a00] sm:$0xff]  ;;  %1612 = vmatpush1.msra.mxu0 %v1005_v63 }
  0xc0   : > { %1689 = vmatpush1.msra.mxu1 %v1261_v0  ;;  %v990_v5 = vld [vmem:[%s3483_s10 + $0x11c8] sm:$0xff]  ;;  %1613 = vmatprep.subr.mxu0 %v998_v1  ;;  %v989_v7 = vld [vmem:[%s3483_s10 + $0x11c0] sm:$0xff] }
  0xc1   : > { %v1246_v6 = vld [vmem:[%s3483_s10 + $0x19c8] sm:$0xff]  ;;  %1690 = vmatprep.subr.mxu1 %v1254_v2  ;;  %v1245_v8 = vld [vmem:[%s3483_s10 + $0x19c0] sm:$0xff]  ;;  %1614 = vmatpush1.msra.mxu0 %v997_v3 }
  0xc2   : > { %1691 = vmatpush1.msra.mxu1 %v1253_v4  ;;  %v982_v9 = vld [vmem:[%s3483_s10 + $0x1188] sm:$0xff]  ;;  %1615 = vmatprep.subr.mxu0 %v990_v5  ;;  %v981_v11 = vld [vmem:[%s3483_s10 + $0x1180] sm:$0xff] }
  0xc3   : > { %v1238_v10 = vld [vmem:[%s3483_s10 + $0x1988] sm:$0xff]  ;;  %1692 = vmatprep.subr.mxu1 %v1246_v6  ;;  %v1237_v12 = vld [vmem:[%s3483_s10 + $0x1980] sm:$0xff]  ;;  %1616 = vmatpush1.msra.mxu0 %v989_v7 }
  0xc4   : > { %1693 = vmatpush1.msra.mxu1 %v1245_v8  ;;  %v974_v13 = vld [vmem:[%s3483_s10 + $0x1148] sm:$0xff]  ;;  %1617 = vmatprep.subr.mxu0 %v982_v9  ;;  %v973_v15 = vld [vmem:[%s3483_s10 + $0x1140] sm:$0xff] }
  0xc5   : > { %v1230_v14 = vld [vmem:[%s3483_s10 + $0x1948] sm:$0xff]  ;;  %1694 = vmatprep.subr.mxu1 %v1238_v10  ;;  %v1229_v16 = vld [vmem:[%s3483_s10 + $0x1940] sm:$0xff]  ;;  %1618 = vmatpush1.msra.mxu0 %v981_v11 }
  0xc6   : > { %1695 = vmatpush1.msra.mxu1 %v1237_v12  ;;  %v966_v17 = vld [vmem:[%s3483_s10 + $0x1108] sm:$0xff]  ;;  %1619 = vmatprep.subr.mxu0 %v974_v13  ;;  %v965_v19 = vld [vmem:[%s3483_s10 + $0x1100] sm:$0xff] }
  0xc7   : > { %v1222_v18 = vld [vmem:[%s3483_s10 + $0x1908] sm:$0xff]  ;;  %1696 = vmatprep.subr.mxu1 %v1230_v14  ;;  %v1221_v20 = vld [vmem:[%s3483_s10 + $0x1900] sm:$0xff]  ;;  %1620 = vmatpush1.msra.mxu0 %v973_v15 }
  0xc8   : > { %1697 = vmatpush1.msra.mxu1 %v1229_v16  ;;  %v958_v21 = vld [vmem:[%s3483_s10 + $0x10c8] sm:$0xff]  ;;  %1621 = vmatprep.subr.mxu0 %v966_v17  ;;  %v957_v23 = vld [vmem:[%s3483_s10 + $0x10c0] sm:$0xff] }
  0xc9   : > { %v1214_v22 = vld [vmem:[%s3483_s10 + $0x18c8] sm:$0xff]  ;;  %1698 = vmatprep.subr.mxu1 %v1222_v18  ;;  %v1213_v24 = vld [vmem:[%s3483_s10 + $0x18c0] sm:$0xff]  ;;  %1622 = vmatpush1.msra.mxu0 %v965_v19 }
  0xca   : > { %1699 = vmatpush1.msra.mxu1 %v1221_v20  ;;  %v950_v25 = vld [vmem:[%s3483_s10 + $0x1088] sm:$0xff]  ;;  %1623 = vmatprep.subr.mxu0 %v958_v21  ;;  %v949_v27 = vld [vmem:[%s3483_s10 + $0x1080] sm:$0xff] }
  0xcb   : > { %v1206_v26 = vld [vmem:[%s3483_s10 + $0x1888] sm:$0xff]  ;;  %1700 = vmatprep.subr.mxu1 %v1214_v22  ;;  %v1205_v28 = vld [vmem:[%s3483_s10 + $0x1880] sm:$0xff]  ;;  %1624 = vmatpush1.msra.mxu0 %v957_v23 }
  0xcc   : > { %1701 = vmatpush1.msra.mxu1 %v1213_v24  ;;  %v942_v29 = vld [vmem:[%s3483_s10 + $0x1048] sm:$0xff]  ;;  %1625 = vmatprep.subr.mxu0 %v950_v25  ;;  %v941_v31 = vld [vmem:[%s3483_s10 + $0x1040] sm:$0xff] }
  0xcd   : > { %v1198_v30 = vld [vmem:[%s3483_s10 + $0x1848] sm:$0xff]  ;;  %1702 = vmatprep.subr.mxu1 %v1206_v26  ;;  %v1197_v32 = vld [vmem:[%s3483_s10 + $0x1840] sm:$0xff]  ;;  %1626 = vmatpush1.msra.mxu0 %v949_v27  ;;  %v416_v26 = vld [vmem:[%s3481_s5 + $0x58] sm:$0xff] }
  0xce   : > { %1703 = vmatpush1.msra.mxu1 %v1205_v28  ;;  %v934_v33 = vld [vmem:[%s3483_s10 + $0x1008] sm:$0xff]  ;;  %1627 = vmatprep.subr.mxu0 %v942_v29  ;;  %v933_v35 = vld [vmem:[%s3483_s10 + $0x1000] sm:$0xff] }
  0xcf   : > { %v1190_v34 = vld [vmem:[%s3483_s10 + $0x1808] sm:$0xff]  ;;  %1704 = vmatprep.subr.mxu1 %v1198_v30  ;;  %v1189_v36 = vld [vmem:[%s3483_s10 + $0x1800] sm:$0xff]  ;;  %1628 = vmatpush1.msra.mxu0 %v941_v31  ;;  %v415_v30 = vld [vmem:[%s3481_s5 + $0x50] sm:$0xff] }
  0xd0   : > { %1705 = vmatpush1.msra.mxu1 %v1197_v32  ;;  %v1182_v37 = vld [vmem:[%s3483_s10 + $0x17c8] sm:$0xff]  ;;  %1629 = vmatprep.subr.mxu0 %v934_v33  ;;  %v1181_v39 = vld [vmem:[%s3483_s10 + $0x17c0] sm:$0xff] }
  0xd1   : > { %v1438_v38 = vld [vmem:[%s3483_s10 + $0x1fc8] sm:$0xff]  ;;  %1706 = vmatprep.subr.mxu1 %v1190_v34  ;;  %v1437_v40 = vld [vmem:[%s3483_s10 + $0x1fc0] sm:$0xff]  ;;  %1630 = vmatpush1.msra.mxu0 %v933_v35 }
  0xd2   : > { %1707 = vmatpush1.msra.mxu1 %v1189_v36  ;;  %v1174_v41 = vld [vmem:[%s3483_s10 + $0x1788] sm:$0xff]  ;;  %1631 = vmatprep.subr.mxu0 %v1182_v37  ;;  %v1173_v43 = vld [vmem:[%s3483_s10 + $0x1780] sm:$0xff] }
  0xd3   : > { %v1430_v42 = vld [vmem:[%s3483_s10 + $0x1f88] sm:$0xff]  ;;  %1708 = vmatprep.subr.mxu1 %v1438_v38  ;;  %v1429_v44 = vld [vmem:[%s3483_s10 + $0x1f80] sm:$0xff]  ;;  %1632 = vmatpush2.msra.mxu0 %v1181_v39 }
  0xd4   : > { %1709 = vmatpush2.msra.mxu1 %v1437_v40  ;;  %v1166_v45 = vld [vmem:[%s3483_s10 + $0x1748] sm:$0xff]  ;;  %1633 = vmatprep.subr.mxu0 %v1174_v41  ;;  %v1165_v47 = vld [vmem:[%s3483_s10 + $0x1740] sm:$0xff] }
  0xd5   : > { %v1422_v46 = vld [vmem:[%s3483_s10 + $0x1f48] sm:$0xff]  ;;  %1710 = vmatprep.subr.mxu1 %v1430_v42  ;;  %v1421_v48 = vld [vmem:[%s3483_s10 + $0x1f40] sm:$0xff]  ;;  %1634 = vmatpush2.msra.mxu0 %v1173_v43  ;;  %v412_v43 = vld [vmem:[%s3481_s5 + $0x38] sm:$0xff] }
  0xd6   : > { %1711 = vmatpush2.msra.mxu1 %v1429_v44  ;;  %v1158_v49 = vld [vmem:[%s3483_s10 + $0x1708] sm:$0xff]  ;;  %1635 = vmatprep.subr.mxu0 %v1166_v45  ;;  %v1157_v51 = vld [vmem:[%s3483_s10 + $0x1700] sm:$0xff]  ;;  %v544_v44 = vld [vmem:[%s3483_s10 + $0x3d8] sm:$0xff] }
  0xd7   : > { %v1414_v50 = vld [vmem:[%s3483_s10 + $0x1f08] sm:$0xff]  ;;  %1712 = vmatprep.subr.mxu1 %v1422_v46  ;;  %v1413_v52 = vld [vmem:[%s3483_s10 + $0x1f00] sm:$0xff]  ;;  %1636 = vmatpush2.msra.mxu0 %v1165_v47  ;;  %v800_v45 = vld [vmem:[%s3483_s10 + $0xbd8] sm:$0xff] }
  0xd8   : > { %1713 = vmatpush2.msra.mxu1 %v1421_v48  ;;  %v1150_v53 = vld [vmem:[%s3483_s10 + $0x16c8] sm:$0xff]  ;;  %1637 = vmatprep.subr.mxu0 %v1158_v49  ;;  %v1149_v55 = vld [vmem:[%s3483_s10 + $0x16c0] sm:$0xff]  ;;  %v411_v46 = vld [vmem:[%s3481_s5 + $0x30] sm:$0xff] }
  0xd9   : > { %v1406_v54 = vld [vmem:[%s3483_s10 + $0x1ec8] sm:$0xff]  ;;  %1714 = vmatprep.subr.mxu1 %v1414_v50  ;;  %v1405_v56 = vld [vmem:[%s3483_s10 + $0x1ec0] sm:$0xff]  ;;  %1638 = vmatpush2.msra.mxu0 %v1157_v51  ;;  %v543_v47 = vld [vmem:[%s3483_s10 + $0x3d0] sm:$0xff] }
  0xda   : > { %1715 = vmatpush2.msra.mxu1 %v1413_v52  ;;  %v1142_v57 = vld [vmem:[%s3483_s10 + $0x1688] sm:$0xff]  ;;  %1639 = vmatprep.subr.mxu0 %v1150_v53  ;;  %v1141_v59 = vld [vmem:[%s3483_s10 + $0x1680] sm:$0xff]  ;;  %v799_v48 = vld [vmem:[%s3483_s10 + $0xbd0] sm:$0xff] }
  0xdb   : > { %v1398_v58 = vld [vmem:[%s3483_s10 + $0x1e88] sm:$0xff]  ;;  %1716 = vmatprep.subr.mxu1 %v1406_v54  ;;  %v1397_v60 = vld [vmem:[%s3483_s10 + $0x1e80] sm:$0xff]  ;;  %1640 = vmatpush2.msra.mxu0 %v1149_v55  ;;  %v536_v49 = vld [vmem:[%s3483_s10 + $0x398] sm:$0xff] }
  0xdc   : > { %1717 = vmatpush2.msra.mxu1 %v1405_v56  ;;  %v1134_v61 = vld [vmem:[%s3483_s10 + $0x1648] sm:$0xff]  ;;  %1641 = vmatprep.subr.mxu0 %v1142_v57  ;;  %v1133_v63 = vld [vmem:[%s3483_s10 + $0x1640] sm:$0xff]  ;;  %v792_v50 = vld [vmem:[%s3483_s10 + $0xb98] sm:$0xff] }
  0xdd   : > { %v1390_v62 = vld [vmem:[%s3483_s10 + $0x1e48] sm:$0xff]  ;;  %1718 = vmatprep.subr.mxu1 %v1398_v58  ;;  %v1389_v0 = vld [vmem:[%s3483_s10 + $0x1e40] sm:$0xff]  ;;  %1642 = vmatpush2.msra.mxu0 %v1141_v59  ;;  %v535_v52 = vld [vmem:[%s3483_s10 + $0x390] sm:$0xff] }
  0xde   : > { %1719 = vmatpush2.msra.mxu1 %v1397_v60  ;;  %v1126_v1 = vld [vmem:[%s3483_s10 + $0x1608] sm:$0xff]  ;;  %1643 = vmatprep.subr.mxu0 %v1134_v61  ;;  %v1125_v3 = vld [vmem:[%s3483_s10 + $0x1600] sm:$0xff]  ;;  %v791_v53 = vld [vmem:[%s3483_s10 + $0xb90] sm:$0xff] }
  0xdf   : > { %v1382_v2 = vld [vmem:[%s3483_s10 + $0x1e08] sm:$0xff]  ;;  %1720 = vmatprep.subr.mxu1 %v1390_v62  ;;  %v1381_v4 = vld [vmem:[%s3483_s10 + $0x1e00] sm:$0xff]  ;;  %1644 = vmatpush2.msra.mxu0 %v1133_v63  ;;  %v528_v55 = vld [vmem:[%s3483_s10 + $0x358] sm:$0xff] }
  0xe0   : > { %1721 = vmatpush2.msra.mxu1 %v1389_v0  ;;  %v1118_v5 = vld [vmem:[%s3483_s10 + $0x15c8] sm:$0xff]  ;;  %1645 = vmatprep.subr.mxu0 %v1126_v1  ;;  %v1117_v7 = vld [vmem:[%s3483_s10 + $0x15c0] sm:$0xff]  ;;  %v784_v56 = vld [vmem:[%s3483_s10 + $0xb58] sm:$0xff] }
  0xe1   : > { %v1374_v6 = vld [vmem:[%s3483_s10 + $0x1dc8] sm:$0xff]  ;;  %1722 = vmatprep.subr.mxu1 %v1382_v2  ;;  %v1373_v8 = vld [vmem:[%s3483_s10 + $0x1dc0] sm:$0xff]  ;;  %1646 = vmatpush2.msra.mxu0 %v1125_v3  ;;  %v420_v57 = vld [vmem:[%s3481_s5 + $0x78] sm:$0xff] }
  0xe2   : > { %1723 = vmatpush2.msra.mxu1 %v1381_v4  ;;  %v1110_v9 = vld [vmem:[%s3483_s10 + $0x1588] sm:$0xff]  ;;  %1647 = vmatprep.subr.mxu0 %v1118_v5  ;;  %v1109_v11 = vld [vmem:[%s3483_s10 + $0x1580] sm:$0xff]  ;;  %v527_v58 = vld [vmem:[%s3483_s10 + $0x350] sm:$0xff] }
  0xe3   : > { %v1366_v10 = vld [vmem:[%s3483_s10 + $0x1d88] sm:$0xff]  ;;  %1724 = vmatprep.subr.mxu1 %v1374_v6  ;;  %v1365_v12 = vld [vmem:[%s3483_s10 + $0x1d80] sm:$0xff]  ;;  %1648 = vmatpush2.msra.mxu0 %v1117_v7  ;;  %v783_v59 = vld [vmem:[%s3483_s10 + $0xb50] sm:$0xff] }
  0xe4   : > { %1725 = vmatpush2.msra.mxu1 %v1373_v8  ;;  %v1102_v13 = vld [vmem:[%s3483_s10 + $0x1548] sm:$0xff]  ;;  %1649 = vmatprep.subr.mxu0 %v1110_v9  ;;  %v1101_v15 = vld [vmem:[%s3483_s10 + $0x1540] sm:$0xff]  ;;  %v520_v60 = vld [vmem:[%s3483_s10 + $0x318] sm:$0xff] }
  0xe5   : > { %v1358_v14 = vld [vmem:[%s3483_s10 + $0x1d48] sm:$0xff]  ;;  %1726 = vmatprep.subr.mxu1 %v1366_v10  ;;  %v1357_v16 = vld [vmem:[%s3483_s10 + $0x1d40] sm:$0xff]  ;;  %1650 = vmatpush2.msra.mxu0 %v1109_v11  ;;  %v419_v61 = vld [vmem:[%s3481_s5 + $0x70] sm:$0xff] }
  0xe6   : > { %1727 = vmatpush2.msra.mxu1 %v1365_v12  ;;  %v1094_v17 = vld [vmem:[%s3483_s10 + $0x1508] sm:$0xff]  ;;  %1651 = vmatprep.subr.mxu0 %v1102_v13  ;;  %v1093_v19 = vld [vmem:[%s3483_s10 + $0x1500] sm:$0xff]  ;;  %v776_v62 = vld [vmem:[%s3483_s10 + $0xb18] sm:$0xff] }
  0xe7   : > { %v1350_v18 = vld [vmem:[%s3483_s10 + $0x1d08] sm:$0xff]  ;;  %1728 = vmatprep.subr.mxu1 %v1358_v14  ;;  %v1349_v20 = vld [vmem:[%s3483_s10 + $0x1d00] sm:$0xff]  ;;  %1652 = vmatpush2.msra.mxu0 %v1101_v15  ;;  %v519_v63 = vld [vmem:[%s3483_s10 + $0x310] sm:$0xff] }
  0xe8   : > { %1729 = vmatpush2.msra.mxu1 %v1357_v16  ;;  %v1086_v21 = vld [vmem:[%s3483_s10 + $0x14c8] sm:$0xff]  ;;  %1653 = vmatprep.subr.mxu0 %v1094_v17  ;;  %v1085_v23 = vld [vmem:[%s3483_s10 + $0x14c0] sm:$0xff]  ;;  %v775_v0 = vld [vmem:[%s3483_s10 + $0xb10] sm:$0xff] }
  0xe9   : > { %v1342_v22 = vld [vmem:[%s3483_s10 + $0x1cc8] sm:$0xff]  ;;  %1730 = vmatprep.subr.mxu1 %v1350_v18  ;;  %v1341_v24 = vld [vmem:[%s3483_s10 + $0x1cc0] sm:$0xff]  ;;  %1654 = vmatpush2.msra.mxu0 %v1093_v19  ;;  %v512_v1 = vld [vmem:[%s3483_s10 + $0x2d8] sm:$0xff] }
  0xea   : > { %1731 = vmatpush2.msra.mxu1 %v1349_v20  ;;  %v414_v25 = vld [vmem:[%s3481_s5 + $0x48] sm:$0xff]  ;;  %1655 = vmatprep.subr.mxu0 %v1086_v21  ;;  %v413_v29 = vld [vmem:[%s3481_s5 + $0x40] sm:$0xff]  ;;  %v768_v2 = vld [vmem:[%s3483_s10 + $0xad8] sm:$0xff] }
  0xeb   : > { %1732 = vmatprep.subr.mxu1 %v1342_v22  ;;  %v1078_v27 = vld [vmem:[%s3483_s10 + $0x1488] sm:$0xff]  ;;  %1656 = vmatpush2.msra.mxu0 %v1085_v23  ;;  %v1077_v31 = vld [vmem:[%s3483_s10 + $0x1480] sm:$0xff]  ;;  %v511_v3 = vld [vmem:[%s3483_s10 + $0x2d0] sm:$0xff] }
  0xec   : > { %v1334_v28 = vld [vmem:[%s3483_s10 + $0x1c88] sm:$0xff]  ;;  %1733 = vmatpush2.msra.mxu1 %v1341_v24  ;;  %1515 = vmatprep.mubr.f32.mxu0 %v414_v25  ;;  %v1333_v32 = vld [vmem:[%s3483_s10 + $0x1c80] sm:$0xff]  ;;  %v767_v4 = vld [vmem:[%s3483_s10 + $0xad0] sm:$0xff] }
  0xed   : > { %1592 = vmatprep.mubr.f32.mxu1 %v416_v26  ;;  %1657 = vmatprep.subr.mxu0 %v1078_v27  ;;  %v1070_v33 = vld [vmem:[%s3483_s10 + $0x1448] sm:$0xff]  ;;  %v1069_v35 = vld [vmem:[%s3483_s10 + $0x1440] sm:$0xff]  ;;  %v504_v5 = vld [vmem:[%s3483_s10 + $0x298] sm:$0xff] }
  0xee   : > { %1734 = vmatprep.subr.mxu1 %v1334_v28  ;;  %v1326_v34 = vld [vmem:[%s3483_s10 + $0x1c48] sm:$0xff]  ;;  %1516 = vmatmul.mubr.f32.gmra.mxu0 %v413_v29  ;;  %v1325_v36 = vld [vmem:[%s3483_s10 + $0x1c40] sm:$0xff]  ;;  %v760_v6 = vld [vmem:[%s3483_s10 + $0xa98] sm:$0xff] }
  0xef   : > { %1593 = vmatmul.mubr.f32.gmra.mxu1 %v415_v30  ;;  %1658 = vmatpush2.msra.mxu0 %v1077_v31  ;;  %v1062_v37 = vld [vmem:[%s3483_s10 + $0x1408] sm:$0xff]  ;;  %v1061_v39 = vld [vmem:[%s3483_s10 + $0x1400] sm:$0xff]  ;;  %v503_v7 = vld [vmem:[%s3483_s10 + $0x290] sm:$0xff] }
  0xf0   : > { %1735 = vmatpush2.msra.mxu1 %v1333_v32  ;;  %v1318_v38 = vld [vmem:[%s3483_s10 + $0x1c08] sm:$0xff]  ;;  %1659 = vmatprep.subr.mxu0 %v1070_v33  ;;  %v1317_v41 = vld [vmem:[%s3483_s10 + $0x1c00] sm:$0xff]  ;;  %v759_v8 = vld [vmem:[%s3483_s10 + $0xa90] sm:$0xff] }
  0xf1   : > { %1736 = vmatprep.subr.mxu1 %v1326_v34  ;;  %v410_v40 = vld [vmem:[%s3481_s5 + $0x28] sm:$0xff]  ;;  %1660 = vmatpush2.msra.mxu0 %v1069_v35  ;;  %v409_v42 = vld [vmem:[%s3481_s5 + $0x20] sm:$0xff]  ;;  %v496_v9 = vld [vmem:[%s3483_s10 + $0x258] sm:$0xff] }
  0xf2   : > { %1737 = vmatpush2.msra.mxu1 %v1325_v36  ;;  %1661 = vmatprep.subr.mxu0 %v1062_v37  ;;  %v418_v51 = vld [vmem:[%s3481_s5 + $0x68] sm:$0xff]  ;;  %v417_v54 = vld [vmem:[%s3481_s5 + $0x60] sm:$0xff]  ;;  %v752_v10 = vld [vmem:[%s3483_s10 + $0xa58] sm:$0xff] }
  0xf3   : > { %1738 = vmatprep.subr.mxu1 %v1318_v38  ;;  %1662 = vmatpush2.msra.mxu0 %v1061_v39  ;;  %v495_v11 = vld [vmem:[%s3483_s10 + $0x250] sm:$0xff]  ;;  %v488_v13 = vld [vmem:[%s3483_s10 + $0x218] sm:$0xff] }
  0xf4   : > { %1663 = vmatprep.mubr.f32.mxu0 %v410_v40  ;;  %1739 = vmatpush2.msra.mxu1 %v1317_v41  ;;  %v751_v12 = vld [vmem:[%s3483_s10 + $0xa50] sm:$0xff]  ;;  %v744_v14 = vld [vmem:[%s3483_s10 + $0xa18] sm:$0xff] }
  0xf5   : > { %1664 = vmatmul.mubr.f32.vlgmr.msra.gmra.mxu0 %v409_v42  ;;  %1740 = vmatprep.mubr.f32.mxu1 %v412_v43  ;;  %v487_v15 = vld [vmem:[%s3483_s10 + $0x210] sm:$0xff]  ;;  %v480_v17 = vld [vmem:[%s3483_s10 + $0x1d8] sm:$0xff] }
  0xf6   : > { %1753 = vmatprep.subr.mxu0 %v544_v44  ;;  %1830 = vmatprep.subr.mxu1 %v800_v45  ;;  %v743_v16 = vld [vmem:[%s3483_s10 + $0xa10] sm:$0xff]  ;;  %v736_v18 = vld [vmem:[%s3483_s10 + $0x9d8] sm:$0xff] }
  0xf7   : > { %1741 = vmatmul.mubr.f32.vlgmr.msra.gmra.mxu1 %v411_v46  ;;  %1754 = vmatpush1.msra.mxu0 %v543_v47  ;;  %v479_v19 = vld [vmem:[%s3483_s10 + $0x1d0] sm:$0xff]  ;;  %v472_v21 = vld [vmem:[%s3483_s10 + $0x198] sm:$0xff] }
  0xf8   : > { %1831 = vmatpush1.msra.mxu1 %v799_v48  ;;  %1755 = vmatprep.subr.mxu0 %v536_v49  ;;  %v735_v20 = vld [vmem:[%s3483_s10 + $0x9d0] sm:$0xff]  ;;  %v728_v22 = vld [vmem:[%s3483_s10 + $0x998] sm:$0xff] }
  0xf9   : > { %1832 = vmatprep.subr.mxu1 %v792_v50  ;;  %1669 = vmatprep.mubr.f32.mxu0 %v418_v51  ;;  %v471_v23 = vld [vmem:[%s3483_s10 + $0x190] sm:$0xff]  ;;  %v464_v25 = vld [vmem:[%s3483_s10 + $0x158] sm:$0xff] }
  0xfa   : > { %1756 = vmatpush1.msra.mxu0 %v535_v52  ;;  %1833 = vmatpush1.msra.mxu1 %v791_v53  ;;  %v727_v24 = vld [vmem:[%s3483_s10 + $0x990] sm:$0xff]  ;;  %v720_v26 = vld [vmem:[%s3483_s10 + $0x958] sm:$0xff] }
  0xfb   : > { %1670 = vmatmul.mubr.f32.gmra.mxu0 %v417_v54  ;;  %1757 = vmatprep.subr.mxu0 %v528_v55  ;;  %v463_v27 = vld [vmem:[%s3483_s10 + $0x150] sm:$0xff]  ;;  %v456_v29 = vld [vmem:[%s3483_s10 + $0x118] sm:$0xff] }
  0xfc   : > { %1834 = vmatprep.subr.mxu1 %v784_v56  ;;  %1746 = vmatprep.mubr.f32.mxu1 %v420_v57  ;;  %v719_v28 = vld [vmem:[%s3483_s10 + $0x950] sm:$0xff]  ;;  %v712_v30 = vld [vmem:[%s3483_s10 + $0x918] sm:$0xff] }
  0xfd   : > { %1758 = vmatpush1.msra.mxu0 %v527_v58  ;;  %1835 = vmatpush1.msra.mxu1 %v783_v59  ;;  %v455_v31 = vld [vmem:[%s3483_s10 + $0x110] sm:$0xff]  ;;  %v448_v33 = vld [vmem:[%s3483_s10 + $0xd8] sm:$0xff] }
  0xfe   : > { %1759 = vmatprep.subr.mxu0 %v520_v60  ;;  %1747 = vmatmul.mubr.f32.gmra.mxu1 %v419_v61  ;;  %v711_v32 = vld [vmem:[%s3483_s10 + $0x910] sm:$0xff]  ;;  %v704_v34 = vld [vmem:[%s3483_s10 + $0x8d8] sm:$0xff] }
  0xff   : > { %1836 = vmatprep.subr.mxu1 %v776_v62  ;;  %1760 = vmatpush1.msra.mxu0 %v519_v63  ;;  %v447_v35 = vld [vmem:[%s3483_s10 + $0xd0] sm:$0xff]  ;;  %v440_v37 = vld [vmem:[%s3483_s10 + $0x98] sm:$0xff] }
 0x100   : > { %1837 = vmatpush1.msra.mxu1 %v775_v0  ;;  %1761 = vmatprep.subr.mxu0 %v512_v1  ;;  %v703_v36 = vld [vmem:[%s3483_s10 + $0x8d0] sm:$0xff]  ;;  %v696_v38 = vld [vmem:[%s3483_s10 + $0x898] sm:$0xff] }
 0x101   : > { %1838 = vmatprep.subr.mxu1 %v768_v2  ;;  %1762 = vmatpush1.msra.mxu0 %v511_v3  ;;  %v439_v39 = vld [vmem:[%s3483_s10 + $0x90] sm:$0xff]  ;;  %v432_v41 = vld [vmem:[%s3483_s10 + $0x58] sm:$0xff] }
 0x102   : > { %1839 = vmatpush1.msra.mxu1 %v767_v4  ;;  %1763 = vmatprep.subr.mxu0 %v504_v5  ;;  %v695_v40 = vld [vmem:[%s3483_s10 + $0x890] sm:$0xff]  ;;  %v688_v42 = vld [vmem:[%s3483_s10 + $0x858] sm:$0xff] }
 0x103   : > { %1840 = vmatprep.subr.mxu1 %v760_v6  ;;  %1764 = vmatpush1.msra.mxu0 %v503_v7  ;;  %v431_v43 = vld [vmem:[%s3483_s10 + $0x50] sm:$0xff]  ;;  %v424_v45 = vld [vmem:[%s3483_s10 + $0x18] sm:$0xff] }
 0x104   : > { %1841 = vmatpush1.msra.mxu1 %v759_v8  ;;  %1765 = vmatprep.subr.mxu0 %v496_v9  ;;  %v687_v44 = vld [vmem:[%s3483_s10 + $0x850] sm:$0xff]  ;;  %v680_v46 = vld [vmem:[%s3483_s10 + $0x818] sm:$0xff] }
 0x105   : > { %1842 = vmatprep.subr.mxu1 %v752_v10  ;;  %1766 = vmatpush1.msra.mxu0 %v495_v11  ;;  %v423_v47 = vld [vmem:[%s3483_s10 + $0x10] sm:$0xff]  ;;  %v672_v49 = vld [vmem:[%s3483_s10 + $0x7d8] sm:$0xff] }
 0x106   : > { %1843 = vmatpush1.msra.mxu1 %v751_v12  ;;  %1767 = vmatprep.subr.mxu0 %v488_v13  ;;  %v679_v48 = vld [vmem:[%s3483_s10 + $0x810] sm:$0xff]  ;;  %v928_v50 = vld [vmem:[%s3483_s10 + $0xfd8] sm:$0xff] }
 0x107   : > { %1844 = vmatprep.subr.mxu1 %v744_v14  ;;  %1768 = vmatpush1.msra.mxu0 %v487_v15  ;;  %v671_v51 = vld [vmem:[%s3483_s10 + $0x7d0] sm:$0xff]  ;;  %v664_v53 = vld [vmem:[%s3483_s10 + $0x798] sm:$0xff] }
 0x108   : > { %1845 = vmatpush1.msra.mxu1 %v743_v16  ;;  %1769 = vmatprep.subr.mxu0 %v480_v17  ;;  %v927_v52 = vld [vmem:[%s3483_s10 + $0xfd0] sm:$0xff]  ;;  %v920_v54 = vld [vmem:[%s3483_s10 + $0xf98] sm:$0xff] }
 0x109   : > { %1846 = vmatprep.subr.mxu1 %v736_v18  ;;  %1770 = vmatpush1.msra.mxu0 %v479_v19  ;;  %v663_v55 = vld [vmem:[%s3483_s10 + $0x790] sm:$0xff]  ;;  %v656_v57 = vld [vmem:[%s3483_s10 + $0x758] sm:$0xff] }
 0x10a   : > { %1847 = vmatpush1.msra.mxu1 %v735_v20  ;;  %1771 = vmatprep.subr.mxu0 %v472_v21  ;;  %v919_v56 = vld [vmem:[%s3483_s10 + $0xf90] sm:$0xff]  ;;  %v912_v58 = vld [vmem:[%s3483_s10 + $0xf58] sm:$0xff] }
 0x10b   : > { %1848 = vmatprep.subr.mxu1 %v728_v22  ;;  %1772 = vmatpush1.msra.mxu0 %v471_v23  ;;  %v655_v59 = vld [vmem:[%s3483_s10 + $0x750] sm:$0xff]  ;;  %v648_v61 = vld [vmem:[%s3483_s10 + $0x718] sm:$0xff] }
 0x10c   : > { %1849 = vmatpush1.msra.mxu1 %v727_v24  ;;  %1773 = vmatprep.subr.mxu0 %v464_v25  ;;  %v911_v60 = vld [vmem:[%s3483_s10 + $0xf50] sm:$0xff]  ;;  %v904_v62 = vld [vmem:[%s3483_s10 + $0xf18] sm:$0xff] }
 0x10d   : > { %1850 = vmatprep.subr.mxu1 %v720_v26  ;;  %1774 = vmatpush1.msra.mxu0 %v463_v27  ;;  %v647_v63 = vld [vmem:[%s3483_s10 + $0x710] sm:$0xff]  ;;  %v640_v1 = vld [vmem:[%s3483_s10 + $0x6d8] sm:$0xff] }
 0x10e   : > { %1851 = vmatpush1.msra.mxu1 %v719_v28  ;;  %1775 = vmatprep.subr.mxu0 %v456_v29  ;;  %v903_v0 = vld [vmem:[%s3483_s10 + $0xf10] sm:$0xff]  ;;  %v896_v2 = vld [vmem:[%s3483_s10 + $0xed8] sm:$0xff] }
 0x10f   : > { %1852 = vmatprep.subr.mxu1 %v712_v30  ;;  %1776 = vmatpush1.msra.mxu0 %v455_v31  ;;  %v639_v3 = vld [vmem:[%s3483_s10 + $0x6d0] sm:$0xff]  ;;  %v632_v5 = vld [vmem:[%s3483_s10 + $0x698] sm:$0xff] }
 0x110   : > { %1853 = vmatpush1.msra.mxu1 %v711_v32  ;;  %1777 = vmatprep.subr.mxu0 %v448_v33  ;;  %v895_v4 = vld [vmem:[%s3483_s10 + $0xed0] sm:$0xff]  ;;  %v888_v6 = vld [vmem:[%s3483_s10 + $0xe98] sm:$0xff] }
 0x111   : > { %1854 = vmatprep.subr.mxu1 %v704_v34  ;;  %1778 = vmatpush1.msra.mxu0 %v447_v35  ;;  %v631_v7 = vld [vmem:[%s3483_s10 + $0x690] sm:$0xff]  ;;  %v624_v9 = vld [vmem:[%s3483_s10 + $0x658] sm:$0xff] }
 0x112   : > { %1855 = vmatpush1.msra.mxu1 %v703_v36  ;;  %1779 = vmatprep.subr.mxu0 %v440_v37  ;;  %v887_v8 = vld [vmem:[%s3483_s10 + $0xe90] sm:$0xff]  ;;  %v880_v10 = vld [vmem:[%s3483_s10 + $0xe58] sm:$0xff] }
 0x113   : > { %1856 = vmatprep.subr.mxu1 %v696_v38  ;;  %1780 = vmatpush1.msra.mxu0 %v439_v39  ;;  %v623_v11 = vld [vmem:[%s3483_s10 + $0x650] sm:$0xff]  ;;  %v616_v13 = vld [vmem:[%s3483_s10 + $0x618] sm:$0xff] }
 0x114   : > { %1857 = vmatpush1.msra.mxu1 %v695_v40  ;;  %1781 = vmatprep.subr.mxu0 %v432_v41  ;;  %v879_v12 = vld [vmem:[%s3483_s10 + $0xe50] sm:$0xff]  ;;  %v872_v14 = vld [vmem:[%s3483_s10 + $0xe18] sm:$0xff] }
 0x115   : > { %1858 = vmatprep.subr.mxu1 %v688_v42  ;;  %1782 = vmatpush1.msra.mxu0 %v431_v43  ;;  %v615_v15 = vld [vmem:[%s3483_s10 + $0x610] sm:$0xff]  ;;  %v608_v17 = vld [vmem:[%s3483_s10 + $0x5d8] sm:$0xff] }
 0x116   : > { %1859 = vmatpush1.msra.mxu1 %v687_v44  ;;  %1783 = vmatprep.subr.mxu0 %v424_v45  ;;  %v871_v16 = vld [vmem:[%s3483_s10 + $0xe10] sm:$0xff]  ;;  %v864_v18 = vld [vmem:[%s3483_s10 + $0xdd8] sm:$0xff] }
 0x117   : > { %1860 = vmatprep.subr.mxu1 %v680_v46  ;;  %1784 = vmatpush1.msra.mxu0 %v423_v47  ;;  %v607_v19 = vld [vmem:[%s3483_s10 + $0x5d0] sm:$0xff]  ;;  %v600_v21 = vld [vmem:[%s3483_s10 + $0x598] sm:$0xff] }
 0x118   : > { %1861 = vmatpush1.msra.mxu1 %v679_v48  ;;  %1785 = vmatprep.subr.mxu0 %v672_v49  ;;  %v863_v20 = vld [vmem:[%s3483_s10 + $0xdd0] sm:$0xff]  ;;  %v856_v22 = vld [vmem:[%s3483_s10 + $0xd98] sm:$0xff]  ;;  %v3094_v49 = vld [vmem:[%s3481_s5 + $0x8] sm:$0xff] }
 0x119   : > { %1862 = vmatprep.subr.mxu1 %v928_v50  ;;  %1786 = vmatpush2.msra.mxu0 %v671_v51  ;;  %v599_v23 = vld [vmem:[%s3483_s10 + $0x590] sm:$0xff]  ;;  %v592_v25 = vld [vmem:[%s3483_s10 + $0x558] sm:$0xff] }
 0x11a   : > { %1863 = vmatpush2.msra.mxu1 %v927_v52  ;;  %1787 = vmatprep.subr.mxu0 %v664_v53  ;;  %v855_v24 = vld [vmem:[%s3483_s10 + $0xd90] sm:$0xff]  ;;  %v848_v26 = vld [vmem:[%s3483_s10 + $0xd58] sm:$0xff] }
 0x11b   : > { %1864 = vmatprep.subr.mxu1 %v920_v54  ;;  %1788 = vmatpush2.msra.mxu0 %v663_v55  ;;  %v591_v27 = vld [vmem:[%s3483_s10 + $0x550] sm:$0xff]  ;;  %v584_v29 = vld [vmem:[%s3483_s10 + $0x518] sm:$0xff]  ;;  %v3096_v55 = vld [vmem:[%s3481_s5] sm:$0xff] }
 0x11c   : > { %1865 = vmatpush2.msra.mxu1 %v919_v56  ;;  %1789 = vmatprep.subr.mxu0 %v656_v57  ;;  %v847_v28 = vld [vmem:[%s3483_s10 + $0xd50] sm:$0xff]  ;;  %v840_v30 = vld [vmem:[%s3483_s10 + $0xd18] sm:$0xff] }
 0x11d   : > { %1866 = vmatprep.subr.mxu1 %v912_v58  ;;  %1790 = vmatpush2.msra.mxu0 %v655_v59  ;;  %v583_v31 = vld [vmem:[%s3483_s10 + $0x510] sm:$0xff]  ;;  %v576_v33 = vld [vmem:[%s3483_s10 + $0x4d8] sm:$0xff] }
 0x11e   : > { %1867 = vmatpush2.msra.mxu1 %v911_v60  ;;  %1791 = vmatprep.subr.mxu0 %v648_v61  ;;  %v839_v32 = vld [vmem:[%s3483_s10 + $0xd10] sm:$0xff]  ;;  %v832_v34 = vld [vmem:[%s3483_s10 + $0xcd8] sm:$0xff] }
 0x11f   : > { %1868 = vmatprep.subr.mxu1 %v904_v62  ;;  %1792 = vmatpush2.msra.mxu0 %v647_v63  ;;  %v575_v35 = vld [vmem:[%s3483_s10 + $0x4d0] sm:$0xff]  ;;  %v568_v37 = vld [vmem:[%s3483_s10 + $0x498] sm:$0xff] }
 0x120   : > { %1869 = vmatpush2.msra.mxu1 %v903_v0  ;;  %1793 = vmatprep.subr.mxu0 %v640_v1  ;;  %v831_v36 = vld [vmem:[%s3483_s10 + $0xcd0] sm:$0xff]  ;;  %v824_v38 = vld [vmem:[%s3483_s10 + $0xc98] sm:$0xff] }
 0x121   : > { %1870 = vmatprep.subr.mxu1 %v896_v2  ;;  %1794 = vmatpush2.msra.mxu0 %v639_v3  ;;  %v567_v39 = vld [vmem:[%s3483_s10 + $0x490] sm:$0xff]  ;;  %v560_v41 = vld [vmem:[%s3483_s10 + $0x458] sm:$0xff] }
 0x122   : > { %1871 = vmatpush2.msra.mxu1 %v895_v4  ;;  %1795 = vmatprep.subr.mxu0 %v632_v5  ;;  %v823_v40 = vld [vmem:[%s3483_s10 + $0xc90] sm:$0xff]  ;;  %v816_v42 = vld [vmem:[%s3483_s10 + $0xc58] sm:$0xff] }
 0x123   : > { %1872 = vmatprep.subr.mxu1 %v888_v6  ;;  %1796 = vmatpush2.msra.mxu0 %v631_v7  ;;  %v559_v43 = vld [vmem:[%s3483_s10 + $0x450] sm:$0xff]  ;;  %v552_v45 = vld [vmem:[%s3483_s10 + $0x418] sm:$0xff] }
 0x124   : > { %1873 = vmatpush2.msra.mxu1 %v887_v8  ;;  %1797 = vmatprep.subr.mxu0 %v624_v9  ;;  %v815_v44 = vld [vmem:[%s3483_s10 + $0xc50] sm:$0xff]  ;;  %v808_v46 = vld [vmem:[%s3483_s10 + $0xc18] sm:$0xff] }
 0x125   : > { %1874 = vmatprep.subr.mxu1 %v880_v10  ;;  %1798 = vmatpush2.msra.mxu0 %v623_v11  ;;  %v551_v47 = vld [vmem:[%s3483_s10 + $0x410] sm:$0xff]  ;;  %v1056_v50 = vld [vmem:[%s3483_s10 + $0x13d8] sm:$0xff] }
 0x126   : > { %1875 = vmatpush2.msra.mxu1 %v879_v12  ;;  %1799 = vmatprep.subr.mxu0 %v616_v13  ;;  %v807_v48 = vld [vmem:[%s3483_s10 + $0xc10] sm:$0xff]  ;;  %v1312_v51 = vld [vmem:[%s3483_s10 + $0x1bd8] sm:$0xff] }
 0x127   : > { %1876 = vmatprep.subr.mxu1 %v872_v14  ;;  %1800 = vmatpush2.msra.mxu0 %v615_v15  ;;  %v3095_v52 = vld [vmem:[%s3481_s5 + $0x18] sm:$0xff]  ;;  %v1055_v53 = vld [vmem:[%s3483_s10 + $0x13d0] sm:$0xff] }
 0x128   : > { %1877 = vmatpush2.msra.mxu1 %v871_v16  ;;  %1801 = vmatprep.subr.mxu0 %v608_v17  ;;  %v1311_v54 = vld [vmem:[%s3483_s10 + $0x1bd0] sm:$0xff]  ;;  %v1048_v57 = vld [vmem:[%s3483_s10 + $0x1398] sm:$0xff] }
 0x129   : > { %1878 = vmatprep.subr.mxu1 %v864_v18  ;;  %1802 = vmatpush2.msra.mxu0 %v607_v19  ;;  %v3097_v56 = vld [vmem:[%s3481_s5 + $0x10] sm:$0xff]  ;;  %v1304_v58 = vld [vmem:[%s3483_s10 + $0x1b98] sm:$0xff] }
 0x12a   : > { %1879 = vmatpush2.msra.mxu1 %v863_v20  ;;  %1803 = vmatprep.subr.mxu0 %v600_v21  ;;  %v1047_v59 = vld [vmem:[%s3483_s10 + $0x1390] sm:$0xff]  ;;  %v1040_v61 = vld [vmem:[%s3483_s10 + $0x1358] sm:$0xff] }
 0x12b   : > { %1880 = vmatprep.subr.mxu1 %v856_v22  ;;  %1804 = vmatpush2.msra.mxu0 %v599_v23  ;;  %v1303_v60 = vld [vmem:[%s3483_s10 + $0x1b90] sm:$0xff]  ;;  %v1296_v62 = vld [vmem:[%s3483_s10 + $0x1b58] sm:$0xff] }
 0x12c   : > { %1881 = vmatpush2.msra.mxu1 %v855_v24  ;;  %1805 = vmatprep.subr.mxu0 %v592_v25  ;;  %v1039_v63 = vld [vmem:[%s3483_s10 + $0x1350] sm:$0xff]  ;;  %v1032_v1 = vld [vmem:[%s3483_s10 + $0x1318] sm:$0xff] }
 0x12d   : > { %1882 = vmatprep.subr.mxu1 %v848_v26  ;;  %1806 = vmatpush2.msra.mxu0 %v591_v27  ;;  %v1295_v0 = vld [vmem:[%s3483_s10 + $0x1b50] sm:$0xff]  ;;  %v1288_v2 = vld [vmem:[%s3483_s10 + $0x1b18] sm:$0xff] }
 0x12e   : > { %1883 = vmatpush2.msra.mxu1 %v847_v28  ;;  %1807 = vmatprep.subr.mxu0 %v584_v29  ;;  %v1031_v3 = vld [vmem:[%s3483_s10 + $0x1310] sm:$0xff]  ;;  %v1024_v5 = vld [vmem:[%s3483_s10 + $0x12d8] sm:$0xff] }
 0x12f   : > { %1884 = vmatprep.subr.mxu1 %v840_v30  ;;  %1808 = vmatpush2.msra.mxu0 %v583_v31  ;;  %v1287_v4 = vld [vmem:[%s3483_s10 + $0x1b10] sm:$0xff]  ;;  %v1280_v6 = vld [vmem:[%s3483_s10 + $0x1ad8] sm:$0xff] }
 0x130   : > { %1885 = vmatpush2.msra.mxu1 %v839_v32  ;;  %1809 = vmatprep.subr.mxu0 %v576_v33  ;;  %v1023_v7 = vld [vmem:[%s3483_s10 + $0x12d0] sm:$0xff]  ;;  %v1016_v9 = vld [vmem:[%s3483_s10 + $0x1298] sm:$0xff] }
 0x131   : > { %1886 = vmatprep.subr.mxu1 %v832_v34  ;;  %1810 = vmatpush2.msra.mxu0 %v575_v35  ;;  %v1279_v8 = vld [vmem:[%s3483_s10 + $0x1ad0] sm:$0xff]  ;;  %v1272_v10 = vld [vmem:[%s3483_s10 + $0x1a98] sm:$0xff] }
 0x132   : > { %1887 = vmatpush2.msra.mxu1 %v831_v36  ;;  %1811 = vmatprep.subr.mxu0 %v568_v37  ;;  %v1015_v11 = vld [vmem:[%s3483_s10 + $0x1290] sm:$0xff]  ;;  %v1008_v13 = vld [vmem:[%s3483_s10 + $0x1258] sm:$0xff] }
 0x133   : > { %1888 = vmatprep.subr.mxu1 %v824_v38  ;;  %1812 = vmatpush2.msra.mxu0 %v567_v39  ;;  %v1271_v12 = vld [vmem:[%s3483_s10 + $0x1a90] sm:$0xff]  ;;  %v1264_v14 = vld [vmem:[%s3483_s10 + $0x1a58] sm:$0xff] }
 0x134   : > { %1889 = vmatpush2.msra.mxu1 %v823_v40  ;;  %1813 = vmatprep.subr.mxu0 %v560_v41  ;;  %v1007_v15 = vld [vmem:[%s3483_s10 + $0x1250] sm:$0xff]  ;;  %v1000_v17 = vld [vmem:[%s3483_s10 + $0x1218] sm:$0xff] }
 0x135   : > { %1890 = vmatprep.subr.mxu1 %v816_v42  ;;  %1814 = vmatpush2.msra.mxu0 %v559_v43  ;;  %v1263_v16 = vld [vmem:[%s3483_s10 + $0x1a50] sm:$0xff]  ;;  %v1256_v18 = vld [vmem:[%s3483_s10 + $0x1a18] sm:$0xff] }
 0x136   : > { %1891 = vmatpush2.msra.mxu1 %v815_v44  ;;  %1815 = vmatprep.subr.mxu0 %v552_v45  ;;  %v999_v19 = vld [vmem:[%s3483_s10 + $0x1210] sm:$0xff]  ;;  %v992_v21 = vld [vmem:[%s3483_s10 + $0x11d8] sm:$0xff] }
 0x137   : > { %1892 = vmatprep.subr.mxu1 %v808_v46  ;;  %1816 = vmatpush2.msra.mxu0 %v551_v47  ;;  %v1255_v20 = vld [vmem:[%s3483_s10 + $0x1a10] sm:$0xff]  ;;  %v1248_v22 = vld [vmem:[%s3483_s10 + $0x19d8] sm:$0xff] }
 0x138   : > { %1817 = vmatprep.mubr.f32.mxu0 %v3094_v49  ;;  %1893 = vmatpush2.msra.mxu1 %v807_v48  ;;  %v991_v23 = vld [vmem:[%s3483_s10 + $0x11d0] sm:$0xff]  ;;  %v984_v25 = vld [vmem:[%s3483_s10 + $0x1198] sm:$0xff] }
 0x139   : > { %1894 = vmatprep.mubr.f32.mxu1 %v3095_v52  ;;  %1818 = vmatmul.mubr.f32.vlgmr.msra.gmra.mxu0 %v3096_v55  ;;  %v1247_v24 = vld [vmem:[%s3483_s10 + $0x19d0] sm:$0xff]  ;;  %v1240_v26 = vld [vmem:[%s3483_s10 + $0x1998] sm:$0xff] }
 0x13a   : > { %1895 = vmatmul.mubr.f32.vlgmr.msra.gmra.mxu1 %v3097_v56  ;;  %1907 = vmatprep.subr.mxu0 %v1056_v50  ;;  %v983_v27 = vld [vmem:[%s3483_s10 + $0x1190] sm:$0xff]  ;;  %v976_v29 = vld [vmem:[%s3483_s10 + $0x1158] sm:$0xff] }
 0x13b   : > { %1984 = vmatprep.subr.mxu1 %v1312_v51  ;;  %1908 = vmatpush1.msra.mxu0 %v1055_v53  ;;  %v1239_v28 = vld [vmem:[%s3483_s10 + $0x1990] sm:$0xff]  ;;  %v1232_v30 = vld [vmem:[%s3483_s10 + $0x1958] sm:$0xff] }
 0x13c   : > { %1985 = vmatpush1.msra.mxu1 %v1311_v54  ;;  %1909 = vmatprep.subr.mxu0 %v1048_v57  ;;  %v975_v31 = vld [vmem:[%s3483_s10 + $0x1150] sm:$0xff]  ;;  %v968_v33 = vld [vmem:[%s3483_s10 + $0x1118] sm:$0xff] }
 0x13d   : > { %1986 = vmatprep.subr.mxu1 %v1304_v58  ;;  %1910 = vmatpush1.msra.mxu0 %v1047_v59  ;;  %v1231_v32 = vld [vmem:[%s3483_s10 + $0x1950] sm:$0xff]  ;;  %v1224_v34 = vld [vmem:[%s3483_s10 + $0x1918] sm:$0xff] }
 0x13e   : > { %1987 = vmatpush1.msra.mxu1 %v1303_v60  ;;  %1911 = vmatprep.subr.mxu0 %v1040_v61  ;;  %v967_v35 = vld [vmem:[%s3483_s10 + $0x1110] sm:$0xff]  ;;  %v960_v37 = vld [vmem:[%s3483_s10 + $0x10d8] sm:$0xff] }
 0x13f   : > { %1988 = vmatprep.subr.mxu1 %v1296_v62  ;;  %1912 = vmatpush1.msra.mxu0 %v1039_v63  ;;  %v1223_v36 = vld [vmem:[%s3483_s10 + $0x1910] sm:$0xff]  ;;  %v1216_v38 = vld [vmem:[%s3483_s10 + $0x18d8] sm:$0xff] }
 0x140   : > { %1989 = vmatpush1.msra.mxu1 %v1295_v0  ;;  %1913 = vmatprep.subr.mxu0 %v1032_v1  ;;  %v959_v39 = vld [vmem:[%s3483_s10 + $0x10d0] sm:$0xff]  ;;  %v952_v41 = vld [vmem:[%s3483_s10 + $0x1098] sm:$0xff] }
 0x141   : > { %1990 = vmatprep.subr.mxu1 %v1288_v2  ;;  %1914 = vmatpush1.msra.mxu0 %v1031_v3  ;;  %v1215_v40 = vld [vmem:[%s3483_s10 + $0x18d0] sm:$0xff]  ;;  %v1208_v42 = vld [vmem:[%s3483_s10 + $0x1898] sm:$0xff] }
 0x142   : > { %1991 = vmatpush1.msra.mxu1 %v1287_v4  ;;  %1915 = vmatprep.subr.mxu0 %v1024_v5  ;;  %v951_v43 = vld [vmem:[%s3483_s10 + $0x1090] sm:$0xff]  ;;  %v944_v45 = vld [vmem:[%s3483_s10 + $0x1058] sm:$0xff] }
 0x143   : > { %1992 = vmatprep.subr.mxu1 %v1280_v6  ;;  %1916 = vmatpush1.msra.mxu0 %v1023_v7  ;;  %v1207_v44 = vld [vmem:[%s3483_s10 + $0x1890] sm:$0xff]  ;;  %v1200_v46 = vld [vmem:[%s3483_s10 + $0x1858] sm:$0xff] }
 0x144   : > { %1993 = vmatpush1.msra.mxu1 %v1279_v8  ;;  %1917 = vmatprep.subr.mxu0 %v1016_v9  ;;  %v943_v47 = vld [vmem:[%s3483_s10 + $0x1050] sm:$0xff]  ;;  %v936_v49 = vld [vmem:[%s3483_s10 + $0x1018] sm:$0xff] }
 0x145   : > { %1994 = vmatprep.subr.mxu1 %v1272_v10  ;;  %1918 = vmatpush1.msra.mxu0 %v1015_v11  ;;  %v1199_v48 = vld [vmem:[%s3483_s10 + $0x1850] sm:$0xff]  ;;  %v1192_v50 = vld [vmem:[%s3483_s10 + $0x1818] sm:$0xff] }
 0x146   : > { %1995 = vmatpush1.msra.mxu1 %v1271_v12  ;;  %1919 = vmatprep.subr.mxu0 %v1008_v13  ;;  %v935_v51 = vld [vmem:[%s3483_s10 + $0x1010] sm:$0xff]  ;;  %v1184_v53 = vld [vmem:[%s3483_s10 + $0x17d8] sm:$0xff] }
 0x147   : > { %1996 = vmatprep.subr.mxu1 %v1264_v14  ;;  %1920 = vmatpush1.msra.mxu0 %v1007_v15  ;;  %v1191_v52 = vld [vmem:[%s3483_s10 + $0x1810] sm:$0xff]  ;;  %v1440_v54 = vld [vmem:[%s3483_s10 + $0x1fd8] sm:$0xff] }
 0x148   : > { %1997 = vmatpush1.msra.mxu1 %v1263_v16  ;;  %1921 = vmatprep.subr.mxu0 %v1000_v17  ;;  %v1183_v55 = vld [vmem:[%s3483_s10 + $0x17d0] sm:$0xff]  ;;  %v1176_v57 = vld [vmem:[%s3483_s10 + $0x1798] sm:$0xff] }
 0x149   : > { %1998 = vmatprep.subr.mxu1 %v1256_v18  ;;  %1922 = vmatpush1.msra.mxu0 %v999_v19  ;;  %v1439_v56 = vld [vmem:[%s3483_s10 + $0x1fd0] sm:$0xff]  ;;  %v1432_v58 = vld [vmem:[%s3483_s10 + $0x1f98] sm:$0xff] }
 0x14a   : > { %1999 = vmatpush1.msra.mxu1 %v1255_v20  ;;  %1923 = vmatprep.subr.mxu0 %v992_v21  ;;  %v1175_v59 = vld [vmem:[%s3483_s10 + $0x1790] sm:$0xff]  ;;  %v1168_v61 = vld [vmem:[%s3483_s10 + $0x1758] sm:$0xff] }
 0x14b   : > { %2000 = vmatprep.subr.mxu1 %v1248_v22  ;;  %1924 = vmatpush1.msra.mxu0 %v991_v23  ;;  %v1431_v60 = vld [vmem:[%s3483_s10 + $0x1f90] sm:$0xff]  ;;  %v1424_v62 = vld [vmem:[%s3483_s10 + $0x1f58] sm:$0xff] }
 0x14c   : > { %2001 = vmatpush1.msra.mxu1 %v1247_v24  ;;  %1925 = vmatprep.subr.mxu0 %v984_v25  ;;  %v1167_v63 = vld [vmem:[%s3483_s10 + $0x1750] sm:$0xff]  ;;  %v1160_v1 = vld [vmem:[%s3483_s10 + $0x1718] sm:$0xff] }
 0x14d   : > { %2002 = vmatprep.subr.mxu1 %v1240_v26  ;;  %1926 = vmatpush1.msra.mxu0 %v983_v27  ;;  %v1423_v0 = vld [vmem:[%s3483_s10 + $0x1f50] sm:$0xff]  ;;  %v1416_v2 = vld [vmem:[%s3483_s10 + $0x1f18] sm:$0xff] }
 0x14e   : > { %2003 = vmatpush1.msra.mxu1 %v1239_v28  ;;  %1927 = vmatprep.subr.mxu0 %v976_v29  ;;  %v1159_v3 = vld [vmem:[%s3483_s10 + $0x1710] sm:$0xff]  ;;  %v1152_v5 = vld [vmem:[%s3483_s10 + $0x16d8] sm:$0xff] }
 0x14f   : > { %2004 = vmatprep.subr.mxu1 %v1232_v30  ;;  %1928 = vmatpush1.msra.mxu0 %v975_v31  ;;  %v1415_v4 = vld [vmem:[%s3483_s10 + $0x1f10] sm:$0xff]  ;;  %v1408_v6 = vld [vmem:[%s3483_s10 + $0x1ed8] sm:$0xff] }
 0x150   : > { %2005 = vmatpush1.msra.mxu1 %v1231_v32  ;;  %1929 = vmatprep.subr.mxu0 %v968_v33  ;;  %v1151_v7 = vld [vmem:[%s3483_s10 + $0x16d0] sm:$0xff]  ;;  %v1144_v9 = vld [vmem:[%s3483_s10 + $0x1698] sm:$0xff] }
 0x151   : > { %2006 = vmatprep.subr.mxu1 %v1224_v34  ;;  %1930 = vmatpush1.msra.mxu0 %v967_v35  ;;  %v1407_v8 = vld [vmem:[%s3483_s10 + $0x1ed0] sm:$0xff]  ;;  %v1400_v10 = vld [vmem:[%s3483_s10 + $0x1e98] sm:$0xff] }
 0x152   : > { %2007 = vmatpush1.msra.mxu1 %v1223_v36  ;;  %1931 = vmatprep.subr.mxu0 %v960_v37  ;;  %v1143_v11 = vld [vmem:[%s3483_s10 + $0x1690] sm:$0xff]  ;;  %v1136_v13 = vld [vmem:[%s3483_s10 + $0x1658] sm:$0xff] }
 0x153   : > { %2008 = vmatprep.subr.mxu1 %v1216_v38  ;;  %1932 = vmatpush1.msra.mxu0 %v959_v39  ;;  %v1399_v12 = vld [vmem:[%s3483_s10 + $0x1e90] sm:$0xff]  ;;  %v1392_v14 = vld [vmem:[%s3483_s10 + $0x1e58] sm:$0xff] }
 0x154   : > { %2009 = vmatpush1.msra.mxu1 %v1215_v40  ;;  %1933 = vmatprep.subr.mxu0 %v952_v41  ;;  %v1135_v15 = vld [vmem:[%s3483_s10 + $0x1650] sm:$0xff]  ;;  %v1128_v17 = vld [vmem:[%s3483_s10 + $0x1618] sm:$0xff] }
 0x155   : > { %2010 = vmatprep.subr.mxu1 %v1208_v42  ;;  %1934 = vmatpush1.msra.mxu0 %v951_v43  ;;  %v1391_v16 = vld [vmem:[%s3483_s10 + $0x1e50] sm:$0xff]  ;;  %v1384_v18 = vld [vmem:[%s3483_s10 + $0x1e18] sm:$0xff]  ;;  %v3098_v43 = vld [vmem:[%s3481_s5 + $0x48] sm:$0xff] }
 0x156   : > { %2011 = vmatpush1.msra.mxu1 %v1207_v44  ;;  %1935 = vmatprep.subr.mxu0 %v944_v45  ;;  %v1127_v19 = vld [vmem:[%s3483_s10 + $0x1610] sm:$0xff]  ;;  %v1120_v21 = vld [vmem:[%s3483_s10 + $0x15d8] sm:$0xff] }
 0x157   : > { %2012 = vmatprep.subr.mxu1 %v1200_v46  ;;  %1936 = vmatpush1.msra.mxu0 %v943_v47  ;;  %v1383_v20 = vld [vmem:[%s3483_s10 + $0x1e10] sm:$0xff]  ;;  %v1376_v22 = vld [vmem:[%s3483_s10 + $0x1dd8] sm:$0xff] }
 0x158   : > { %2013 = vmatpush1.msra.mxu1 %v1199_v48  ;;  %1937 = vmatprep.subr.mxu0 %v936_v49  ;;  %v1119_v23 = vld [vmem:[%s3483_s10 + $0x15d0] sm:$0xff]  ;;  %v1112_v25 = vld [vmem:[%s3483_s10 + $0x1598] sm:$0xff]  ;;  %v3100_v49 = vld [vmem:[%s3481_s5 + $0x40] sm:$0xff] }
 0x159   : > { %2014 = vmatprep.subr.mxu1 %v1192_v50  ;;  %1938 = vmatpush1.msra.mxu0 %v935_v51  ;;  %v1375_v24 = vld [vmem:[%s3483_s10 + $0x1dd0] sm:$0xff]  ;;  %v1368_v26 = vld [vmem:[%s3483_s10 + $0x1d98] sm:$0xff] }
 0x15a   : > { %2015 = vmatpush1.msra.mxu1 %v1191_v52  ;;  %1939 = vmatprep.subr.mxu0 %v1184_v53  ;;  %v1111_v27 = vld [vmem:[%s3483_s10 + $0x1590] sm:$0xff]  ;;  %v1104_v29 = vld [vmem:[%s3483_s10 + $0x1558] sm:$0xff] }
 0x15b   : > { %2016 = vmatprep.subr.mxu1 %v1440_v54  ;;  %1940 = vmatpush2.msra.mxu0 %v1183_v55  ;;  %v1367_v28 = vld [vmem:[%s3483_s10 + $0x1d90] sm:$0xff]  ;;  %v1360_v30 = vld [vmem:[%s3483_s10 + $0x1d58] sm:$0xff] }
 0x15c   : > { %2017 = vmatpush2.msra.mxu1 %v1439_v56  ;;  %1941 = vmatprep.subr.mxu0 %v1176_v57  ;;  %v1103_v31 = vld [vmem:[%s3483_s10 + $0x1550] sm:$0xff]  ;;  %v1096_v33 = vld [vmem:[%s3483_s10 + $0x1518] sm:$0xff]  ;;  %v546_v57 = vld [vmem:[%s3483_s10 + $0x3e8] sm:$0xff] }
 0x15d   : > { %2018 = vmatprep.subr.mxu1 %v1432_v58  ;;  %1942 = vmatpush2.msra.mxu0 %v1175_v59  ;;  %v1359_v32 = vld [vmem:[%s3483_s10 + $0x1d50] sm:$0xff]  ;;  %v1352_v34 = vld [vmem:[%s3483_s10 + $0x1d18] sm:$0xff]  ;;  %v3102_v58 = vld [vmem:[%s3481_s5 + $0x28] sm:$0xff] }
 0x15e   : > { %2019 = vmatpush2.msra.mxu1 %v1431_v60  ;;  %1943 = vmatprep.subr.mxu0 %v1168_v61  ;;  %v1095_v35 = vld [vmem:[%s3483_s10 + $0x1510] sm:$0xff]  ;;  %v1088_v37 = vld [vmem:[%s3483_s10 + $0x14d8] sm:$0xff]  ;;  %v802_v59 = vld [vmem:[%s3483_s10 + $0xbe8] sm:$0xff] }
 0x15f   : > { %2020 = vmatprep.subr.mxu1 %v1424_v62  ;;  %1944 = vmatpush2.msra.mxu0 %v1167_v63  ;;  %v1351_v36 = vld [vmem:[%s3483_s10 + $0x1d10] sm:$0xff]  ;;  %v1344_v38 = vld [vmem:[%s3483_s10 + $0x1cd8] sm:$0xff]  ;;  %v3103_v60 = vld [vmem:[%s3481_s5 + $0x20] sm:$0xff] }
 0x160   : > { %2021 = vmatpush2.msra.mxu1 %v1423_v0  ;;  %1945 = vmatprep.subr.mxu0 %v1160_v1  ;;  %v1087_v39 = vld [vmem:[%s3483_s10 + $0x14d0] sm:$0xff]  ;;  %v1080_v41 = vld [vmem:[%s3483_s10 + $0x1498] sm:$0xff]  ;;  %v545_v61 = vld [vmem:[%s3483_s10 + $0x3e0] sm:$0xff] }
 0x161   : > { %2022 = vmatprep.subr.mxu1 %v1416_v2  ;;  %1946 = vmatpush2.msra.mxu0 %v1159_v3  ;;  %v1343_v40 = vld [vmem:[%s3483_s10 + $0x1cd0] sm:$0xff]  ;;  %v1336_v42 = vld [vmem:[%s3483_s10 + $0x1c98] sm:$0xff]  ;;  %v801_v62 = vld [vmem:[%s3483_s10 + $0xbe0] sm:$0xff] }
 0x162   : > { %2023 = vmatpush2.msra.mxu1 %v1415_v4  ;;  %1947 = vmatprep.subr.mxu0 %v1152_v5  ;;  %v3099_v44 = vld [vmem:[%s3481_s5 + $0x58] sm:$0xff]  ;;  %v1079_v45 = vld [vmem:[%s3483_s10 + $0x1490] sm:$0xff]  ;;  %v538_v0 = vld [vmem:[%s3483_s10 + $0x3a8] sm:$0xff] }
 0x163   : > { %2024 = vmatprep.subr.mxu1 %v1408_v6  ;;  %1948 = vmatpush2.msra.mxu0 %v1151_v7  ;;  %v1335_v46 = vld [vmem:[%s3483_s10 + $0x1c90] sm:$0xff]  ;;  %v1072_v47 = vld [vmem:[%s3483_s10 + $0x1458] sm:$0xff]  ;;  %v794_v1 = vld [vmem:[%s3483_s10 + $0xba8] sm:$0xff] }
 0x164   : > { %2025 = vmatpush2.msra.mxu1 %v1407_v8  ;;  %1949 = vmatprep.subr.mxu0 %v1144_v9  ;;  %v1328_v48 = vld [vmem:[%s3483_s10 + $0x1c58] sm:$0xff]  ;;  %v3101_v50 = vld [vmem:[%s3481_s5 + $0x50] sm:$0xff]  ;;  %v537_v3 = vld [vmem:[%s3483_s10 + $0x3a0] sm:$0xff] }
 0x165   : > { %2026 = vmatprep.subr.mxu1 %v1400_v10  ;;  %1950 = vmatpush2.msra.mxu0 %v1143_v11  ;;  %v1071_v51 = vld [vmem:[%s3483_s10 + $0x1450] sm:$0xff]  ;;  %v1064_v53 = vld [vmem:[%s3483_s10 + $0x1418] sm:$0xff]  ;;  %v793_v4 = vld [vmem:[%s3483_s10 + $0xba0] sm:$0xff] }
 0x166   : > { %2027 = vmatpush2.msra.mxu1 %v1399_v12  ;;  %1951 = vmatprep.subr.mxu0 %v1136_v13  ;;  %v1327_v52 = vld [vmem:[%s3483_s10 + $0x1c50] sm:$0xff]  ;;  %v1320_v54 = vld [vmem:[%s3483_s10 + $0x1c18] sm:$0xff]  ;;  %v530_v5 = vld [vmem:[%s3483_s10 + $0x368] sm:$0xff] }
 0x167   : > { %2028 = vmatprep.subr.mxu1 %v1392_v14  ;;  %1952 = vmatpush2.msra.mxu0 %v1135_v15  ;;  %v1063_v55 = vld [vmem:[%s3483_s10 + $0x1410] sm:$0xff]  ;;  %v3104_v63 = vld [vmem:[%s3481_s5 + $0x38] sm:$0xff]  ;;  %v786_v6 = vld [vmem:[%s3483_s10 + $0xb68] sm:$0xff] }
 0x168   : > { %2029 = vmatpush2.msra.mxu1 %v1391_v16  ;;  %1953 = vmatprep.subr.mxu0 %v1128_v17  ;;  %v1319_v56 = vld [vmem:[%s3483_s10 + $0x1c10] sm:$0xff]  ;;  %v3106_v7 = vld [vmem:[%s3481_s5 + $0x68] sm:$0xff]  ;;  %v529_v8 = vld [vmem:[%s3483_s10 + $0x360] sm:$0xff] }
 0x169   : > { %2030 = vmatprep.subr.mxu1 %v1384_v18  ;;  %1954 = vmatpush2.msra.mxu0 %v1127_v19  ;;  %v3105_v2 = vld [vmem:[%s3481_s5 + $0x30] sm:$0xff]  ;;  %v3107_v9 = vld [vmem:[%s3481_s5 + $0x60] sm:$0xff]  ;;  %v522_v11 = vld [vmem:[%s3483_s10 + $0x328] sm:$0xff] }
 0x16a   : > { %2031 = vmatpush2.msra.mxu1 %v1383_v20  ;;  %1955 = vmatprep.subr.mxu0 %v1120_v21  ;;  %v785_v10 = vld [vmem:[%s3483_s10 + $0xb60] sm:$0xff]  ;;  %v778_v12 = vld [vmem:[%s3483_s10 + $0xb28] sm:$0xff]  ;;  %v3108_v13 = vld [vmem:[%s3481_s5 + $0x78] sm:$0xff] }
 0x16b   : > { %2032 = vmatprep.subr.mxu1 %v1376_v22  ;;  %1956 = vmatpush2.msra.mxu0 %v1119_v23  ;;  %v521_v14 = vld [vmem:[%s3483_s10 + $0x320] sm:$0xff]  ;;  %v514_v16 = vld [vmem:[%s3483_s10 + $0x2e8] sm:$0xff]  ;;  %v3109_v18 = vld [vmem:[%s3481_s5 + $0x70] sm:$0xff] }
 0x16c   : > { %2033 = vmatpush2.msra.mxu1 %v1375_v24  ;;  %1957 = vmatprep.subr.mxu0 %v1112_v25  ;;  %v777_v15 = vld [vmem:[%s3483_s10 + $0xb20] sm:$0xff]  ;;  %v770_v17 = vld [vmem:[%s3483_s10 + $0xae8] sm:$0xff] }
 0x16d   : > { %2034 = vmatprep.subr.mxu1 %v1368_v26  ;;  %1958 = vmatpush2.msra.mxu0 %v1111_v27  ;;  %v513_v19 = vld [vmem:[%s3483_s10 + $0x2e0] sm:$0xff]  ;;  %v506_v21 = vld [vmem:[%s3483_s10 + $0x2a8] sm:$0xff] }
 0x16e   : > { %2035 = vmatpush2.msra.mxu1 %v1367_v28  ;;  %1959 = vmatprep.subr.mxu0 %v1104_v29  ;;  %v769_v20 = vld [vmem:[%s3483_s10 + $0xae0] sm:$0xff]  ;;  %v762_v22 = vld [vmem:[%s3483_s10 + $0xaa8] sm:$0xff] }
 0x16f   : > { %2036 = vmatprep.subr.mxu1 %v1360_v30  ;;  %1960 = vmatpush2.msra.mxu0 %v1103_v31  ;;  %v505_v23 = vld [vmem:[%s3483_s10 + $0x2a0] sm:$0xff]  ;;  %v498_v25 = vld [vmem:[%s3483_s10 + $0x268] sm:$0xff] }
 0x170   : > { %2037 = vmatpush2.msra.mxu1 %v1359_v32  ;;  %1961 = vmatprep.subr.mxu0 %v1096_v33  ;;  %v761_v24 = vld [vmem:[%s3483_s10 + $0xaa0] sm:$0xff]  ;;  %v754_v26 = vld [vmem:[%s3483_s10 + $0xa68] sm:$0xff] }
 0x171   : > { %2038 = vmatprep.subr.mxu1 %v1352_v34  ;;  %1962 = vmatpush2.msra.mxu0 %v1095_v35  ;;  %v497_v27 = vld [vmem:[%s3483_s10 + $0x260] sm:$0xff]  ;;  %v490_v29 = vld [vmem:[%s3483_s10 + $0x228] sm:$0xff] }
 0x172   : > { %2039 = vmatpush2.msra.mxu1 %v1351_v36  ;;  %1963 = vmatprep.subr.mxu0 %v1088_v37  ;;  %v753_v28 = vld [vmem:[%s3483_s10 + $0xa60] sm:$0xff]  ;;  %v746_v30 = vld [vmem:[%s3483_s10 + $0xa28] sm:$0xff] }
 0x173   : > { %2040 = vmatprep.subr.mxu1 %v1344_v38  ;;  %1964 = vmatpush2.msra.mxu0 %v1087_v39  ;;  %v489_v31 = vld [vmem:[%s3483_s10 + $0x220] sm:$0xff]  ;;  %v482_v33 = vld [vmem:[%s3483_s10 + $0x1e8] sm:$0xff] }
 0x174   : > { %2041 = vmatpush2.msra.mxu1 %v1343_v40  ;;  %1823 = vmatprep.mubr.f32.mxu0 %v3098_v43  ;;  %v745_v32 = vld [vmem:[%s3483_s10 + $0xa20] sm:$0xff]  ;;  %v738_v34 = vld [vmem:[%s3483_s10 + $0x9e8] sm:$0xff] }
 0x175   : > { %1900 = vmatprep.mubr.f32.mxu1 %v3099_v44  ;;  %1965 = vmatprep.subr.mxu0 %v1080_v41  ;;  %v481_v35 = vld [vmem:[%s3483_s10 + $0x1e0] sm:$0xff]  ;;  %v474_v37 = vld [vmem:[%s3483_s10 + $0x1a8] sm:$0xff] }
 0x176   : > { %2042 = vmatprep.subr.mxu1 %v1336_v42  ;;  %1824 = vmatmul.mubr.f32.gmra.mxu0 %v3100_v49  ;;  %v737_v36 = vld [vmem:[%s3483_s10 + $0x9e0] sm:$0xff]  ;;  %v730_v38 = vld [vmem:[%s3483_s10 + $0x9a8] sm:$0xff] }
 0x177   : > { %1901 = vmatmul.mubr.f32.gmra.mxu1 %v3101_v50  ;;  %1966 = vmatpush2.msra.mxu0 %v1079_v45  ;;  %v473_v39 = vld [vmem:[%s3483_s10 + $0x1a0] sm:$0xff]  ;;  %v466_v41 = vld [vmem:[%s3483_s10 + $0x168] sm:$0xff] }
 0x178   : > { %2043 = vmatpush2.msra.mxu1 %v1335_v46  ;;  %1967 = vmatprep.subr.mxu0 %v1072_v47  ;;  %v729_v40 = vld [vmem:[%s3483_s10 + $0x9a0] sm:$0xff]  ;;  %v722_v42 = vld [vmem:[%s3483_s10 + $0x968] sm:$0xff] }
 0x179   : > { %2044 = vmatprep.subr.mxu1 %v1328_v48  ;;  %1968 = vmatpush2.msra.mxu0 %v1071_v51  ;;  %v465_v43 = vld [vmem:[%s3483_s10 + $0x160] sm:$0xff]  ;;  %v458_v45 = vld [vmem:[%s3483_s10 + $0x128] sm:$0xff] }
 0x17a   : > { %2045 = vmatpush2.msra.mxu1 %v1327_v52  ;;  %1969 = vmatprep.subr.mxu0 %v1064_v53  ;;  %v721_v44 = vld [vmem:[%s3483_s10 + $0x960] sm:$0xff]  ;;  %v714_v46 = vld [vmem:[%s3483_s10 + $0x928] sm:$0xff] }
 0x17b   : > { %2046 = vmatprep.subr.mxu1 %v1320_v54  ;;  %1970 = vmatpush2.msra.mxu0 %v1063_v55  ;;  %v457_v47 = vld [vmem:[%s3483_s10 + $0x120] sm:$0xff]  ;;  %v450_v49 = vld [vmem:[%s3483_s10 + $0xe8] sm:$0xff] }
 0x17c   : > { %1971 = vmatprep.mubr.f32.mxu0 %v3102_v58  ;;  %2047 = vmatpush2.msra.mxu1 %v1319_v56  ;;  %v713_v48 = vld [vmem:[%s3483_s10 + $0x920] sm:$0xff]  ;;  %v706_v50 = vld [vmem:[%s3483_s10 + $0x8e8] sm:$0xff] }
 0x17d   : > { %1972 = vmatmul.mubr.f32.vlgmr.msra.gmra.mxu0 %v3103_v60  ;;  %2048 = vmatprep.mubr.f32.mxu1 %v3104_v63  ;;  %v449_v51 = vld [vmem:[%s3483_s10 + $0xe0] sm:$0xff]  ;;  %v442_v53 = vld [vmem:[%s3483_s10 + $0xa8] sm:$0xff] }
 0x17e   : > { %2061 = vmatprep.subr.mxu0 %v546_v57  ;;  %2138 = vmatprep.subr.mxu1 %v802_v59  ;;  %v705_v52 = vld [vmem:[%s3483_s10 + $0x8e0] sm:$0xff]  ;;  %v698_v54 = vld [vmem:[%s3483_s10 + $0x8a8] sm:$0xff] }
 0x17f   : > { %2049 = vmatmul.mubr.f32.vlgmr.msra.gmra.mxu1 %v3105_v2  ;;  %2062 = vmatpush1.msra.mxu0 %v545_v61  ;;  %v441_v55 = vld [vmem:[%s3483_s10 + $0xa0] sm:$0xff]  ;;  %v434_v57 = vld [vmem:[%s3483_s10 + $0x68] sm:$0xff] }
 0x180   : > { %2139 = vmatpush1.msra.mxu1 %v801_v62  ;;  %2063 = vmatprep.subr.mxu0 %v538_v0  ;;  %v697_v56 = vld [vmem:[%s3483_s10 + $0x8a0] sm:$0xff]  ;;  %v690_v58 = vld [vmem:[%s3483_s10 + $0x868] sm:$0xff] }
 0x181   : > { %2140 = vmatprep.subr.mxu1 %v794_v1  ;;  %1977 = vmatprep.mubr.f32.mxu0 %v3106_v7  ;;  %v433_v59 = vld [vmem:[%s3483_s10 + $0x60] sm:$0xff]  ;;  %v426_v61 = vld [vmem:[%s3483_s10 + $0x28] sm:$0xff] }
 0x182   : > { %2064 = vmatpush1.msra.mxu0 %v537_v3  ;;  %2141 = vmatpush1.msra.mxu1 %v793_v4  ;;  %v689_v60 = vld [vmem:[%s3483_s10 + $0x860] sm:$0xff]  ;;  %v682_v62 = vld [vmem:[%s3483_s10 + $0x828] sm:$0xff] }
 0x183   : > { %1978 = vmatmul.mubr.f32.gmra.mxu0 %v3107_v9  ;;  %2065 = vmatprep.subr.mxu0 %v530_v5  ;;  %v425_v63 = vld [vmem:[%s3483_s10 + $0x20] sm:$0xff]  ;;  %v674_v1 = vld [vmem:[%s3483_s10 + $0x7e8] sm:$0xff] }
 0x184   : > { %2142 = vmatprep.subr.mxu1 %v786_v6  ;;  %2054 = vmatprep.mubr.f32.mxu1 %v3108_v13  ;;  %v681_v0 = vld [vmem:[%s3483_s10 + $0x820] sm:$0xff]  ;;  %v930_v2 = vld [vmem:[%s3483_s10 + $0xfe8] sm:$0xff] }
 0x185   : > { %2066 = vmatpush1.msra.mxu0 %v529_v8  ;;  %2143 = vmatpush1.msra.mxu1 %v785_v10  ;;  %v673_v3 = vld [vmem:[%s3483_s10 + $0x7e0] sm:$0xff]  ;;  %v666_v5 = vld [vmem:[%s3483_s10 + $0x7a8] sm:$0xff] }
 0x186   : > { %2067 = vmatprep.subr.mxu0 %v522_v11  ;;  %2055 = vmatmul.mubr.f32.gmra.mxu1 %v3109_v18  ;;  %v929_v4 = vld [vmem:[%s3483_s10 + $0xfe0] sm:$0xff]  ;;  %v922_v6 = vld [vmem:[%s3483_s10 + $0xfa8] sm:$0xff] }
 0x187   : > { %2144 = vmatprep.subr.mxu1 %v778_v12  ;;  %2068 = vmatpush1.msra.mxu0 %v521_v14  ;;  %v665_v7 = vld [vmem:[%s3483_s10 + $0x7a0] sm:$0xff]  ;;  %v658_v9 = vld [vmem:[%s3483_s10 + $0x768] sm:$0xff] }
 0x188   : > { %2145 = vmatpush1.msra.mxu1 %v777_v15  ;;  %2069 = vmatprep.subr.mxu0 %v514_v16  ;;  %v921_v8 = vld [vmem:[%s3483_s10 + $0xfa0] sm:$0xff]  ;;  %v914_v10 = vld [vmem:[%s3483_s10 + $0xf68] sm:$0xff] }
 0x189   : > { %2146 = vmatprep.subr.mxu1 %v770_v17  ;;  %2070 = vmatpush1.msra.mxu0 %v513_v19  ;;  %v657_v11 = vld [vmem:[%s3483_s10 + $0x760] sm:$0xff]  ;;  %v650_v13 = vld [vmem:[%s3483_s10 + $0x728] sm:$0xff] }
 0x18a   : > { %2147 = vmatpush1.msra.mxu1 %v769_v20  ;;  %2071 = vmatprep.subr.mxu0 %v506_v21  ;;  %v913_v12 = vld [vmem:[%s3483_s10 + $0xf60] sm:$0xff]  ;;  %v906_v14 = vld [vmem:[%s3483_s10 + $0xf28] sm:$0xff] }
 0x18b   : > { %2148 = vmatprep.subr.mxu1 %v762_v22  ;;  %2072 = vmatpush1.msra.mxu0 %v505_v23  ;;  %v649_v15 = vld [vmem:[%s3483_s10 + $0x720] sm:$0xff]  ;;  %v642_v17 = vld [vmem:[%s3483_s10 + $0x6e8] sm:$0xff]  ;;  %v1511_v23 = vpop.f32.mrf.mxu0 }
 0x18c   : > { %2149 = vmatpush1.msra.mxu1 %v761_v24  ;;  %2073 = vmatprep.subr.mxu0 %v498_v25  ;;  %v905_v16 = vld [vmem:[%s3483_s10 + $0xf20] sm:$0xff]  ;;  %v898_v18 = vld [vmem:[%s3483_s10 + $0xee8] sm:$0xff] }
 0x18d   : > { %2150 = vmatprep.subr.mxu1 %v754_v26  ;;  %2074 = vmatpush1.msra.mxu0 %v497_v27  ;;  %v641_v19 = vld [vmem:[%s3483_s10 + $0x6e0] sm:$0xff]  ;;  %v634_v21 = vld [vmem:[%s3483_s10 + $0x6a8] sm:$0xff] }
 0x18e   : > { %2151 = vmatpush1.msra.mxu1 %v753_v28  ;;  %2075 = vmatprep.subr.mxu0 %v490_v29  ;;  %v897_v20 = vld [vmem:[%s3483_s10 + $0xee0] sm:$0xff]  ;;  %v890_v22 = vld [vmem:[%s3483_s10 + $0xea8] sm:$0xff]  ;;  %v1588_v28 = vpop.f32.mrf.mxu1 }
 0x18f   : > { %2152 = vmatprep.subr.mxu1 %v746_v30  ;;  %2076 = vmatpush1.msra.mxu0 %v489_v31  ;;  %v633_v24 = vld [vmem:[%s3483_s10 + $0x6a0] sm:$0xff]  ;;  %v626_v26 = vld [vmem:[%s3483_s10 + $0x668] sm:$0xff] }
 0x190   : > { %2153 = vmatpush1.msra.mxu1 %v745_v32  ;;  %2077 = vmatprep.subr.mxu0 %v482_v33  ;;  %v889_v25 = vld [vmem:[%s3483_s10 + $0xea0] sm:$0xff]  ;;  %v882_v27 = vld [vmem:[%s3483_s10 + $0xe68] sm:$0xff]  ;;  %v1513_v33 = vpop.f32.mrf.mxu0 }
 0x191   : > { %2154 = vmatprep.subr.mxu1 %v738_v34  ;;  %2078 = vmatpush1.msra.mxu0 %v481_v35  ;;  %v625_v29 = vld [vmem:[%s3483_s10 + $0x660] sm:$0xff]  ;;  %v618_v31 = vld [vmem:[%s3483_s10 + $0x628] sm:$0xff] }
 0x192   : > { %2155 = vmatpush1.msra.mxu1 %v737_v36  ;;  %2079 = vmatprep.subr.mxu0 %v474_v37  ;;  %v881_v30 = vld [vmem:[%s3483_s10 + $0xe60] sm:$0xff]  ;;  %v874_v32 = vld [vmem:[%s3483_s10 + $0xe28] sm:$0xff] }
 0x193   : > { %2156 = vmatprep.subr.mxu1 %v730_v38  ;;  %2080 = vmatpush1.msra.mxu0 %v473_v39  ;;  %v617_v34 = vld [vmem:[%s3483_s10 + $0x620] sm:$0xff]  ;;  %v610_v36 = vld [vmem:[%s3483_s10 + $0x5e8] sm:$0xff]  ;;  %v1590_v38 = vpop.f32.mrf.mxu1 }
 0x194   : > { %2157 = vmatpush1.msra.mxu1 %v729_v40  ;;  %2081 = vmatprep.subr.mxu0 %v466_v41  ;;  %v873_v35 = vld [vmem:[%s3483_s10 + $0xe20] sm:$0xff]  ;;  %v866_v37 = vld [vmem:[%s3483_s10 + $0xde8] sm:$0xff] }
 0x195   : > { %2158 = vmatprep.subr.mxu1 %v722_v42  ;;  %2082 = vmatpush1.msra.mxu0 %v465_v43  ;;  %v609_v39 = vld [vmem:[%s3483_s10 + $0x5e0] sm:$0xff]  ;;  %v602_v42 = vld [vmem:[%s3483_s10 + $0x5a8] sm:$0xff] }
 0x196   : > { %2159 = vmatpush1.msra.mxu1 %v721_v44  ;;  %2083 = vmatprep.subr.mxu0 %v458_v45  ;;  %v865_v40 = vld [vmem:[%s3483_s10 + $0xde0] sm:$0xff]  ;;  %v858_v43 = vld [vmem:[%s3483_s10 + $0xda8] sm:$0xff] }
 0x197   : > { %2160 = vmatprep.subr.mxu1 %v714_v46  ;;  %2084 = vmatpush1.msra.mxu0 %v457_v47  ;;  %v601_v44 = vld [vmem:[%s3483_s10 + $0x5a0] sm:$0xff] }
 0x198   : > { %2161 = vmatpush1.msra.mxu1 %v713_v48  ;;  %2085 = vmatprep.subr.mxu0 %v450_v49  ;;  %v857_v45 = vld [vmem:[%s3483_s10 + $0xda0] sm:$0xff]  ;;  %v594_v48 = vld [vmem:[%s3483_s10 + $0x568] sm:$0xff] }
 0x199   : > { %2162 = vmatprep.subr.mxu1 %v706_v50  ;;  %2086 = vmatpush1.msra.mxu0 %v449_v51  ;;  %v850_v49 = vld [vmem:[%s3483_s10 + $0xd68] sm:$0xff]  ;;  %v593_v50 = vld [vmem:[%s3483_s10 + $0x560] sm:$0xff] }
 0x19a   : > { %2163 = vmatpush1.msra.mxu1 %v705_v52  ;;  %2087 = vmatprep.subr.mxu0 %v442_v53  ;;  %v849_v51 = vld [vmem:[%s3483_s10 + $0xd60] sm:$0xff]  ;;  %v1589_v52 = vadd.f32 %v1588_v28, %v1511_v23  ;;  %v586_v53 = vld [vmem:[%s3483_s10 + $0x528] sm:$0xff] }
 0x19b   : > { %2164 = vmatprep.subr.mxu1 %v698_v54  ;;  %2088 = vmatpush1.msra.mxu0 %v441_v55  ;;  %v842_v54 = vld [vmem:[%s3483_s10 + $0xd28] sm:$0xff]  ;;  %v585_v55 = vld [vmem:[%s3483_s10 + $0x520] sm:$0xff] }
 0x19c   : > { %2165 = vmatpush1.msra.mxu1 %v697_v56  ;;  %2089 = vmatprep.subr.mxu0 %v434_v57  ;;  %v841_v56 = vld [vmem:[%s3483_s10 + $0xd20] sm:$0xff] }
 0x19d   : > { %2166 = vmatprep.subr.mxu1 %v690_v58  ;;  %2090 = vmatpush1.msra.mxu0 %v433_v59  ;;  %v1591_v59 = vadd.f32 %v1590_v38, %v1513_v33  ;;  %v1314_v33 = vld [vmem:[%s3483_s10 + $0x1be8] sm:$0xff]  ;;  %v398_v38 = vld [vmem:[#allocation2 + $0x20] sm:$0xff] }
 0x19e   : > { %2167 = vmatpush1.msra.mxu1 %v689_v60  ;;  %2091 = vmatprep.subr.mxu0 %v426_v61  ;;  %v578_v60 = vld [vmem:[%s3483_s10 + $0x4e8] sm:$0xff] }
 0x19f   : > { %2168 = vmatprep.subr.mxu1 %v682_v62  ;;  %2092 = vmatpush1.msra.mxu0 %v425_v63  ;;  %v834_v61 = vld [vmem:[%s3483_s10 + $0xce8] sm:$0xff]  ;;  %v577_v63 = vld [vmem:[%s3483_s10 + $0x4e0] sm:$0xff] }
 0x1a0   : > { %2169 = vmatpush1.msra.mxu1 %v681_v0  ;;  %2093 = vmatprep.subr.mxu0 %v674_v1  ;;  %v833_v0 = vld [vmem:[%s3483_s10 + $0xce0] sm:$0xff]  ;;  %v389_v1 = vld [vmem:[#allocation2 + $0x30] sm:$0xff] }
 0x1a1   : > { %2170 = vmatprep.subr.mxu1 %v930_v2  ;;  %2094 = vmatpush2.msra.mxu0 %v673_v3 }
 0x1a2   : > { %2171 = vmatpush2.msra.mxu1 %v929_v4  ;;  %2095 = vmatprep.subr.mxu0 %v666_v5  ;;  %v570_v4 = vld [vmem:[%s3483_s10 + $0x4a8] sm:$0xff] }
 0x1a3   : > { %2172 = vmatprep.subr.mxu1 %v922_v6  ;;  %2096 = vmatpush2.msra.mxu0 %v665_v7  ;;  %v826_v5 = vld [vmem:[%s3483_s10 + $0xca8] sm:$0xff] }
 0x1a4   : > { %2173 = vmatpush2.msra.mxu1 %v921_v8  ;;  %2097 = vmatprep.subr.mxu0 %v658_v9  ;;  %v569_v8 = vld [vmem:[%s3483_s10 + $0x4a0] sm:$0xff] }
 0x1a5   : > { %2174 = vmatprep.subr.mxu1 %v914_v10  ;;  %2098 = vmatpush2.msra.mxu0 %v657_v11  ;;  %v825_v9 = vld [vmem:[%s3483_s10 + $0xca0] sm:$0xff] }
 0x1a6   : > { %2175 = vmatpush2.msra.mxu1 %v913_v12  ;;  %2099 = vmatprep.subr.mxu0 %v650_v13  ;;  %v390_v10 = vld [vmem:[#allocation2] sm:$0xff]  ;;  %v562_v13 = vld [vmem:[%s3483_s10 + $0x468] sm:$0xff] }
 0x1a7   : > { %2176 = vmatprep.subr.mxu1 %v906_v14  ;;  %2100 = vmatpush2.msra.mxu0 %v649_v15  ;;  %v818_v14 = vld [vmem:[%s3483_s10 + $0xc68] sm:$0xff] }
 0x1a8   : > { %2177 = vmatpush2.msra.mxu1 %v905_v16  ;;  %2101 = vmatprep.subr.mxu0 %v642_v17  ;;  %v561_v17 = vld [vmem:[%s3483_s10 + $0x460] sm:$0xff] }
 0x1a9   : > { %2178 = vmatprep.subr.mxu1 %v898_v18  ;;  %2102 = vmatpush2.msra.mxu0 %v641_v19  ;;  %v817_v18 = vld [vmem:[%s3483_s10 + $0xc60] sm:$0xff] }
 0x1aa   : > { %2179 = vmatpush2.msra.mxu1 %v897_v20  ;;  %2103 = vmatprep.subr.mxu0 %v634_v21  ;;  %v554_v21 = vld [vmem:[%s3483_s10 + $0x428] sm:$0xff] }
 0x1ab   : > { %2180 = vmatprep.subr.mxu1 %v890_v22  ;;  %2104 = vmatpush2.msra.mxu0 %v633_v24  ;;  %v810_v22 = vld [vmem:[%s3483_s10 + $0xc28] sm:$0xff] }
 0x1ac   : > { %2181 = vmatpush2.msra.mxu1 %v889_v25  ;;  %2105 = vmatprep.subr.mxu0 %v626_v26  ;;  %v553_v25 = vld [vmem:[%s3483_s10 + $0x420] sm:$0xff] }
 0x1ad   : > { %2182 = vmatprep.subr.mxu1 %v882_v27  ;;  %2106 = vmatpush2.msra.mxu0 %v625_v29  ;;  %v809_v27 = vld [vmem:[%s3483_s10 + $0xc20] sm:$0xff] }
 0x1ae   : > { %2183 = vmatpush2.msra.mxu1 %v881_v30  ;;  %2107 = vmatprep.subr.mxu0 %v618_v31  ;;  %v1517_v41 = vpop.f32.mrf.mxu0  ;;  %v397_v29 = vld [vmem:[#allocation2 + $0x40] sm:$0xff]  ;;  %v3110_v31 = vld [vmem:[%s3481_s5 + $0x8] sm:$0xff] }
 0x1af   : > { %2184 = vmatprep.subr.mxu1 %v874_v32  ;;  %2108 = vmatpush2.msra.mxu0 %v617_v34  ;;  %v1594_v46 = vpop.f32.mrf.mxu1  ;;  %v1058_v32 = vld [vmem:[%s3483_s10 + $0x13e8] sm:$0xff] }
 0x1b0   : > { %2185 = vmatpush2.msra.mxu1 %v873_v35  ;;  %2109 = vmatprep.subr.mxu0 %v610_v36  ;;  %v1519_v47 = vpop.f32.mrf.mxu0  ;;  %v1595_v12 = vadd.f32 %v1594_v46, %v1517_v41  ;;  %v3111_v35 = vld [vmem:[%s3481_s5 + $0x18] sm:$0xff]  ;;  %v1057_v36 = vld [vmem:[%s3483_s10 + $0x13e0] sm:$0xff]  ;;  %v3113_v41 = vld [vmem:[%s3481_s5 + $0x10] sm:$0xff] }
 0x1b1   : > { %2186 = vmatprep.subr.mxu1 %v866_v37  ;;  %2110 = vmatpush2.msra.mxu0 %v609_v39  ;;  %v1596_v57 = vpop.f32.mrf.mxu1  ;;  %v1313_v37 = vld [vmem:[%s3483_s10 + $0x1be0] sm:$0xff] }
 0x1b2   : > { %2187 = vmatpush2.msra.mxu1 %v865_v40  ;;  %2111 = vmatprep.subr.mxu0 %v602_v42  ;;  %v1597_v20 = vadd.f32 %v1596_v57, %v1519_v47  ;;  %v3112_v40 = vld [vmem:[%s3481_s5] sm:$0xff]  ;;  %v1050_v42 = vld [vmem:[%s3483_s10 + $0x13a8] sm:$0xff] }
 0x1b3   : > { %2188 = vmatprep.subr.mxu1 %v858_v43  ;;  %2112 = vmatpush2.msra.mxu0 %v601_v44  ;;  %v1306_v43 = vld [vmem:[%s3483_s10 + $0x1ba8] sm:$0xff]  ;;  %v1049_v46 = vld [vmem:[%s3483_s10 + $0x13a0] sm:$0xff] }
 0x1b4   : > { %2189 = vmatpush2.msra.mxu1 %v857_v45  ;;  %2113 = vmatprep.subr.mxu0 %v594_v48  ;;  %v1305_v47 = vld [vmem:[%s3483_s10 + $0x1ba0] sm:$0xff]  ;;  %v1042_v48 = vld [vmem:[%s3483_s10 + $0x1368] sm:$0xff] }
 0x1b5   : > { %2190 = vmatprep.subr.mxu1 %v850_v49  ;;  %v1665_v58 = vpop.f32.mrf.mxu0  ;;  %2114 = vmatpush2.msra.mxu0 %v593_v50  ;;  %v1298_v49 = vld [vmem:[%s3483_s10 + $0x1b68] sm:$0xff] }
 0x1b6   : > { %2191 = vmatpush2.msra.mxu1 %v849_v51  ;;  %v1666_v62 = vadd.f32 %v1665_v58, %v1589_v52  ;;  %2115 = vmatprep.subr.mxu0 %v586_v53  ;;  %v1041_v51 = vld [vmem:[%s3483_s10 + $0x1360] sm:$0xff]  ;;  %v1034_v53 = vld [vmem:[%s3483_s10 + $0x1328] sm:$0xff] }
 0x1b7   : > { %2192 = vmatprep.subr.mxu1 %v842_v54  ;;  %v1742_v2 = vpop.f32.mrf.mxu1  ;;  %v1667_v3 = vpop.f32.mrf.mxu0  ;;  %2116 = vmatpush2.msra.mxu0 %v585_v55  ;;  %v1297_v52 = vld [vmem:[%s3483_s10 + $0x1b60] sm:$0xff]  ;;  %v1290_v54 = vld [vmem:[%s3483_s10 + $0x1b28] sm:$0xff] }
 0x1b8   : > { %2193 = vmatpush2.msra.mxu1 %v841_v56  ;;  %v1743_v6 = vadd.f32 %v1742_v2, %v1666_v62  ;;  %v1668_v7 = vadd.f32 %v1667_v3, %v1591_v59  ;;  %2117 = vmatprep.subr.mxu0 %v578_v60  ;;  %v1033_v55 = vld [vmem:[%s3483_s10 + $0x1320] sm:$0xff]  ;;  %v1026_v57 = vld [vmem:[%s3483_s10 + $0x12e8] sm:$0xff] }
 0x1b9   : > { %2194 = vmatprep.subr.mxu1 %v834_v61  ;;  %v1744_v11 = vpop.f32.mrf.mxu1  ;;  %2118 = vmatpush2.msra.mxu0 %v577_v63  ;;  %v1289_v56 = vld [vmem:[%s3483_s10 + $0x1b20] sm:$0xff]  ;;  %v1282_v58 = vld [vmem:[%s3483_s10 + $0x1ae8] sm:$0xff] }
 0x1ba   : > { %2195 = vmatpush2.msra.mxu1 %v833_v0  ;;  %v2677_v15 = vadd.f32 %v1743_v6, %v389_v1  ;;  %v1745_v16 = vadd.f32 %v1744_v11, %v1668_v7  ;;  %2119 = vmatprep.subr.mxu0 %v570_v4  ;;  %v1025_v59 = vld [vmem:[%s3483_s10 + $0x12e0] sm:$0xff]  ;;  %v1018_v61 = vld [vmem:[%s3483_s10 + $0x12a8] sm:$0xff] }
 0x1bb   : > { %2196 = vmatprep.subr.mxu1 %v826_v5  ;;  %v1671_v19 = vpop.f32.mrf.mxu0  ;;  %2120 = vmatpush2.msra.mxu0 %v569_v8  ;;  %v1281_v60 = vld [vmem:[%s3483_s10 + $0x1ae0] sm:$0xff]  ;;  %v1274_v62 = vld [vmem:[%s3483_s10 + $0x1aa8] sm:$0xff] }
 0x1bc   : > { %2197 = vmatpush2.msra.mxu1 %v825_v9  ;;  %2693 = vst [vmem:[#allocation2 + $0x30] sm:$0xff] %v2677_v15  ;;  %v2678_v23 = vadd.f32 %v1745_v16, %v390_v10  ;;  %v1672_v24 = vadd.f32 %v1671_v19, %v1595_v12  ;;  %2121 = vmatprep.subr.mxu0 %v562_v13  ;;  %v1017_v63 = vld [vmem:[%s3483_s10 + $0x12a0] sm:$0xff]  ;;  %v1010_v1 = vld [vmem:[%s3483_s10 + $0x1268] sm:$0xff] }
 0x1bd   : > { %2198 = vmatprep.subr.mxu1 %v818_v14  ;;  %v1673_v26 = vpop.f32.mrf.mxu0  ;;  %2122 = vmatpush2.msra.mxu0 %v561_v17  ;;  %v1273_v0 = vld [vmem:[%s3483_s10 + $0x1aa0] sm:$0xff]  ;;  %v1266_v2 = vld [vmem:[%s3483_s10 + $0x1a68] sm:$0xff] }
 0x1be   : > { %2199 = vmatpush2.msra.mxu1 %v817_v18  ;;  %2694 = vst [vmem:[#allocation2] sm:$0xff] %v2678_v23  ;;  %v1674_v28 = vadd.f32 %v1673_v26, %v1597_v20  ;;  %2123 = vmatprep.subr.mxu0 %v554_v21  ;;  %v1748_v30 = vpop.f32.mrf.mxu1  ;;  %v1009_v3 = vld [vmem:[%s3483_s10 + $0x1260] sm:$0xff]  ;;  %v1002_v5 = vld [vmem:[%s3483_s10 + $0x1228] sm:$0xff] }
 0x1bf   : > { %2200 = vmatprep.subr.mxu1 %v810_v22  ;;  %2124 = vmatpush2.msra.mxu0 %v553_v25  ;;  %v1749_v34 = vadd.f32 %v1748_v30, %v1672_v24  ;;  %v1265_v4 = vld [vmem:[%s3483_s10 + $0x1a60] sm:$0xff]  ;;  %v1258_v6 = vld [vmem:[%s3483_s10 + $0x1a28] sm:$0xff] }
 0x1c0   : > { %2125 = vmatprep.mubr.f32.mxu0 %v3110_v31  ;;  %2201 = vmatpush2.msra.mxu1 %v809_v27  ;;  %v1750_v39 = vpop.f32.mrf.mxu1  ;;  %v1001_v7 = vld [vmem:[%s3483_s10 + $0x1220] sm:$0xff]  ;;  %v994_v9 = vld [vmem:[%s3483_s10 + $0x11e8] sm:$0xff] }
 0x1c1   : > { %2202 = vmatprep.mubr.f32.mxu1 %v3111_v35  ;;  %2126 = vmatmul.mubr.f32.vlgmr.msra.gmra.mxu0 %v3112_v40  ;;  %v2685_v44 = vadd.f32 %v1749_v34, %v397_v29  ;;  %v1751_v45 = vadd.f32 %v1750_v39, %v1674_v28  ;;  %v1257_v8 = vld [vmem:[%s3483_s10 + $0x1a20] sm:$0xff]  ;;  %v1250_v10 = vld [vmem:[%s3483_s10 + $0x19e8] sm:$0xff] }
 0x1c2   : > { %2203 = vmatmul.mubr.f32.vlgmr.msra.gmra.mxu1 %v3113_v41  ;;  %2215 = vmatprep.subr.mxu0 %v1058_v32  ;;  %v993_v11 = vld [vmem:[%s3483_s10 + $0x11e0] sm:$0xff]  ;;  %v986_v13 = vld [vmem:[%s3483_s10 + $0x11a8] sm:$0xff] }
 0x1c3   : > { %2292 = vmatprep.subr.mxu1 %v1314_v33  ;;  %2216 = vmatpush1.msra.mxu0 %v1057_v36  ;;  %2701 = vst [vmem:[#allocation2 + $0x40] sm:$0xff] %v2685_v44  ;;  %v2686_v50 = vadd.f32 %v1751_v45, %v398_v38  ;;  %v1249_v12 = vld [vmem:[%s3483_s10 + $0x19e0] sm:$0xff]  ;;  %v1242_v14 = vld [vmem:[%s3483_s10 + $0x19a8] sm:$0xff] }
 0x1c4   : > { %2293 = vmatpush1.msra.mxu1 %v1313_v37  ;;  %2217 = vmatprep.subr.mxu0 %v1050_v42  ;;  %v985_v15 = vld [vmem:[%s3483_s10 + $0x11a0] sm:$0xff]  ;;  %v978_v17 = vld [vmem:[%s3483_s10 + $0x1168] sm:$0xff] }
 0x1c5   : > { %2294 = vmatprep.subr.mxu1 %v1306_v43  ;;  %2218 = vmatpush1.msra.mxu0 %v1049_v46  ;;  %2702 = vst [vmem:[#allocation2 + $0x20] sm:$0xff] %v2686_v50  ;;  %v1241_v16 = vld [vmem:[%s3483_s10 + $0x19a0] sm:$0xff]  ;;  %v1234_v18 = vld [vmem:[%s3483_s10 + $0x1968] sm:$0xff] }
 0x1c6   : > { %2295 = vmatpush1.msra.mxu1 %v1305_v47  ;;  %2219 = vmatprep.subr.mxu0 %v1042_v48  ;;  %v977_v19 = vld [vmem:[%s3483_s10 + $0x1160] sm:$0xff]  ;;  %v970_v21 = vld [vmem:[%s3483_s10 + $0x1128] sm:$0xff] }
 0x1c7   : > { %2296 = vmatprep.subr.mxu1 %v1298_v49  ;;  %2220 = vmatpush1.msra.mxu0 %v1041_v51  ;;  %v1233_v20 = vld [vmem:[%s3483_s10 + $0x1960] sm:$0xff]  ;;  %v1226_v22 = vld [vmem:[%s3483_s10 + $0x1928] sm:$0xff] }
 0x1c8   : > { %2297 = vmatpush1.msra.mxu1 %v1297_v52  ;;  %2221 = vmatprep.subr.mxu0 %v1034_v53  ;;  %v969_v23 = vld [vmem:[%s3483_s10 + $0x1120] sm:$0xff]  ;;  %v962_v25 = vld [vmem:[%s3483_s10 + $0x10e8] sm:$0xff] }
 0x1c9   : > { %2298 = vmatprep.subr.mxu1 %v1290_v54  ;;  %2222 = vmatpush1.msra.mxu0 %v1033_v55  ;;  %v1225_v24 = vld [vmem:[%s3483_s10 + $0x1920] sm:$0xff]  ;;  %v1218_v26 = vld [vmem:[%s3483_s10 + $0x18e8] sm:$0xff] }
 0x1ca   : > { %2299 = vmatpush1.msra.mxu1 %v1289_v56  ;;  %2223 = vmatprep.subr.mxu0 %v1026_v57  ;;  %v961_v27 = vld [vmem:[%s3483_s10 + $0x10e0] sm:$0xff]  ;;  %v954_v29 = vld [vmem:[%s3483_s10 + $0x10a8] sm:$0xff] }
 0x1cb   : > { %2300 = vmatprep.subr.mxu1 %v1282_v58  ;;  %2224 = vmatpush1.msra.mxu0 %v1025_v59  ;;  %v1217_v28 = vld [vmem:[%s3483_s10 + $0x18e0] sm:$0xff]  ;;  %v1210_v30 = vld [vmem:[%s3483_s10 + $0x18a8] sm:$0xff] }
 0x1cc   : > { %2301 = vmatpush1.msra.mxu1 %v1281_v60  ;;  %2225 = vmatprep.subr.mxu0 %v1018_v61  ;;  %v953_v31 = vld [vmem:[%s3483_s10 + $0x10a0] sm:$0xff]  ;;  %v946_v33 = vld [vmem:[%s3483_s10 + $0x1068] sm:$0xff] }
 0x1cd   : > { %2302 = vmatprep.subr.mxu1 %v1274_v62  ;;  %2226 = vmatpush1.msra.mxu0 %v1017_v63  ;;  %v1209_v32 = vld [vmem:[%s3483_s10 + $0x18a0] sm:$0xff]  ;;  %v1202_v34 = vld [vmem:[%s3483_s10 + $0x1868] sm:$0xff] }
 0x1ce   : > { %2303 = vmatpush1.msra.mxu1 %v1273_v0  ;;  %2227 = vmatprep.subr.mxu0 %v1010_v1  ;;  %v945_v35 = vld [vmem:[%s3483_s10 + $0x1060] sm:$0xff]  ;;  %v938_v37 = vld [vmem:[%s3483_s10 + $0x1028] sm:$0xff] }
 0x1cf   : > { %2304 = vmatprep.subr.mxu1 %v1266_v2  ;;  %2228 = vmatpush1.msra.mxu0 %v1009_v3  ;;  %v1201_v36 = vld [vmem:[%s3483_s10 + $0x1860] sm:$0xff]  ;;  %v1194_v38 = vld [vmem:[%s3483_s10 + $0x1828] sm:$0xff] }
 0x1d0   : > { %2305 = vmatpush1.msra.mxu1 %v1265_v4  ;;  %2229 = vmatprep.subr.mxu0 %v1002_v5  ;;  %v937_v39 = vld [vmem:[%s3483_s10 + $0x1020] sm:$0xff]  ;;  %v1186_v41 = vld [vmem:[%s3483_s10 + $0x17e8] sm:$0xff] }
 0x1d1   : > { %2306 = vmatprep.subr.mxu1 %v1258_v6  ;;  %2230 = vmatpush1.msra.mxu0 %v1001_v7  ;;  %v1193_v40 = vld [vmem:[%s3483_s10 + $0x1820] sm:$0xff]  ;;  %v1442_v42 = vld [vmem:[%s3483_s10 + $0x1fe8] sm:$0xff] }
 0x1d2   : > { %2307 = vmatpush1.msra.mxu1 %v1257_v8  ;;  %2231 = vmatprep.subr.mxu0 %v994_v9  ;;  %v1185_v43 = vld [vmem:[%s3483_s10 + $0x17e0] sm:$0xff]  ;;  %v1178_v45 = vld [vmem:[%s3483_s10 + $0x17a8] sm:$0xff] }
 0x1d3   : > { %2308 = vmatprep.subr.mxu1 %v1250_v10  ;;  %2232 = vmatpush1.msra.mxu0 %v993_v11  ;;  %v1441_v44 = vld [vmem:[%s3483_s10 + $0x1fe0] sm:$0xff]  ;;  %v1434_v46 = vld [vmem:[%s3483_s10 + $0x1fa8] sm:$0xff] }
 0x1d4   : > { %2309 = vmatpush1.msra.mxu1 %v1249_v12  ;;  %2233 = vmatprep.subr.mxu0 %v986_v13  ;;  %v1177_v47 = vld [vmem:[%s3483_s10 + $0x17a0] sm:$0xff]  ;;  %v1170_v49 = vld [vmem:[%s3483_s10 + $0x1768] sm:$0xff] }
 0x1d5   : > { %2310 = vmatprep.subr.mxu1 %v1242_v14  ;;  %2234 = vmatpush1.msra.mxu0 %v985_v15  ;;  %v1433_v48 = vld [vmem:[%s3483_s10 + $0x1fa0] sm:$0xff]  ;;  %v1426_v50 = vld [vmem:[%s3483_s10 + $0x1f68] sm:$0xff] }
 0x1d6   : > { %2311 = vmatpush1.msra.mxu1 %v1241_v16  ;;  %2235 = vmatprep.subr.mxu0 %v978_v17  ;;  %v1169_v51 = vld [vmem:[%s3483_s10 + $0x1760] sm:$0xff]  ;;  %v1162_v53 = vld [vmem:[%s3483_s10 + $0x1728] sm:$0xff] }
 0x1d7   : > { %2312 = vmatprep.subr.mxu1 %v1234_v18  ;;  %2236 = vmatpush1.msra.mxu0 %v977_v19  ;;  %v1425_v52 = vld [vmem:[%s3483_s10 + $0x1f60] sm:$0xff]  ;;  %v1418_v54 = vld [vmem:[%s3483_s10 + $0x1f28] sm:$0xff] }
 0x1d8   : > { %2313 = vmatpush1.msra.mxu1 %v1233_v20  ;;  %2237 = vmatprep.subr.mxu0 %v970_v21  ;;  %v1161_v55 = vld [vmem:[%s3483_s10 + $0x1720] sm:$0xff]  ;;  %v1154_v57 = vld [vmem:[%s3483_s10 + $0x16e8] sm:$0xff] }
 0x1d9   : > { %2314 = vmatprep.subr.mxu1 %v1226_v22  ;;  %2238 = vmatpush1.msra.mxu0 %v969_v23  ;;  %v1417_v56 = vld [vmem:[%s3483_s10 + $0x1f20] sm:$0xff]  ;;  %v1410_v58 = vld [vmem:[%s3483_s10 + $0x1ee8] sm:$0xff] }
 0x1da   : > { %2315 = vmatpush1.msra.mxu1 %v1225_v24  ;;  %2239 = vmatprep.subr.mxu0 %v962_v25  ;;  %v1153_v59 = vld [vmem:[%s3483_s10 + $0x16e0] sm:$0xff]  ;;  %v1146_v61 = vld [vmem:[%s3483_s10 + $0x16a8] sm:$0xff] }
 0x1db   : > { %2316 = vmatprep.subr.mxu1 %v1218_v26  ;;  %2240 = vmatpush1.msra.mxu0 %v961_v27  ;;  %v1409_v60 = vld [vmem:[%s3483_s10 + $0x1ee0] sm:$0xff]  ;;  %v1402_v62 = vld [vmem:[%s3483_s10 + $0x1ea8] sm:$0xff] }
 0x1dc   : > { %2317 = vmatpush1.msra.mxu1 %v1217_v28  ;;  %2241 = vmatprep.subr.mxu0 %v954_v29  ;;  %v1145_v63 = vld [vmem:[%s3483_s10 + $0x16a0] sm:$0xff]  ;;  %v1138_v1 = vld [vmem:[%s3483_s10 + $0x1668] sm:$0xff] }
 0x1dd   : > { %2318 = vmatprep.subr.mxu1 %v1210_v30  ;;  %2242 = vmatpush1.msra.mxu0 %v953_v31  ;;  %v1401_v0 = vld [vmem:[%s3483_s10 + $0x1ea0] sm:$0xff]  ;;  %v1394_v2 = vld [vmem:[%s3483_s10 + $0x1e68] sm:$0xff] }
 0x1de   : > { %2319 = vmatpush1.msra.mxu1 %v1209_v32  ;;  %2243 = vmatprep.subr.mxu0 %v946_v33  ;;  %v1137_v3 = vld [vmem:[%s3483_s10 + $0x1660] sm:$0xff]  ;;  %v1130_v5 = vld [vmem:[%s3483_s10 + $0x1628] sm:$0xff]  ;;  %v3115_v32 = vld [vmem:[%s3481_s5 + $0x58] sm:$0xff] }
 0x1df   : > { %2320 = vmatprep.subr.mxu1 %v1202_v34  ;;  %2244 = vmatpush1.msra.mxu0 %v945_v35  ;;  %v1393_v4 = vld [vmem:[%s3483_s10 + $0x1e60] sm:$0xff]  ;;  %v1386_v6 = vld [vmem:[%s3483_s10 + $0x1e28] sm:$0xff] }
 0x1e0   : > { %2321 = vmatpush1.msra.mxu1 %v1201_v36  ;;  %2245 = vmatprep.subr.mxu0 %v938_v37  ;;  %v1129_v7 = vld [vmem:[%s3483_s10 + $0x1620] sm:$0xff]  ;;  %v1122_v9 = vld [vmem:[%s3483_s10 + $0x15e8] sm:$0xff] }
 0x1e1   : > { %2322 = vmatprep.subr.mxu1 %v1194_v38  ;;  %2246 = vmatpush1.msra.mxu0 %v937_v39  ;;  %v1385_v8 = vld [vmem:[%s3483_s10 + $0x1e20] sm:$0xff]  ;;  %v1378_v10 = vld [vmem:[%s3483_s10 + $0x1de8] sm:$0xff]  ;;  %v3117_v38 = vld [vmem:[%s3481_s5 + $0x50] sm:$0xff] }
 0x1e2   : > { %2323 = vmatpush1.msra.mxu1 %v1193_v40  ;;  %2247 = vmatprep.subr.mxu0 %v1186_v41  ;;  %v1121_v11 = vld [vmem:[%s3483_s10 + $0x15e0] sm:$0xff]  ;;  %v1114_v13 = vld [vmem:[%s3483_s10 + $0x15a8] sm:$0xff] }
 0x1e3   : > { %2324 = vmatprep.subr.mxu1 %v1442_v42  ;;  %2248 = vmatpush2.msra.mxu0 %v1185_v43  ;;  %v1377_v12 = vld [vmem:[%s3483_s10 + $0x1de0] sm:$0xff]  ;;  %v1370_v14 = vld [vmem:[%s3483_s10 + $0x1da8] sm:$0xff] }
 0x1e4   : > { %2325 = vmatpush2.msra.mxu1 %v1441_v44  ;;  %2249 = vmatprep.subr.mxu0 %v1178_v45  ;;  %v1113_v15 = vld [vmem:[%s3483_s10 + $0x15a0] sm:$0xff]  ;;  %v1106_v17 = vld [vmem:[%s3483_s10 + $0x1568] sm:$0xff]  ;;  %v548_v45 = vld [vmem:[%s3483_s10 + $0x3f8] sm:$0xff] }
 0x1e5   : > { %2326 = vmatprep.subr.mxu1 %v1434_v46  ;;  %2250 = vmatpush2.msra.mxu0 %v1177_v47  ;;  %v1369_v16 = vld [vmem:[%s3483_s10 + $0x1da0] sm:$0xff]  ;;  %v1362_v18 = vld [vmem:[%s3483_s10 + $0x1d68] sm:$0xff]  ;;  %v804_v47 = vld [vmem:[%s3483_s10 + $0xbf8] sm:$0xff] }
 0x1e6   : > { %2327 = vmatpush2.msra.mxu1 %v1433_v48  ;;  %2251 = vmatprep.subr.mxu0 %v1170_v49  ;;  %v1105_v19 = vld [vmem:[%s3483_s10 + $0x1560] sm:$0xff]  ;;  %v1098_v21 = vld [vmem:[%s3483_s10 + $0x1528] sm:$0xff]  ;;  %v547_v49 = vld [vmem:[%s3483_s10 + $0x3f0] sm:$0xff] }
 0x1e7   : > { %2328 = vmatprep.subr.mxu1 %v1426_v50  ;;  %2252 = vmatpush2.msra.mxu0 %v1169_v51  ;;  %v1361_v20 = vld [vmem:[%s3483_s10 + $0x1d60] sm:$0xff]  ;;  %v1354_v22 = vld [vmem:[%s3483_s10 + $0x1d28] sm:$0xff]  ;;  %v803_v50 = vld [vmem:[%s3483_s10 + $0xbf0] sm:$0xff] }
 0x1e8   : > { %2329 = vmatpush2.msra.mxu1 %v1425_v52  ;;  %2253 = vmatprep.subr.mxu0 %v1162_v53  ;;  %v1097_v23 = vld [vmem:[%s3483_s10 + $0x1520] sm:$0xff]  ;;  %v1090_v25 = vld [vmem:[%s3483_s10 + $0x14e8] sm:$0xff]  ;;  %v3120_v51 = vld [vmem:[%s3481_s5 + $0x38] sm:$0xff] }
 0x1e9   : > { %2330 = vmatprep.subr.mxu1 %v1418_v54  ;;  %2254 = vmatpush2.msra.mxu0 %v1161_v55  ;;  %v1353_v24 = vld [vmem:[%s3483_s10 + $0x1d20] sm:$0xff]  ;;  %v1346_v26 = vld [vmem:[%s3483_s10 + $0x1ce8] sm:$0xff]  ;;  %v540_v52 = vld [vmem:[%s3483_s10 + $0x3b8] sm:$0xff] }
 0x1ea   : > { %2331 = vmatpush2.msra.mxu1 %v1417_v56  ;;  %2255 = vmatprep.subr.mxu0 %v1154_v57  ;;  %v1089_v27 = vld [vmem:[%s3483_s10 + $0x14e0] sm:$0xff]  ;;  %v1082_v29 = vld [vmem:[%s3483_s10 + $0x14a8] sm:$0xff]  ;;  %v796_v53 = vld [vmem:[%s3483_s10 + $0xbb8] sm:$0xff] }
 0x1eb   : > { %2332 = vmatprep.subr.mxu1 %v1410_v58  ;;  %2256 = vmatpush2.msra.mxu0 %v1153_v59  ;;  %v1345_v28 = vld [vmem:[%s3483_s10 + $0x1ce0] sm:$0xff]  ;;  %v1338_v30 = vld [vmem:[%s3483_s10 + $0x1ca8] sm:$0xff]  ;;  %v3121_v54 = vld [vmem:[%s3481_s5 + $0x30] sm:$0xff] }
 0x1ec   : > { %2333 = vmatpush2.msra.mxu1 %v1409_v60  ;;  %2257 = vmatprep.subr.mxu0 %v1146_v61  ;;  %v3114_v31 = vld [vmem:[%s3481_s5 + $0x48] sm:$0xff]  ;;  %v1081_v33 = vld [vmem:[%s3483_s10 + $0x14a0] sm:$0xff]  ;;  %v539_v55 = vld [vmem:[%s3483_s10 + $0x3b0] sm:$0xff] }
 0x1ed   : > { %2334 = vmatprep.subr.mxu1 %v1402_v62  ;;  %2258 = vmatpush2.msra.mxu0 %v1145_v63  ;;  %v1337_v34 = vld [vmem:[%s3483_s10 + $0x1ca0] sm:$0xff]  ;;  %v1074_v35 = vld [vmem:[%s3483_s10 + $0x1468] sm:$0xff]  ;;  %v795_v56 = vld [vmem:[%s3483_s10 + $0xbb0] sm:$0xff] }
 0x1ee   : > { %2335 = vmatpush2.msra.mxu1 %v1401_v0  ;;  %2259 = vmatprep.subr.mxu0 %v1138_v1  ;;  %v1330_v36 = vld [vmem:[%s3483_s10 + $0x1c68] sm:$0xff]  ;;  %v3116_v37 = vld [vmem:[%s3481_s5 + $0x40] sm:$0xff]  ;;  %v532_v57 = vld [vmem:[%s3483_s10 + $0x378] sm:$0xff] }
 0x1ef   : > { %2336 = vmatprep.subr.mxu1 %v1394_v2  ;;  %2260 = vmatpush2.msra.mxu0 %v1137_v3  ;;  %v1073_v39 = vld [vmem:[%s3483_s10 + $0x1460] sm:$0xff]  ;;  %v1066_v41 = vld [vmem:[%s3483_s10 + $0x1428] sm:$0xff]  ;;  %v788_v58 = vld [vmem:[%s3483_s10 + $0xb78] sm:$0xff] }
 0x1f0   : > { %2337 = vmatpush2.msra.mxu1 %v1393_v4  ;;  %2261 = vmatprep.subr.mxu0 %v1130_v5  ;;  %v1329_v40 = vld [vmem:[%s3483_s10 + $0x1c60] sm:$0xff]  ;;  %v1322_v42 = vld [vmem:[%s3483_s10 + $0x1c28] sm:$0xff]  ;;  %v531_v60 = vld [vmem:[%s3483_s10 + $0x370] sm:$0xff] }
 0x1f1   : > { %2338 = vmatprep.subr.mxu1 %v1386_v6  ;;  %2262 = vmatpush2.msra.mxu0 %v1129_v7  ;;  %v1065_v43 = vld [vmem:[%s3483_s10 + $0x1420] sm:$0xff]  ;;  %v3118_v46 = vld [vmem:[%s3481_s5 + $0x28] sm:$0xff]  ;;  %v787_v62 = vld [vmem:[%s3483_s10 + $0xb70] sm:$0xff] }
 0x1f2   : > { %2339 = vmatpush2.msra.mxu1 %v1385_v8  ;;  %2263 = vmatprep.subr.mxu0 %v1122_v9  ;;  %v1321_v44 = vld [vmem:[%s3483_s10 + $0x1c20] sm:$0xff]  ;;  %v3122_v59 = vld [vmem:[%s3481_s5 + $0x68] sm:$0xff]  ;;  %v524_v63 = vld [vmem:[%s3483_s10 + $0x338] sm:$0xff] }
 0x1f3   : > { %2340 = vmatprep.subr.mxu1 %v1378_v10  ;;  %2264 = vmatpush2.msra.mxu0 %v1121_v11  ;;  %v3119_v48 = vld [vmem:[%s3481_s5 + $0x20] sm:$0xff]  ;;  %v780_v0 = vld [vmem:[%s3483_s10 + $0xb38] sm:$0xff]  ;;  %v523_v2 = vld [vmem:[%s3483_s10 + $0x330] sm:$0xff] }
 0x1f4   : > { %2341 = vmatpush2.msra.mxu1 %v1377_v12  ;;  %2265 = vmatprep.subr.mxu0 %v1114_v13  ;;  %v3123_v61 = vld [vmem:[%s3481_s5 + $0x60] sm:$0xff]  ;;  %v3124_v1 = vld [vmem:[%s3481_s5 + $0x78] sm:$0xff]  ;;  %v779_v3 = vld [vmem:[%s3483_s10 + $0xb30] sm:$0xff] }
 0x1f5   : > { %2342 = vmatprep.subr.mxu1 %v1370_v14  ;;  %2266 = vmatpush2.msra.mxu0 %v1113_v15  ;;  %v516_v4 = vld [vmem:[%s3483_s10 + $0x2f8] sm:$0xff]  ;;  %v3125_v6 = vld [vmem:[%s3481_s5 + $0x70] sm:$0xff] }
 0x1f6   : > { %2343 = vmatpush2.msra.mxu1 %v1369_v16  ;;  %2267 = vmatprep.subr.mxu0 %v1106_v17  ;;  %v772_v5 = vld [vmem:[%s3483_s10 + $0xaf8] sm:$0xff]  ;;  %v515_v7 = vld [vmem:[%s3483_s10 + $0x2f0] sm:$0xff] }
 0x1f7   : > { %2344 = vmatprep.subr.mxu1 %v1362_v18  ;;  %2268 = vmatpush2.msra.mxu0 %v1105_v19  ;;  %v771_v8 = vld [vmem:[%s3483_s10 + $0xaf0] sm:$0xff]  ;;  %v508_v9 = vld [vmem:[%s3483_s10 + $0x2b8] sm:$0xff] }
 0x1f8   : > { %2345 = vmatpush2.msra.mxu1 %v1361_v20  ;;  %2269 = vmatprep.subr.mxu0 %v1098_v21  ;;  %v764_v10 = vld [vmem:[%s3483_s10 + $0xab8] sm:$0xff]  ;;  %v507_v11 = vld [vmem:[%s3483_s10 + $0x2b0] sm:$0xff] }
 0x1f9   : > { %2346 = vmatprep.subr.mxu1 %v1354_v22  ;;  %2270 = vmatpush2.msra.mxu0 %v1097_v23  ;;  %v763_v12 = vld [vmem:[%s3483_s10 + $0xab0] sm:$0xff]  ;;  %v500_v13 = vld [vmem:[%s3483_s10 + $0x278] sm:$0xff] }
 0x1fa   : > { %2347 = vmatpush2.msra.mxu1 %v1353_v24  ;;  %2271 = vmatprep.subr.mxu0 %v1090_v25  ;;  %v756_v14 = vld [vmem:[%s3483_s10 + $0xa78] sm:$0xff]  ;;  %v499_v15 = vld [vmem:[%s3483_s10 + $0x270] sm:$0xff] }
 0x1fb   : > { %2348 = vmatprep.subr.mxu1 %v1346_v26  ;;  %2272 = vmatpush2.msra.mxu0 %v1089_v27  ;;  %v755_v16 = vld [vmem:[%s3483_s10 + $0xa70] sm:$0xff]  ;;  %v492_v17 = vld [vmem:[%s3483_s10 + $0x238] sm:$0xff] }
 0x1fc   : > { %2349 = vmatpush2.msra.mxu1 %v1345_v28  ;;  %2131 = vmatprep.mubr.f32.mxu0 %v3114_v31  ;;  %v748_v18 = vld [vmem:[%s3483_s10 + $0xa38] sm:$0xff]  ;;  %v491_v19 = vld [vmem:[%s3483_s10 + $0x230] sm:$0xff] }
 0x1fd   : > { %2208 = vmatprep.mubr.f32.mxu1 %v3115_v32  ;;  %2273 = vmatprep.subr.mxu0 %v1082_v29  ;;  %v747_v20 = vld [vmem:[%s3483_s10 + $0xa30] sm:$0xff]  ;;  %v484_v21 = vld [vmem:[%s3483_s10 + $0x1f8] sm:$0xff] }
 0x1fe   : > { %2350 = vmatprep.subr.mxu1 %v1338_v30  ;;  %2132 = vmatmul.mubr.f32.gmra.mxu0 %v3116_v37  ;;  %v740_v22 = vld [vmem:[%s3483_s10 + $0x9f8] sm:$0xff]  ;;  %v483_v23 = vld [vmem:[%s3483_s10 + $0x1f0] sm:$0xff] }
 0x1ff   : > { %2209 = vmatmul.mubr.f32.gmra.mxu1 %v3117_v38  ;;  %2274 = vmatpush2.msra.mxu0 %v1081_v33  ;;  %v739_v24 = vld [vmem:[%s3483_s10 + $0x9f0] sm:$0xff]  ;;  %v476_v25 = vld [vmem:[%s3483_s10 + $0x1b8] sm:$0xff] }
 0x200   : > { %2351 = vmatpush2.msra.mxu1 %v1337_v34  ;;  %2275 = vmatprep.subr.mxu0 %v1074_v35  ;;  %v732_v26 = vld [vmem:[%s3483_s10 + $0x9b8] sm:$0xff]  ;;  %v475_v27 = vld [vmem:[%s3483_s10 + $0x1b0] sm:$0xff] }
 0x201   : > { %2352 = vmatprep.subr.mxu1 %v1330_v36  ;;  %2276 = vmatpush2.msra.mxu0 %v1073_v39  ;;  %v731_v28 = vld [vmem:[%s3483_s10 + $0x9b0] sm:$0xff]  ;;  %v468_v29 = vld [vmem:[%s3483_s10 + $0x178] sm:$0xff] }
 0x202   : > { %2353 = vmatpush2.msra.mxu1 %v1329_v40  ;;  %2277 = vmatprep.subr.mxu0 %v1066_v41  ;;  %v724_v30 = vld [vmem:[%s3483_s10 + $0x978] sm:$0xff]  ;;  %v467_v31 = vld [vmem:[%s3483_s10 + $0x170] sm:$0xff] }
 0x203   : > { %2354 = vmatprep.subr.mxu1 %v1322_v42  ;;  %2278 = vmatpush2.msra.mxu0 %v1065_v43  ;;  %v723_v32 = vld [vmem:[%s3483_s10 + $0x970] sm:$0xff]  ;;  %v460_v33 = vld [vmem:[%s3483_s10 + $0x138] sm:$0xff] }
 0x204   : > { %2279 = vmatprep.mubr.f32.mxu0 %v3118_v46  ;;  %2355 = vmatpush2.msra.mxu1 %v1321_v44  ;;  %v716_v34 = vld [vmem:[%s3483_s10 + $0x938] sm:$0xff]  ;;  %v459_v35 = vld [vmem:[%s3483_s10 + $0x130] sm:$0xff] }
 0x205   : > { %2280 = vmatmul.mubr.f32.vlgmr.msra.gmra.mxu0 %v3119_v48  ;;  %2356 = vmatprep.mubr.f32.mxu1 %v3120_v51  ;;  %v715_v36 = vld [vmem:[%s3483_s10 + $0x930] sm:$0xff]  ;;  %v452_v37 = vld [vmem:[%s3483_s10 + $0xf8] sm:$0xff] }
 0x206   : > { %2369 = vmatprep.subr.mxu0 %v548_v45  ;;  %2446 = vmatprep.subr.mxu1 %v804_v47  ;;  %v708_v38 = vld [vmem:[%s3483_s10 + $0x8f8] sm:$0xff]  ;;  %v451_v39 = vld [vmem:[%s3483_s10 + $0xf0] sm:$0xff] }
 0x207   : > { %2357 = vmatmul.mubr.f32.vlgmr.msra.gmra.mxu1 %v3121_v54  ;;  %2370 = vmatpush1.msra.mxu0 %v547_v49  ;;  %v707_v40 = vld [vmem:[%s3483_s10 + $0x8f0] sm:$0xff]  ;;  %v444_v41 = vld [vmem:[%s3483_s10 + $0xb8] sm:$0xff] }
 0x208   : > { %2447 = vmatpush1.msra.mxu1 %v803_v50  ;;  %2371 = vmatprep.subr.mxu0 %v540_v52  ;;  %v700_v42 = vld [vmem:[%s3483_s10 + $0x8b8] sm:$0xff]  ;;  %v443_v43 = vld [vmem:[%s3483_s10 + $0xb0] sm:$0xff] }
 0x209   : > { %2448 = vmatprep.subr.mxu1 %v796_v53  ;;  %2285 = vmatprep.mubr.f32.mxu0 %v3122_v59  ;;  %v699_v44 = vld [vmem:[%s3483_s10 + $0x8b0] sm:$0xff]  ;;  %v436_v45 = vld [vmem:[%s3483_s10 + $0x78] sm:$0xff] }
 0x20a   : > { %2372 = vmatpush1.msra.mxu0 %v539_v55  ;;  %2449 = vmatpush1.msra.mxu1 %v795_v56  ;;  %v692_v46 = vld [vmem:[%s3483_s10 + $0x878] sm:$0xff]  ;;  %v435_v47 = vld [vmem:[%s3483_s10 + $0x70] sm:$0xff] }
 0x20b   : > { %2286 = vmatmul.mubr.f32.gmra.mxu0 %v3123_v61  ;;  %2373 = vmatprep.subr.mxu0 %v532_v57  ;;  %v691_v48 = vld [vmem:[%s3483_s10 + $0x870] sm:$0xff]  ;;  %v428_v49 = vld [vmem:[%s3483_s10 + $0x38] sm:$0xff] }
 0x20c   : > { %2450 = vmatprep.subr.mxu1 %v788_v58  ;;  %2362 = vmatprep.mubr.f32.mxu1 %v3124_v1  ;;  %v684_v50 = vld [vmem:[%s3483_s10 + $0x838] sm:$0xff]  ;;  %v427_v51 = vld [vmem:[%s3483_s10 + $0x30] sm:$0xff] }
 0x20d   : > { %2374 = vmatpush1.msra.mxu0 %v531_v60  ;;  %2451 = vmatpush1.msra.mxu1 %v787_v62  ;;  %v683_v52 = vld [vmem:[%s3483_s10 + $0x830] sm:$0xff]  ;;  %v676_v53 = vld [vmem:[%s3483_s10 + $0x7f8] sm:$0xff] }
 0x20e   : > { %2375 = vmatprep.subr.mxu0 %v524_v63  ;;  %2363 = vmatmul.mubr.f32.gmra.mxu1 %v3125_v6  ;;  %v932_v54 = vld [vmem:[%s3483_s10 + $0xff8] sm:$0xff]  ;;  %v675_v55 = vld [vmem:[%s3483_s10 + $0x7f0] sm:$0xff] }
 0x20f   : > { %2452 = vmatprep.subr.mxu1 %v780_v0  ;;  %2376 = vmatpush1.msra.mxu0 %v523_v2  ;;  %v931_v56 = vld [vmem:[%s3483_s10 + $0xff0] sm:$0xff]  ;;  %v668_v57 = vld [vmem:[%s3483_s10 + $0x7b8] sm:$0xff] }
 0x210   : > { %2453 = vmatpush1.msra.mxu1 %v779_v3  ;;  %2377 = vmatprep.subr.mxu0 %v516_v4  ;;  %v924_v58 = vld [vmem:[%s3483_s10 + $0xfb8] sm:$0xff]  ;;  %v667_v59 = vld [vmem:[%s3483_s10 + $0x7b0] sm:$0xff] }
 0x211   : > { %2454 = vmatprep.subr.mxu1 %v772_v5  ;;  %2378 = vmatpush1.msra.mxu0 %v515_v7  ;;  %v923_v60 = vld [vmem:[%s3483_s10 + $0xfb0] sm:$0xff]  ;;  %v660_v61 = vld [vmem:[%s3483_s10 + $0x778] sm:$0xff] }
 0x212   : > { %2455 = vmatpush1.msra.mxu1 %v771_v8  ;;  %2379 = vmatprep.subr.mxu0 %v508_v9  ;;  %v916_v62 = vld [vmem:[%s3483_s10 + $0xf78] sm:$0xff]  ;;  %v659_v63 = vld [vmem:[%s3483_s10 + $0x770] sm:$0xff] }
 0x213   : > { %2456 = vmatprep.subr.mxu1 %v764_v10  ;;  %2380 = vmatpush1.msra.mxu0 %v507_v11  ;;  %v915_v0 = vld [vmem:[%s3483_s10 + $0xf70] sm:$0xff]  ;;  %v652_v1 = vld [vmem:[%s3483_s10 + $0x738] sm:$0xff]  ;;  %v1819_v11 = vpop.f32.mrf.mxu0 }
 0x214   : > { %2457 = vmatpush1.msra.mxu1 %v763_v12  ;;  %2381 = vmatprep.subr.mxu0 %v500_v13  ;;  %v908_v2 = vld [vmem:[%s3483_s10 + $0xf38] sm:$0xff]  ;;  %v651_v3 = vld [vmem:[%s3483_s10 + $0x730] sm:$0xff] }
 0x215   : > { %2458 = vmatprep.subr.mxu1 %v756_v14  ;;  %2382 = vmatpush1.msra.mxu0 %v499_v15  ;;  %v907_v4 = vld [vmem:[%s3483_s10 + $0xf30] sm:$0xff]  ;;  %v644_v5 = vld [vmem:[%s3483_s10 + $0x6f8] sm:$0xff] }
 0x216   : > { %2459 = vmatpush1.msra.mxu1 %v755_v16  ;;  %2383 = vmatprep.subr.mxu0 %v492_v17  ;;  %v900_v6 = vld [vmem:[%s3483_s10 + $0xef8] sm:$0xff]  ;;  %v643_v7 = vld [vmem:[%s3483_s10 + $0x6f0] sm:$0xff]  ;;  %v1896_v16 = vpop.f32.mrf.mxu1 }
 0x217   : > { %2460 = vmatprep.subr.mxu1 %v748_v18  ;;  %2384 = vmatpush1.msra.mxu0 %v491_v19  ;;  %v899_v8 = vld [vmem:[%s3483_s10 + $0xef0] sm:$0xff]  ;;  %v636_v9 = vld [vmem:[%s3483_s10 + $0x6b8] sm:$0xff] }
 0x218   : > { %2461 = vmatpush1.msra.mxu1 %v747_v20  ;;  %2385 = vmatprep.subr.mxu0 %v484_v21  ;;  %v892_v10 = vld [vmem:[%s3483_s10 + $0xeb8] sm:$0xff]  ;;  %v635_v12 = vld [vmem:[%s3483_s10 + $0x6b0] sm:$0xff]  ;;  %v1821_v21 = vpop.f32.mrf.mxu0 }
 0x219   : > { %2462 = vmatprep.subr.mxu1 %v740_v22  ;;  %2386 = vmatpush1.msra.mxu0 %v483_v23  ;;  %v891_v13 = vld [vmem:[%s3483_s10 + $0xeb0] sm:$0xff]  ;;  %v628_v14 = vld [vmem:[%s3483_s10 + $0x678] sm:$0xff] }
 0x21a   : > { %2463 = vmatpush1.msra.mxu1 %v739_v24  ;;  %2387 = vmatprep.subr.mxu0 %v476_v25  ;;  %v884_v15 = vld [vmem:[%s3483_s10 + $0xe78] sm:$0xff]  ;;  %v627_v17 = vld [vmem:[%s3483_s10 + $0x670] sm:$0xff] }
 0x21b   : > { %2464 = vmatprep.subr.mxu1 %v732_v26  ;;  %2388 = vmatpush1.msra.mxu0 %v475_v27  ;;  %v883_v18 = vld [vmem:[%s3483_s10 + $0xe70] sm:$0xff]  ;;  %v620_v19 = vld [vmem:[%s3483_s10 + $0x638] sm:$0xff]  ;;  %v1898_v26 = vpop.f32.mrf.mxu1 }
 0x21c   : > { %2465 = vmatpush1.msra.mxu1 %v731_v28  ;;  %2389 = vmatprep.subr.mxu0 %v468_v29  ;;  %v876_v20 = vld [vmem:[%s3483_s10 + $0xe38] sm:$0xff]  ;;  %v619_v22 = vld [vmem:[%s3483_s10 + $0x630] sm:$0xff] }
 0x21d   : > { %2466 = vmatprep.subr.mxu1 %v724_v30  ;;  %2390 = vmatpush1.msra.mxu0 %v467_v31  ;;  %v875_v23 = vld [vmem:[%s3483_s10 + $0xe30] sm:$0xff]  ;;  %v612_v24 = vld [vmem:[%s3483_s10 + $0x5f8] sm:$0xff] }
 0x21e   : > { %2467 = vmatpush1.msra.mxu1 %v723_v32  ;;  %2391 = vmatprep.subr.mxu0 %v460_v33  ;;  %v868_v25 = vld [vmem:[%s3483_s10 + $0xdf8] sm:$0xff]  ;;  %v611_v27 = vld [vmem:[%s3483_s10 + $0x5f0] sm:$0xff] }
 0x21f   : > { %2468 = vmatprep.subr.mxu1 %v716_v34  ;;  %2392 = vmatpush1.msra.mxu0 %v459_v35  ;;  %v867_v28 = vld [vmem:[%s3483_s10 + $0xdf0] sm:$0xff]  ;;  %v604_v30 = vld [vmem:[%s3483_s10 + $0x5b8] sm:$0xff] }
 0x220   : > { %2469 = vmatpush1.msra.mxu1 %v715_v36  ;;  %2393 = vmatprep.subr.mxu0 %v452_v37  ;;  %v860_v31 = vld [vmem:[%s3483_s10 + $0xdb8] sm:$0xff]  ;;  %v603_v32 = vld [vmem:[%s3483_s10 + $0x5b0] sm:$0xff] }
 0x221   : > { %2470 = vmatprep.subr.mxu1 %v708_v38  ;;  %2394 = vmatpush1.msra.mxu0 %v451_v39  ;;  %v859_v33 = vld [vmem:[%s3483_s10 + $0xdb0] sm:$0xff]  ;;  %v596_v36 = vld [vmem:[%s3483_s10 + $0x578] sm:$0xff] }
 0x222   : > { %2471 = vmatpush1.msra.mxu1 %v707_v40  ;;  %2395 = vmatprep.subr.mxu0 %v444_v41  ;;  %v852_v37 = vld [vmem:[%s3483_s10 + $0xd78] sm:$0xff]  ;;  %v595_v38 = vld [vmem:[%s3483_s10 + $0x570] sm:$0xff]  ;;  %v1897_v40 = vadd.f32 %v1896_v16, %v1819_v11 }
 0x223   : > { %2472 = vmatprep.subr.mxu1 %v700_v42  ;;  %2396 = vmatpush1.msra.mxu0 %v443_v43  ;;  %v851_v39 = vld [vmem:[%s3483_s10 + $0xd70] sm:$0xff]  ;;  %v588_v41 = vld [vmem:[%s3483_s10 + $0x538] sm:$0xff] }
 0x224   : > { %2473 = vmatpush1.msra.mxu1 %v699_v44  ;;  %2397 = vmatprep.subr.mxu0 %v436_v45  ;;  %v844_v42 = vld [vmem:[%s3483_s10 + $0xd38] sm:$0xff]  ;;  %v587_v43 = vld [vmem:[%s3483_s10 + $0x530] sm:$0xff] }
 0x225   : > { %2474 = vmatprep.subr.mxu1 %v692_v46  ;;  %2398 = vmatpush1.msra.mxu0 %v435_v47  ;;  %v843_v44 = vld [vmem:[%s3483_s10 + $0xd30] sm:$0xff]  ;;  %v1899_v47 = vadd.f32 %v1898_v26, %v1821_v21  ;;  %v1316_v21 = vld [vmem:[%s3483_s10 + $0x1bf8] sm:$0xff] }
 0x226   : > { %2475 = vmatpush1.msra.mxu1 %v691_v48  ;;  %2399 = vmatprep.subr.mxu0 %v428_v49  ;;  %v580_v48 = vld [vmem:[%s3483_s10 + $0x4f8] sm:$0xff] }
 0x227   : > { %2476 = vmatprep.subr.mxu1 %v684_v50  ;;  %2400 = vmatpush1.msra.mxu0 %v427_v51  ;;  %v836_v49 = vld [vmem:[%s3483_s10 + $0xcf8] sm:$0xff]  ;;  %v579_v51 = vld [vmem:[%s3483_s10 + $0x4f0] sm:$0xff] }
 0x228   : > { %2477 = vmatpush1.msra.mxu1 %v683_v52  ;;  %2401 = vmatprep.subr.mxu0 %v676_v53  ;;  %v835_v52 = vld [vmem:[%s3483_s10 + $0xcf0] sm:$0xff]  ;;  %v391_v53 = vld [vmem:[#allocation2 + $0x58] sm:$0xff] }
 0x229   : > { %2478 = vmatprep.subr.mxu1 %v932_v54  ;;  %2402 = vmatpush2.msra.mxu0 %v675_v55  ;;  %v400_v26 = vld [vmem:[#allocation2 + $0x38] sm:$0xff] }
 0x22a   : > { %2479 = vmatpush2.msra.mxu1 %v931_v56  ;;  %2403 = vmatprep.subr.mxu0 %v668_v57  ;;  %v572_v56 = vld [vmem:[%s3483_s10 + $0x4b8] sm:$0xff] }
 0x22b   : > { %2480 = vmatprep.subr.mxu1 %v924_v58  ;;  %2404 = vmatpush2.msra.mxu0 %v667_v59  ;;  %v828_v57 = vld [vmem:[%s3483_s10 + $0xcb8] sm:$0xff] }
 0x22c   : > { %2481 = vmatpush2.msra.mxu1 %v923_v60  ;;  %2405 = vmatprep.subr.mxu0 %v660_v61  ;;  %v571_v60 = vld [vmem:[%s3483_s10 + $0x4b0] sm:$0xff] }
 0x22d   : > { %2482 = vmatprep.subr.mxu1 %v916_v62  ;;  %2406 = vmatpush2.msra.mxu0 %v659_v63  ;;  %v827_v61 = vld [vmem:[%s3483_s10 + $0xcb0] sm:$0xff]  ;;  %v392_v62 = vld [vmem:[#allocation2 + $0x18] sm:$0xff] }
 0x22e   : > { %2483 = vmatpush2.msra.mxu1 %v915_v0  ;;  %2407 = vmatprep.subr.mxu0 %v652_v1  ;;  %v564_v1 = vld [vmem:[%s3483_s10 + $0x478] sm:$0xff] }
 0x22f   : > { %2484 = vmatprep.subr.mxu1 %v908_v2  ;;  %2408 = vmatpush2.msra.mxu0 %v651_v3  ;;  %v820_v2 = vld [vmem:[%s3483_s10 + $0xc78] sm:$0xff] }
 0x230   : > { %2485 = vmatpush2.msra.mxu1 %v907_v4  ;;  %2409 = vmatprep.subr.mxu0 %v644_v5  ;;  %v563_v5 = vld [vmem:[%s3483_s10 + $0x470] sm:$0xff] }
 0x231   : > { %2486 = vmatprep.subr.mxu1 %v900_v6  ;;  %2410 = vmatpush2.msra.mxu0 %v643_v7  ;;  %v819_v6 = vld [vmem:[%s3483_s10 + $0xc70] sm:$0xff] }
 0x232   : > { %2487 = vmatpush2.msra.mxu1 %v899_v8  ;;  %2411 = vmatprep.subr.mxu0 %v636_v9  ;;  %v556_v9 = vld [vmem:[%s3483_s10 + $0x438] sm:$0xff] }
 0x233   : > { %2488 = vmatprep.subr.mxu1 %v892_v10  ;;  %2412 = vmatpush2.msra.mxu0 %v635_v12  ;;  %v812_v10 = vld [vmem:[%s3483_s10 + $0xc38] sm:$0xff] }
 0x234   : > { %2489 = vmatpush2.msra.mxu1 %v891_v13  ;;  %2413 = vmatprep.subr.mxu0 %v628_v14  ;;  %v555_v13 = vld [vmem:[%s3483_s10 + $0x430] sm:$0xff] }
 0x235   : > { %2490 = vmatprep.subr.mxu1 %v884_v15  ;;  %2414 = vmatpush2.msra.mxu0 %v627_v17  ;;  %v811_v15 = vld [vmem:[%s3483_s10 + $0xc30] sm:$0xff] }
 0x236   : > { %2491 = vmatpush2.msra.mxu1 %v883_v18  ;;  %2415 = vmatprep.subr.mxu0 %v620_v19  ;;  %v1825_v29 = vpop.f32.mrf.mxu0  ;;  %v399_v17 = vld [vmem:[#allocation2 + $0x10] sm:$0xff]  ;;  %v3126_v19 = vld [vmem:[%s3481_s5 + $0x8] sm:$0xff] }
 0x237   : > { %2492 = vmatprep.subr.mxu1 %v876_v20  ;;  %2416 = vmatpush2.msra.mxu0 %v619_v22  ;;  %v1902_v34 = vpop.f32.mrf.mxu1  ;;  %v1060_v20 = vld [vmem:[%s3483_s10 + $0x13f8] sm:$0xff] }
 0x238   : > { %2493 = vmatpush2.msra.mxu1 %v875_v23  ;;  %2417 = vmatprep.subr.mxu0 %v612_v24  ;;  %v1827_v35 = vpop.f32.mrf.mxu0  ;;  %v1903_v0 = vadd.f32 %v1902_v34, %v1825_v29  ;;  %v3127_v23 = vld [vmem:[%s3481_s5 + $0x18] sm:$0xff]  ;;  %v1059_v24 = vld [vmem:[%s3483_s10 + $0x13f0] sm:$0xff] }
 0x239   : > { %2494 = vmatprep.subr.mxu1 %v868_v25  ;;  %2418 = vmatpush2.msra.mxu0 %v611_v27  ;;  %v1904_v45 = vpop.f32.mrf.mxu1  ;;  %v1315_v25 = vld [vmem:[%s3483_s10 + $0x1bf0] sm:$0xff] }
 0x23a   : > { %2495 = vmatpush2.msra.mxu1 %v867_v28  ;;  %2419 = vmatprep.subr.mxu0 %v604_v30  ;;  %v1905_v8 = vadd.f32 %v1904_v45, %v1827_v35  ;;  %v3128_v28 = vld [vmem:[%s3481_s5] sm:$0xff]  ;;  %v3129_v29 = vld [vmem:[%s3481_s5 + $0x10] sm:$0xff]  ;;  %v1052_v30 = vld [vmem:[%s3483_s10 + $0x13b8] sm:$0xff] }
 0x23b   : > { %2496 = vmatprep.subr.mxu1 %v860_v31  ;;  %2420 = vmatpush2.msra.mxu0 %v603_v32  ;;  %v1308_v31 = vld [vmem:[%s3483_s10 + $0x1bb8] sm:$0xff]  ;;  %v1051_v34 = vld [vmem:[%s3483_s10 + $0x13b0] sm:$0xff] }
 0x23c   : > { %2497 = vmatpush2.msra.mxu1 %v859_v33  ;;  %2421 = vmatprep.subr.mxu0 %v596_v36  ;;  %v1307_v35 = vld [vmem:[%s3483_s10 + $0x1bb0] sm:$0xff]  ;;  %v1044_v36 = vld [vmem:[%s3483_s10 + $0x1378] sm:$0xff] }
 0x23d   : > { %2498 = vmatprep.subr.mxu1 %v852_v37  ;;  %v1973_v46 = vpop.f32.mrf.mxu0  ;;  %2422 = vmatpush2.msra.mxu0 %v595_v38  ;;  %v1300_v37 = vld [vmem:[%s3483_s10 + $0x1b78] sm:$0xff] }
 0x23e   : > { %2499 = vmatpush2.msra.mxu1 %v851_v39  ;;  %v1974_v50 = vadd.f32 %v1973_v46, %v1897_v40  ;;  %2423 = vmatprep.subr.mxu0 %v588_v41  ;;  %v1043_v39 = vld [vmem:[%s3483_s10 + $0x1370] sm:$0xff]  ;;  %v1036_v41 = vld [vmem:[%s3483_s10 + $0x1338] sm:$0xff] }
 0x23f   : > { %2500 = vmatprep.subr.mxu1 %v844_v42  ;;  %v2050_v54 = vpop.f32.mrf.mxu1  ;;  %v1975_v55 = vpop.f32.mrf.mxu0  ;;  %2424 = vmatpush2.msra.mxu0 %v587_v43  ;;  %v1299_v40 = vld [vmem:[%s3483_s10 + $0x1b70] sm:$0xff]  ;;  %v1292_v42 = vld [vmem:[%s3483_s10 + $0x1b38] sm:$0xff] }
 0x240   : > { %2501 = vmatpush2.msra.mxu1 %v843_v44  ;;  %v2051_v58 = vadd.f32 %v2050_v54, %v1974_v50  ;;  %v1976_v59 = vadd.f32 %v1975_v55, %v1899_v47  ;;  %2425 = vmatprep.subr.mxu0 %v580_v48  ;;  %v1035_v43 = vld [vmem:[%s3483_s10 + $0x1330] sm:$0xff]  ;;  %v1028_v45 = vld [vmem:[%s3483_s10 + $0x12f8] sm:$0xff] }
 0x241   : > { %2502 = vmatprep.subr.mxu1 %v836_v49  ;;  %v2052_v63 = vpop.f32.mrf.mxu1  ;;  %2426 = vmatpush2.msra.mxu0 %v579_v51  ;;  %v1291_v44 = vld [vmem:[%s3483_s10 + $0x1b30] sm:$0xff]  ;;  %v1284_v46 = vld [vmem:[%s3483_s10 + $0x1af8] sm:$0xff] }
 0x242   : > { %2503 = vmatpush2.msra.mxu1 %v835_v52  ;;  %v2679_v3 = vadd.f32 %v2051_v58, %v391_v53  ;;  %v2053_v4 = vadd.f32 %v2052_v63, %v1976_v59  ;;  %2427 = vmatprep.subr.mxu0 %v572_v56  ;;  %v1027_v47 = vld [vmem:[%s3483_s10 + $0x12f0] sm:$0xff]  ;;  %v1020_v49 = vld [vmem:[%s3483_s10 + $0x12b8] sm:$0xff] }
 0x243   : > { %2504 = vmatprep.subr.mxu1 %v828_v57  ;;  %v1979_v7 = vpop.f32.mrf.mxu0  ;;  %2428 = vmatpush2.msra.mxu0 %v571_v60  ;;  %v1283_v48 = vld [vmem:[%s3483_s10 + $0x1af0] sm:$0xff]  ;;  %v1276_v50 = vld [vmem:[%s3483_s10 + $0x1ab8] sm:$0xff] }
 0x244   : > { %2505 = vmatpush2.msra.mxu1 %v827_v61  ;;  %2695 = vst [vmem:[#allocation2 + $0x58] sm:$0xff] %v2679_v3  ;;  %v2680_v11 = vadd.f32 %v2053_v4, %v392_v62  ;;  %v1980_v12 = vadd.f32 %v1979_v7, %v1903_v0  ;;  %2429 = vmatprep.subr.mxu0 %v564_v1  ;;  %v1019_v51 = vld [vmem:[%s3483_s10 + $0x12b0] sm:$0xff]  ;;  %v1012_v53 = vld [vmem:[%s3483_s10 + $0x1278] sm:$0xff] }
 0x245   : > { %2506 = vmatprep.subr.mxu1 %v820_v2  ;;  %v1981_v14 = vpop.f32.mrf.mxu0  ;;  %2430 = vmatpush2.msra.mxu0 %v563_v5  ;;  %v1275_v52 = vld [vmem:[%s3483_s10 + $0x1ab0] sm:$0xff]  ;;  %v1268_v54 = vld [vmem:[%s3483_s10 + $0x1a78] sm:$0xff] }
 0x246   : > { %2507 = vmatpush2.msra.mxu1 %v819_v6  ;;  %2696 = vst [vmem:[#allocation2 + $0x18] sm:$0xff] %v2680_v11  ;;  %v1982_v16 = vadd.f32 %v1981_v14, %v1905_v8  ;;  %2431 = vmatprep.subr.mxu0 %v556_v9  ;;  %v2056_v18 = vpop.f32.mrf.mxu1  ;;  %v1011_v55 = vld [vmem:[%s3483_s10 + $0x1270] sm:$0xff]  ;;  %v1004_v57 = vld [vmem:[%s3483_s10 + $0x1238] sm:$0xff] }
 0x247   : > { %2508 = vmatprep.subr.mxu1 %v812_v10  ;;  %2432 = vmatpush2.msra.mxu0 %v555_v13  ;;  %v2057_v22 = vadd.f32 %v2056_v18, %v1980_v12  ;;  %v1267_v56 = vld [vmem:[%s3483_s10 + $0x1a70] sm:$0xff]  ;;  %v1260_v58 = vld [vmem:[%s3483_s10 + $0x1a38] sm:$0xff] }
 0x248   : > { %2433 = vmatprep.mubr.f32.mxu0 %v3126_v19  ;;  %2509 = vmatpush2.msra.mxu1 %v811_v15  ;;  %v2058_v27 = vpop.f32.mrf.mxu1  ;;  %v1003_v59 = vld [vmem:[%s3483_s10 + $0x1230] sm:$0xff]  ;;  %v996_v61 = vld [vmem:[%s3483_s10 + $0x11f8] sm:$0xff] }
 0x249   : > { %2510 = vmatprep.mubr.f32.mxu1 %v3127_v23  ;;  %2434 = vmatmul.mubr.f32.vlgmr.msra.gmra.mxu0 %v3128_v28  ;;  %v2687_v32 = vadd.f32 %v2057_v22, %v399_v17  ;;  %v2059_v33 = vadd.f32 %v2058_v27, %v1982_v16  ;;  %v1259_v60 = vld [vmem:[%s3483_s10 + $0x1a30] sm:$0xff]  ;;  %v1252_v62 = vld [vmem:[%s3483_s10 + $0x19f8] sm:$0xff] }
 0x24a   : > { %2511 = vmatmul.mubr.f32.vlgmr.msra.gmra.mxu1 %v3129_v29  ;;  %2523 = vmatprep.subr.mxu0 %v1060_v20  ;;  %v995_v63 = vld [vmem:[%s3483_s10 + $0x11f0] sm:$0xff]  ;;  %v988_v1 = vld [vmem:[%s3483_s10 + $0x11b8] sm:$0xff] }
 0x24b   : > { %2600 = vmatprep.subr.mxu1 %v1316_v21  ;;  %2524 = vmatpush1.msra.mxu0 %v1059_v24  ;;  %2703 = vst [vmem:[#allocation2 + $0x10] sm:$0xff] %v2687_v32  ;;  %v2688_v38 = vadd.f32 %v2059_v33, %v400_v26  ;;  %v1251_v0 = vld [vmem:[%s3483_s10 + $0x19f0] sm:$0xff]  ;;  %v1244_v2 = vld [vmem:[%s3483_s10 + $0x19b8] sm:$0xff] }
 0x24c   : > { %2601 = vmatpush1.msra.mxu1 %v1315_v25  ;;  %2525 = vmatprep.subr.mxu0 %v1052_v30  ;;  %v987_v3 = vld [vmem:[%s3483_s10 + $0x11b0] sm:$0xff]  ;;  %v980_v5 = vld [vmem:[%s3483_s10 + $0x1178] sm:$0xff] }
 0x24d   : > { %2602 = vmatprep.subr.mxu1 %v1308_v31  ;;  %2526 = vmatpush1.msra.mxu0 %v1051_v34  ;;  %2704 = vst [vmem:[#allocation2 + $0x38] sm:$0xff] %v2688_v38  ;;  %v1243_v4 = vld [vmem:[%s3483_s10 + $0x19b0] sm:$0xff]  ;;  %v1236_v6 = vld [vmem:[%s3483_s10 + $0x1978] sm:$0xff] }
 0x24e   : > { %2603 = vmatpush1.msra.mxu1 %v1307_v35  ;;  %2527 = vmatprep.subr.mxu0 %v1044_v36  ;;  %v979_v7 = vld [vmem:[%s3483_s10 + $0x1170] sm:$0xff]  ;;  %v972_v9 = vld [vmem:[%s3483_s10 + $0x1138] sm:$0xff] }
 0x24f   : > { %2604 = vmatprep.subr.mxu1 %v1300_v37  ;;  %2528 = vmatpush1.msra.mxu0 %v1043_v39  ;;  %v1235_v8 = vld [vmem:[%s3483_s10 + $0x1970] sm:$0xff]  ;;  %v1228_v10 = vld [vmem:[%s3483_s10 + $0x1938] sm:$0xff] }
 0x250   : > { %2605 = vmatpush1.msra.mxu1 %v1299_v40  ;;  %2529 = vmatprep.subr.mxu0 %v1036_v41  ;;  %v971_v11 = vld [vmem:[%s3483_s10 + $0x1130] sm:$0xff]  ;;  %v964_v13 = vld [vmem:[%s3483_s10 + $0x10f8] sm:$0xff] }
 0x251   : > { %2606 = vmatprep.subr.mxu1 %v1292_v42  ;;  %2530 = vmatpush1.msra.mxu0 %v1035_v43  ;;  %v1227_v12 = vld [vmem:[%s3483_s10 + $0x1930] sm:$0xff]  ;;  %v1220_v14 = vld [vmem:[%s3483_s10 + $0x18f8] sm:$0xff] }
 0x252   : > { %2607 = vmatpush1.msra.mxu1 %v1291_v44  ;;  %2531 = vmatprep.subr.mxu0 %v1028_v45  ;;  %v963_v15 = vld [vmem:[%s3483_s10 + $0x10f0] sm:$0xff]  ;;  %v956_v17 = vld [vmem:[%s3483_s10 + $0x10b8] sm:$0xff] }
 0x253   : > { %2608 = vmatprep.subr.mxu1 %v1284_v46  ;;  %2532 = vmatpush1.msra.mxu0 %v1027_v47  ;;  %v1219_v16 = vld [vmem:[%s3483_s10 + $0x18f0] sm:$0xff]  ;;  %v1212_v18 = vld [vmem:[%s3483_s10 + $0x18b8] sm:$0xff] }
 0x254   : > { %2609 = vmatpush1.msra.mxu1 %v1283_v48  ;;  %2533 = vmatprep.subr.mxu0 %v1020_v49  ;;  %v955_v19 = vld [vmem:[%s3483_s10 + $0x10b0] sm:$0xff]  ;;  %v948_v21 = vld [vmem:[%s3483_s10 + $0x1078] sm:$0xff] }
 0x255   : > { %2610 = vmatprep.subr.mxu1 %v1276_v50  ;;  %2534 = vmatpush1.msra.mxu0 %v1019_v51  ;;  %v1211_v20 = vld [vmem:[%s3483_s10 + $0x18b0] sm:$0xff]  ;;  %v1204_v22 = vld [vmem:[%s3483_s10 + $0x1878] sm:$0xff] }
 0x256   : > { %2611 = vmatpush1.msra.mxu1 %v1275_v52  ;;  %2535 = vmatprep.subr.mxu0 %v1012_v53  ;;  %v947_v23 = vld [vmem:[%s3483_s10 + $0x1070] sm:$0xff]  ;;  %v940_v25 = vld [vmem:[%s3483_s10 + $0x1038] sm:$0xff] }
 0x257   : > { %2612 = vmatprep.subr.mxu1 %v1268_v54  ;;  %2536 = vmatpush1.msra.mxu0 %v1011_v55  ;;  %v1203_v24 = vld [vmem:[%s3483_s10 + $0x1870] sm:$0xff]  ;;  %v1196_v26 = vld [vmem:[%s3483_s10 + $0x1838] sm:$0xff] }
 0x258   : > { %2613 = vmatpush1.msra.mxu1 %v1267_v56  ;;  %2537 = vmatprep.subr.mxu0 %v1004_v57  ;;  %v939_v27 = vld [vmem:[%s3483_s10 + $0x1030] sm:$0xff]  ;;  %v1188_v29 = vld [vmem:[%s3483_s10 + $0x17f8] sm:$0xff] }
 0x259   : > { %2614 = vmatprep.subr.mxu1 %v1260_v58  ;;  %2538 = vmatpush1.msra.mxu0 %v1003_v59  ;;  %v1195_v28 = vld [vmem:[%s3483_s10 + $0x1830] sm:$0xff]  ;;  %v1444_v30 = vld [vmem:[%s3483_s10 + $0x1ff8] sm:$0xff] }
 0x25a   : > { %2615 = vmatpush1.msra.mxu1 %v1259_v60  ;;  %2539 = vmatprep.subr.mxu0 %v996_v61  ;;  %v1187_v31 = vld [vmem:[%s3483_s10 + $0x17f0] sm:$0xff]  ;;  %v1180_v33 = vld [vmem:[%s3483_s10 + $0x17b8] sm:$0xff] }
 0x25b   : > { %2616 = vmatprep.subr.mxu1 %v1252_v62  ;;  %2540 = vmatpush1.msra.mxu0 %v995_v63  ;;  %v1443_v32 = vld [vmem:[%s3483_s10 + $0x1ff0] sm:$0xff]  ;;  %v1436_v34 = vld [vmem:[%s3483_s10 + $0x1fb8] sm:$0xff] }
 0x25c   : > { %2617 = vmatpush1.msra.mxu1 %v1251_v0  ;;  %2541 = vmatprep.subr.mxu0 %v988_v1  ;;  %v1179_v35 = vld [vmem:[%s3483_s10 + $0x17b0] sm:$0xff]  ;;  %v1172_v37 = vld [vmem:[%s3483_s10 + $0x1778] sm:$0xff] }
 0x25d   : > { %2618 = vmatprep.subr.mxu1 %v1244_v2  ;;  %2542 = vmatpush1.msra.mxu0 %v987_v3  ;;  %v1435_v36 = vld [vmem:[%s3483_s10 + $0x1fb0] sm:$0xff]  ;;  %v1428_v38 = vld [vmem:[%s3483_s10 + $0x1f78] sm:$0xff] }
 0x25e   : > { %2619 = vmatpush1.msra.mxu1 %v1243_v4  ;;  %2543 = vmatprep.subr.mxu0 %v980_v5  ;;  %v1171_v39 = vld [vmem:[%s3483_s10 + $0x1770] sm:$0xff]  ;;  %v1164_v41 = vld [vmem:[%s3483_s10 + $0x1738] sm:$0xff] }
 0x25f   : > { %2620 = vmatprep.subr.mxu1 %v1236_v6  ;;  %2544 = vmatpush1.msra.mxu0 %v979_v7  ;;  %v1427_v40 = vld [vmem:[%s3483_s10 + $0x1f70] sm:$0xff]  ;;  %v1420_v42 = vld [vmem:[%s3483_s10 + $0x1f38] sm:$0xff] }
 0x260   : > { %2621 = vmatpush1.msra.mxu1 %v1235_v8  ;;  %2545 = vmatprep.subr.mxu0 %v972_v9  ;;  %v1163_v43 = vld [vmem:[%s3483_s10 + $0x1730] sm:$0xff]  ;;  %v1156_v45 = vld [vmem:[%s3483_s10 + $0x16f8] sm:$0xff] }
 0x261   : > { %2622 = vmatprep.subr.mxu1 %v1228_v10  ;;  %2546 = vmatpush1.msra.mxu0 %v971_v11  ;;  %v1419_v44 = vld [vmem:[%s3483_s10 + $0x1f30] sm:$0xff]  ;;  %v1412_v46 = vld [vmem:[%s3483_s10 + $0x1ef8] sm:$0xff] }
 0x262   : > { %2623 = vmatpush1.msra.mxu1 %v1227_v12  ;;  %2547 = vmatprep.subr.mxu0 %v964_v13  ;;  %v1155_v47 = vld [vmem:[%s3483_s10 + $0x16f0] sm:$0xff]  ;;  %v1148_v49 = vld [vmem:[%s3483_s10 + $0x16b8] sm:$0xff] }
 0x263   : > { %2624 = vmatprep.subr.mxu1 %v1220_v14  ;;  %2548 = vmatpush1.msra.mxu0 %v963_v15  ;;  %v1411_v48 = vld [vmem:[%s3483_s10 + $0x1ef0] sm:$0xff]  ;;  %v1404_v50 = vld [vmem:[%s3483_s10 + $0x1eb8] sm:$0xff] }
 0x264   : > { %2625 = vmatpush1.msra.mxu1 %v1219_v16  ;;  %2549 = vmatprep.subr.mxu0 %v956_v17  ;;  %v1147_v51 = vld [vmem:[%s3483_s10 + $0x16b0] sm:$0xff]  ;;  %v1140_v53 = vld [vmem:[%s3483_s10 + $0x1678] sm:$0xff]  ;;  %v3130_v17 = vld [vmem:[%s3481_s5 + $0x48] sm:$0xff] }
 0x265   : > { %2626 = vmatprep.subr.mxu1 %v1212_v18  ;;  %2550 = vmatpush1.msra.mxu0 %v955_v19  ;;  %v1403_v52 = vld [vmem:[%s3483_s10 + $0x1eb0] sm:$0xff]  ;;  %v1396_v54 = vld [vmem:[%s3483_s10 + $0x1e78] sm:$0xff] }
 0x266   : > { %2627 = vmatpush1.msra.mxu1 %v1211_v20  ;;  %2551 = vmatprep.subr.mxu0 %v948_v21  ;;  %v1139_v55 = vld [vmem:[%s3483_s10 + $0x1670] sm:$0xff]  ;;  %v1132_v57 = vld [vmem:[%s3483_s10 + $0x1638] sm:$0xff] }
 0x267   : > { %2628 = vmatprep.subr.mxu1 %v1204_v22  ;;  %2552 = vmatpush1.msra.mxu0 %v947_v23  ;;  %v1395_v56 = vld [vmem:[%s3483_s10 + $0x1e70] sm:$0xff]  ;;  %v1388_v58 = vld [vmem:[%s3483_s10 + $0x1e38] sm:$0xff]  ;;  %v3132_v23 = vld [vmem:[%s3481_s5 + $0x40] sm:$0xff] }
 0x268   : > { %2629 = vmatpush1.msra.mxu1 %v1203_v24  ;;  %2553 = vmatprep.subr.mxu0 %v940_v25  ;;  %v1131_v59 = vld [vmem:[%s3483_s10 + $0x1630] sm:$0xff]  ;;  %v1124_v61 = vld [vmem:[%s3483_s10 + $0x15f8] sm:$0xff] }
 0x269   : > { %2630 = vmatprep.subr.mxu1 %v1196_v26  ;;  %2554 = vmatpush1.msra.mxu0 %v939_v27  ;;  %v1387_v60 = vld [vmem:[%s3483_s10 + $0x1e30] sm:$0xff]  ;;  %v1380_v62 = vld [vmem:[%s3483_s10 + $0x1df8] sm:$0xff] }
 0x26a   : > { %2631 = vmatpush1.msra.mxu1 %v1195_v28  ;;  %2555 = vmatprep.subr.mxu0 %v1188_v29  ;;  %v1123_v63 = vld [vmem:[%s3483_s10 + $0x15f0] sm:$0xff]  ;;  %v1116_v1 = vld [vmem:[%s3483_s10 + $0x15b8] sm:$0xff] }
 0x26b   : > { %2632 = vmatprep.subr.mxu1 %v1444_v30  ;;  %2556 = vmatpush2.msra.mxu0 %v1187_v31  ;;  %v1379_v0 = vld [vmem:[%s3483_s10 + $0x1df0] sm:$0xff]  ;;  %v1372_v2 = vld [vmem:[%s3483_s10 + $0x1db8] sm:$0xff] }
 0x26c   : > { %2633 = vmatpush2.msra.mxu1 %v1443_v32  ;;  %2557 = vmatprep.subr.mxu0 %v1180_v33  ;;  %v1115_v3 = vld [vmem:[%s3483_s10 + $0x15b0] sm:$0xff]  ;;  %v1108_v5 = vld [vmem:[%s3483_s10 + $0x1578] sm:$0xff]  ;;  %v3134_v33 = vld [vmem:[%s3481_s5 + $0x28] sm:$0xff] }
 0x26d   : > { %2634 = vmatprep.subr.mxu1 %v1436_v34  ;;  %2558 = vmatpush2.msra.mxu0 %v1179_v35  ;;  %v1371_v4 = vld [vmem:[%s3483_s10 + $0x1db0] sm:$0xff]  ;;  %v1364_v6 = vld [vmem:[%s3483_s10 + $0x1d78] sm:$0xff]  ;;  %v3136_v35 = vld [vmem:[%s3481_s5 + $0x20] sm:$0xff] }
 0x26e   : > { %2635 = vmatpush2.msra.mxu1 %v1435_v36  ;;  %2559 = vmatprep.subr.mxu0 %v1172_v37  ;;  %v1107_v7 = vld [vmem:[%s3483_s10 + $0x1570] sm:$0xff]  ;;  %v1100_v9 = vld [vmem:[%s3483_s10 + $0x1538] sm:$0xff]  ;;  %v3138_v37 = vld [vmem:[%s3481_s5 + $0x68] sm:$0xff] }
 0x26f   : > { %2636 = vmatprep.subr.mxu1 %v1428_v38  ;;  %2560 = vmatpush2.msra.mxu0 %v1171_v39  ;;  %v1363_v8 = vld [vmem:[%s3483_s10 + $0x1d70] sm:$0xff]  ;;  %v1356_v10 = vld [vmem:[%s3483_s10 + $0x1d38] sm:$0xff]  ;;  %v3140_v39 = vld [vmem:[%s3481_s5 + $0x60] sm:$0xff] }
 0x270   : > { %2637 = vmatpush2.msra.mxu1 %v1427_v40  ;;  %2561 = vmatprep.subr.mxu0 %v1164_v41  ;;  %v1099_v11 = vld [vmem:[%s3483_s10 + $0x1530] sm:$0xff]  ;;  %v1092_v13 = vld [vmem:[%s3483_s10 + $0x14f8] sm:$0xff] }
 0x271   : > { %2638 = vmatprep.subr.mxu1 %v1420_v42  ;;  %2562 = vmatpush2.msra.mxu0 %v1163_v43  ;;  %v1355_v12 = vld [vmem:[%s3483_s10 + $0x1d30] sm:$0xff]  ;;  %v1348_v14 = vld [vmem:[%s3483_s10 + $0x1cf8] sm:$0xff] }
 0x272   : > { %2639 = vmatpush2.msra.mxu1 %v1419_v44  ;;  %2563 = vmatprep.subr.mxu0 %v1156_v45  ;;  %v1091_v15 = vld [vmem:[%s3483_s10 + $0x14f0] sm:$0xff]  ;;  %v3131_v18 = vld [vmem:[%s3481_s5 + $0x58] sm:$0xff] }
 0x273   : > { %2640 = vmatprep.subr.mxu1 %v1412_v46  ;;  %2564 = vmatpush2.msra.mxu0 %v1155_v47  ;;  %v1347_v16 = vld [vmem:[%s3483_s10 + $0x1cf0] sm:$0xff]  ;;  %v1084_v19 = vld [vmem:[%s3483_s10 + $0x14b8] sm:$0xff] }
 0x274   : > { %2641 = vmatpush2.msra.mxu1 %v1411_v48  ;;  %2565 = vmatprep.subr.mxu0 %v1148_v49  ;;  %v1340_v20 = vld [vmem:[%s3483_s10 + $0x1cb8] sm:$0xff]  ;;  %v1083_v21 = vld [vmem:[%s3483_s10 + $0x14b0] sm:$0xff] }
 0x275   : > { %2642 = vmatprep.subr.mxu1 %v1404_v50  ;;  %2566 = vmatpush2.msra.mxu0 %v1147_v51  ;;  %v1339_v22 = vld [vmem:[%s3483_s10 + $0x1cb0] sm:$0xff]  ;;  %v1076_v25 = vld [vmem:[%s3483_s10 + $0x1478] sm:$0xff] }
 0x276   : > { %2643 = vmatpush2.msra.mxu1 %v1403_v52  ;;  %2567 = vmatprep.subr.mxu0 %v1140_v53  ;;  %v3133_v24 = vld [vmem:[%s3481_s5 + $0x50] sm:$0xff]  ;;  %v1332_v26 = vld [vmem:[%s3483_s10 + $0x1c78] sm:$0xff] }
 0x277   : > { %2644 = vmatprep.subr.mxu1 %v1396_v54  ;;  %2568 = vmatpush2.msra.mxu0 %v1139_v55  ;;  %v1075_v27 = vld [vmem:[%s3483_s10 + $0x1470] sm:$0xff]  ;;  %v1068_v29 = vld [vmem:[%s3483_s10 + $0x1438] sm:$0xff] }
 0x278   : > { %2645 = vmatpush2.msra.mxu1 %v1395_v56  ;;  %2569 = vmatprep.subr.mxu0 %v1132_v57  ;;  %v1331_v28 = vld [vmem:[%s3483_s10 + $0x1c70] sm:$0xff]  ;;  %v1324_v30 = vld [vmem:[%s3483_s10 + $0x1c38] sm:$0xff] }
 0x279   : > { %2646 = vmatprep.subr.mxu1 %v1388_v58  ;;  %2570 = vmatpush2.msra.mxu0 %v1131_v59  ;;  %v1067_v31 = vld [vmem:[%s3483_s10 + $0x1430] sm:$0xff]  ;;  %v3135_v34 = vld [vmem:[%s3481_s5 + $0x38] sm:$0xff]  ;;  %v394_v58 = vld [vmem:[#allocation2 + $0x68] sm:$0xff] }
 0x27a   : > { %2647 = vmatpush2.msra.mxu1 %v1387_v60  ;;  %2571 = vmatprep.subr.mxu0 %v1124_v61  ;;  %v1323_v32 = vld [vmem:[%s3483_s10 + $0x1c30] sm:$0xff]  ;;  %v3139_v38 = vld [vmem:[%s3481_s5 + $0x78] sm:$0xff] }
 0x27b   : > { %2648 = vmatprep.subr.mxu1 %v1380_v62  ;;  %2572 = vmatpush2.msra.mxu0 %v1123_v63  ;;  %v3137_v36 = vld [vmem:[%s3481_s5 + $0x30] sm:$0xff] }
 0x27c   : > { %2649 = vmatpush2.msra.mxu1 %v1379_v0  ;;  %2573 = vmatprep.subr.mxu0 %v1116_v1  ;;  %v3141_v40 = vld [vmem:[%s3481_s5 + $0x70] sm:$0xff] }
 0x27d   : > { %2650 = vmatprep.subr.mxu1 %v1372_v2  ;;  %2574 = vmatpush2.msra.mxu0 %v1115_v3  ;;  %v393_v53 = vld [vmem:[#allocation2 + $0x50] sm:$0xff] }
 0x27e   : > { %2651 = vmatpush2.msra.mxu1 %v1371_v4  ;;  %2575 = vmatprep.subr.mxu0 %v1108_v5  ;;  %v401_v5 = vld [vmem:[#allocation2 + $0x60] sm:$0xff] }
 0x27f   : > { %2652 = vmatprep.subr.mxu1 %v1364_v6  ;;  %2576 = vmatpush2.msra.mxu0 %v1107_v7 }
 0x280   : > { %2653 = vmatpush2.msra.mxu1 %v1363_v8  ;;  %2577 = vmatprep.subr.mxu0 %v1100_v9  ;;  %v402_v8 = vld [vmem:[#allocation2 + $0x70] sm:$0xff] }
 0x281   : > { %2654 = vmatprep.subr.mxu1 %v1356_v10  ;;  %2578 = vmatpush2.msra.mxu0 %v1099_v11  ;;  %v2127_v41 = vpop.f32.mrf.mxu0 }
 0x282   : > { %2655 = vmatpush2.msra.mxu1 %v1355_v12  ;;  %2579 = vmatprep.subr.mxu0 %v1092_v13  ;;  %v2204_v42 = vpop.f32.mrf.mxu1 }
 0x283   : > { %2656 = vmatprep.subr.mxu1 %v1348_v14  ;;  %2439 = vmatprep.mubr.f32.mxu0 %v3130_v17  ;;  %v2129_v43 = vpop.f32.mrf.mxu0  ;;  %v2205_v48 = vadd.f32 %v2204_v42, %v2127_v41 }
 0x284   : > { %2516 = vmatprep.mubr.f32.mxu1 %v3131_v18  ;;  %2580 = vmatpush2.msra.mxu0 %v1091_v15  ;;  %v2206_v44 = vpop.f32.mrf.mxu1 }
 0x285   : > { %2657 = vmatpush2.msra.mxu1 %v1347_v16  ;;  %2440 = vmatmul.mubr.f32.gmra.mxu0 %v3132_v23  ;;  %v2207_v51 = vadd.f32 %v2206_v44, %v2129_v43  ;;  %v404_v44 = vld [vmem:[#allocation2 + $0x28] sm:$0xff] }
 0x286   : > { %2517 = vmatmul.mubr.f32.gmra.mxu1 %v3133_v24  ;;  %2581 = vmatprep.subr.mxu0 %v1084_v19 }
 0x287   : > { %2658 = vmatprep.subr.mxu1 %v1340_v20  ;;  %2582 = vmatpush2.msra.mxu0 %v1083_v21 }
 0x288   : > { %2659 = vmatpush2.msra.mxu1 %v1339_v22  ;;  %2583 = vmatprep.subr.mxu0 %v1076_v25 }
 0x289   : > { %2660 = vmatprep.subr.mxu1 %v1332_v26  ;;  %2584 = vmatpush2.msra.mxu0 %v1075_v27  ;;  %v395_v26 = vld [vmem:[#allocation2 + $0x8] sm:$0xff] }
 0x28a   : > { %2661 = vmatpush2.msra.mxu1 %v1331_v28  ;;  %2585 = vmatprep.subr.mxu0 %v1068_v29 }
 0x28b   : > { %2662 = vmatprep.subr.mxu1 %v1324_v30  ;;  %2586 = vmatpush2.msra.mxu0 %v1067_v31 }
 0x28c   : > { %2587 = vmatprep.mubr.f32.mxu0 %v3134_v33  ;;  %2663 = vmatpush2.msra.mxu1 %v1323_v32  ;;  %v396_v32 = vld [vmem:[#allocation2 + $0x48] sm:$0xff] }
 0x28d   : > { %2664 = vmatprep.mubr.f32.mxu1 %v3135_v34  ;;  %2588 = vmatmul.mubr.f32.vlgmr.msra.gmra.mxu0 %v3136_v35 }
 0x28e   : > { %2665 = vmatmul.mubr.f32.vlgmr.msra.gmra.mxu1 %v3137_v36  ;;  %2593 = vmatprep.mubr.f32.mxu0 %v3138_v37 }
 0x28f   : > { %2670 = vmatprep.mubr.f32.mxu1 %v3139_v38 }
 0x291   : > { %2594 = vmatmul.mubr.f32.gmra.mxu0 %v3140_v39  ;;  %v403_v39 = vld [vmem:[#allocation2 + $0x78] sm:$0xff] }
 0x292   : > { %2671 = vmatmul.mubr.f32.gmra.mxu1 %v3141_v40 }
 0x2be   : > { %v2133_v45 = vpop.f32.mrf.mxu0 }
 0x2bf   : > { %v2210_v46 = vpop.f32.mrf.mxu1 }
 0x2c0   : > { %v2135_v47 = vpop.f32.mrf.mxu0  ;;  %v2211_v60 = vadd.f32 %v2210_v46, %v2133_v45 }
 0x2c1   : > { %v2212_v49 = vpop.f32.mrf.mxu1 }
 0x2c2   : > { %v2213_v0 = vadd.f32 %v2212_v49, %v2135_v47 }
 0x2c5   : > { %v2281_v50 = vpop.f32.mrf.mxu0 }
 0x2c6   : > { %v2282_v52 = vadd.f32 %v2281_v50, %v2205_v48 }
 0x2c7   : > { %v2358_v54 = vpop.f32.mrf.mxu1  ;;  %v2283_v55 = vpop.f32.mrf.mxu0 }
 0x2c8   : > { %v2359_v56 = vadd.f32 %v2358_v54, %v2282_v52  ;;  %v2284_v57 = vadd.f32 %v2283_v55, %v2207_v51 }
 0x2c9   : > { %v2360_v59 = vpop.f32.mrf.mxu1 }
 0x2ca   : > { %v2681_v61 = vadd.f32 %v2359_v56, %v393_v53  ;;  %v2361_v62 = vadd.f32 %v2360_v59, %v2284_v57 }
 0x2cb   : > { %v2287_v63 = vpop.f32.mrf.mxu0 }
 0x2cc   : > { %2697 = vst [vmem:[#allocation2 + $0x50] sm:$0xff] %v2681_v61  ;;  %v2682_v1 = vadd.f32 %v2361_v62, %v394_v58  ;;  %v2288_v2 = vadd.f32 %v2287_v63, %v2211_v60 }
 0x2cd   : > { %v2289_v3 = vpop.f32.mrf.mxu0 }
 0x2ce   : > { %2698 = vst [vmem:[#allocation2 + $0x68] sm:$0xff] %v2682_v1  ;;  %v2290_v4 = vadd.f32 %v2289_v3, %v2213_v0  ;;  %v2364_v6 = vpop.f32.mrf.mxu1 }
 0x2cf   : > { %v2365_v7 = vadd.f32 %v2364_v6, %v2288_v2 }
 0x2d0   : > { %v2366_v9 = vpop.f32.mrf.mxu1 }
 0x2d1   : > { %v2689_v10 = vadd.f32 %v2365_v7, %v401_v5  ;;  %v2367_v11 = vadd.f32 %v2366_v9, %v2290_v4 }
 0x2d3   : > { %2705 = vst [vmem:[#allocation2 + $0x60] sm:$0xff] %v2689_v10  ;;  %v2690_v12 = vadd.f32 %v2367_v11, %v402_v8 }
 0x2d5   : > { %2706 = vst [vmem:[#allocation2 + $0x70] sm:$0xff] %v2690_v12 }
 0x309   : > { %v2435_v13 = vpop.f32.mrf.mxu0 }
 0x30a   : > { %v2512_v14 = vpop.f32.mrf.mxu1 }
 0x30b   : > { %v2437_v15 = vpop.f32.mrf.mxu0  ;;  %v2513_v21 = vadd.f32 %v2512_v14, %v2435_v13 }
 0x30c   : > { %v2514_v16 = vpop.f32.mrf.mxu1 }
 0x30d   : > { %v2515_v24 = vadd.f32 %v2514_v16, %v2437_v15 }
 0x345   : > { %v2441_v17 = vpop.f32.mrf.mxu0 }
 0x346   : > { %v2518_v18 = vpop.f32.mrf.mxu1 }
 0x347   : > { %v2443_v19 = vpop.f32.mrf.mxu0  ;;  %v2519_v29 = vadd.f32 %v2518_v18, %v2441_v17 }
 0x348   : > { %v2520_v20 = vpop.f32.mrf.mxu1 }
 0x349   : > { %v2521_v35 = vadd.f32 %v2520_v20, %v2443_v19 }
 0x34d   : > { %v2589_v22 = vpop.f32.mrf.mxu0 }
 0x34e   : > { %v2666_v23 = vpop.f32.mrf.mxu1  ;;  %v2590_v25 = vadd.f32 %v2589_v22, %v2513_v21 }
 0x34f   : > { %v2591_v27 = vpop.f32.mrf.mxu0 }
 0x350   : > { %v2668_v28 = vpop.f32.mrf.mxu1  ;;  %v2667_v30 = vadd.f32 %v2666_v23, %v2590_v25  ;;  %v2592_v31 = vadd.f32 %v2591_v27, %v2515_v24 }
 0x351   : > { %v2595_v33 = vpop.f32.mrf.mxu0 }
 0x352   : > { %v2672_v34 = vpop.f32.mrf.mxu1  ;;  %v2683_v36 = vadd.f32 %v2667_v30, %v395_v26  ;;  %v2669_v37 = vadd.f32 %v2668_v28, %v2592_v31  ;;  %v2596_v38 = vadd.f32 %v2595_v33, %v2519_v29 }
 0x353   : > { %v2597_v40 = vpop.f32.mrf.mxu0 }
 0x354   : > { %2699 = vst [vmem:[#allocation2 + $0x8] sm:$0xff] %v2683_v36  ;;  %v2684_v41 = vadd.f32 %v2669_v37, %v396_v32  ;;  %v2673_v42 = vadd.f32 %v2672_v34, %v2596_v38  ;;  %v2598_v43 = vadd.f32 %v2597_v40, %v2521_v35  ;;  %v2674_v45 = vpop.f32.mrf.mxu1 }
 0x356   : > { %2700 = vst [vmem:[#allocation2 + $0x48] sm:$0xff] %v2684_v41  ;;  %v2691_v46 = vadd.f32 %v2673_v42, %v403_v39  ;;  %v2675_v47 = vadd.f32 %v2674_v45, %v2598_v43  ;;  %2712 = sbr.rel (%p2982_p12) target bundleno = 874 (0x36a), region = 90 }
 0x358   : > { %2707 = vst [vmem:[#allocation2 + $0x78] sm:$0xff] %v2691_v46  ;;  %v2692_v48 = vadd.f32 %v2675_v47, %v404_v44 }
 0x35a   : > { %2708 = vst [vmem:[#allocation2 + $0x28] sm:$0xff] %v2692_v48 }
 0x35b   : > { %v2713_v49 = vld [vmem:[#allocation2 + $0x30] sm:$0xff]  ;;  %v2729_v50 = vld [vmem:[%s3490_s30] sm:$0xff]  ;;  %v2730_v53 = vld [vmem:[%s3490_s30 + $0x8] sm:$0xff] }
 0x35c   : > { %v2714_v51 = vld [vmem:[#allocation2] sm:$0xff]  ;;  %v2745_v52 = vadd.f32 %v2729_v50, %v2713_v49  ;;  %v2715_v54 = vld [vmem:[#allocation2 + $0x58] sm:$0xff]  ;;  %v2731_v55 = vld [vmem:[%s3490_s30 + $0x10] sm:$0xff] }
 0x35d   : > { %v2746_v56 = vadd.f32 %v2730_v53, %v2714_v51  ;;  %v2747_v57 = vadd.f32 %v2731_v55, %v2715_v54  ;;  %v2716_v58 = vld [vmem:[#allocation2 + $0x18] sm:$0xff]  ;;  %v2717_v60 = vld [vmem:[#allocation2 + $0x50] sm:$0xff]  ;;  %v2733_v62 = vld [vmem:[%s3490_s30 + $0x20] sm:$0xff] }
 0x35e   : > { %v2732_v59 = vld [vmem:[%s3490_s30 + $0x18] sm:$0xff]  ;;  %2761 = vst [vmem:[%s3492_s18] sm:$0xff] %v2745_v52  ;;  %v2718_v63 = vld [vmem:[#allocation2 + $0x68] sm:$0xff]  ;;  %v2749_v1 = vadd.f32 %v2733_v62, %v2717_v60  ;;  %v2735_v4 = vld [vmem:[%s3490_s30 + $0x30] sm:$0xff] }
 0x35f   : > { %v2748_v61 = vadd.f32 %v2732_v59, %v2716_v58  ;;  %v2734_v0 = vld [vmem:[%s3490_s30 + $0x28] sm:$0xff]  ;;  %2762 = vst [vmem:[%s3492_s18 + $0x8] sm:$0xff] %v2746_v56  ;;  %2763 = vst [vmem:[%s3492_s18 + $0x10] sm:$0xff] %v2747_v57  ;;  %v2736_v7 = vld [vmem:[%s3490_s30 + $0x38] sm:$0xff] }
 0x360   : > { %v2750_v2 = vadd.f32 %v2734_v0, %v2718_v63  ;;  %v2719_v3 = vld [vmem:[#allocation2 + $0x8] sm:$0xff]  ;;  %v2721_v8 = vld [vmem:[#allocation2 + $0x40] sm:$0xff]  ;;  %2765 = vst [vmem:[%s3492_s18 + $0x20] sm:$0xff] %v2749_v1  ;;  %v2723_v14 = vld [vmem:[#allocation2 + $0x10] sm:$0xff] }
 0x361   : > { %v2720_v5 = vld [vmem:[#allocation2 + $0x48] sm:$0xff]  ;;  %2764 = vst [vmem:[%s3492_s18 + $0x18] sm:$0xff] %v2748_v61  ;;  %v2751_v6 = vadd.f32 %v2735_v4, %v2719_v3  ;;  %v2737_v9 = vld [vmem:[%s3490_s30 + $0x40] sm:$0xff]  ;;  %v2739_v16 = vld [vmem:[%s3490_s30 + $0x50] sm:$0xff] }
 0x362   : > { %2766 = vst [vmem:[%s3492_s18 + $0x28] sm:$0xff] %v2750_v2  ;;  %v2752_v10 = vadd.f32 %v2736_v7, %v2720_v5  ;;  %v2753_v11 = vadd.f32 %v2737_v9, %v2721_v8  ;;  %v2722_v12 = vld [vmem:[#allocation2 + $0x20] sm:$0xff]  ;;  %v2738_v13 = vld [vmem:[%s3490_s30 + $0x48] sm:$0xff]  ;;  %v2724_v17 = vld [vmem:[#allocation2 + $0x38] sm:$0xff]  ;;  %v2755_v19 = vadd.f32 %v2739_v16, %v2723_v14 }
 0x363   : > { %2767 = vst [vmem:[%s3492_s18 + $0x30] sm:$0xff] %v2751_v6  ;;  %v2754_v15 = vadd.f32 %v2738_v13, %v2722_v12  ;;  %v2740_v18 = vld [vmem:[%s3490_s30 + $0x58] sm:$0xff]  ;;  %v2725_v21 = vld [vmem:[#allocation2 + $0x60] sm:$0xff]  ;;  %v2726_v23 = vld [vmem:[#allocation2 + $0x70] sm:$0xff] }
 0x364   : > { %2768 = vst [vmem:[%s3492_s18 + $0x38] sm:$0xff] %v2752_v10  ;;  %2769 = vst [vmem:[%s3492_s18 + $0x40] sm:$0xff] %v2753_v11  ;;  %v2756_v20 = vadd.f32 %v2740_v18, %v2724_v17  ;;  %v2741_v22 = vld [vmem:[%s3490_s30 + $0x60] sm:$0xff]  ;;  %v2742_v25 = vld [vmem:[%s3490_s30 + $0x68] sm:$0xff] }
 0x365   : > { %2770 = vst [vmem:[%s3492_s18 + $0x48] sm:$0xff] %v2754_v15  ;;  %v2757_v24 = vadd.f32 %v2741_v22, %v2725_v21  ;;  %v2727_v26 = vld [vmem:[#allocation2 + $0x78] sm:$0xff]  ;;  %v2743_v27 = vld [vmem:[%s3490_s30 + $0x70] sm:$0xff]  ;;  %2771 = vst [vmem:[%s3492_s18 + $0x50] sm:$0xff] %v2755_v19  ;;  %v2758_v28 = vadd.f32 %v2742_v25, %v2726_v23 }
 0x366   : > { %2772 = vst [vmem:[%s3492_s18 + $0x58] sm:$0xff] %v2756_v20  ;;  %v2759_v29 = vadd.f32 %v2743_v27, %v2727_v26  ;;  %v2728_v30 = vld [vmem:[#allocation2 + $0x28] sm:$0xff]  ;;  %v2744_v31 = vld [vmem:[%s3490_s30 + $0x78] sm:$0xff] }
 0x367   : > { %2773 = vst [vmem:[%s3492_s18 + $0x60] sm:$0xff] %v2757_v24  ;;  %v2760_v32 = vadd.f32 %v2744_v31, %v2728_v30  ;;  %2774 = vst [vmem:[%s3492_s18 + $0x68] sm:$0xff] %v2758_v28 }
 0x368   : > { %2775 = vst [vmem:[%s3492_s18 + $0x70] sm:$0xff] %v2759_v29 }
 0x369   : > { %2776 = vst [vmem:[%s3492_s18 + $0x78] sm:$0xff] %v2760_v32 }
 0x36a PF: > { %2783 = sbr.rel (!%p3412_p3) target bundleno = 890 (0x37a), region = 94  ;;  %s2991_s12 = sshll.u32 (%p3412_p3), %s3254_s20, 6  ;;  %v2802_v33 = vld [vmem:[%s3492_s18] sm:$0xff] (%p3412_p3)  ;;  %v2804_v34 = vld [vmem:[%s3492_s18 + $0x8] sm:$0xff] (%p3412_p3)  ;;  %v2806_v35 = vld [vmem:[%s3492_s18 + $0x10] sm:$0xff] (%p3412_p3) }
 0x36b   : > { %s4697_s9 = sld [smem:[#allocation17_spill]] (%p3412_p3)  ;;  %v2808_v36 = vld [vmem:[%s3492_s18 + $0x18] sm:$0xff] (%p3412_p3)  ;;  %v2810_v37 = vld [vmem:[%s3492_s18 + $0x20] sm:$0xff] (%p3412_p3)  ;;  %v2812_v38 = vld [vmem:[%s3492_s18 + $0x28] sm:$0xff] (%p3412_p3) }
 0x36c   : > { %v2814_v39 = vld [vmem:[%s3492_s18 + $0x30] sm:$0xff] (%p3412_p3)  ;;  %v2816_v40 = vld [vmem:[%s3492_s18 + $0x38] sm:$0xff] (%p3412_p3)  ;;  %v2818_v41 = vld [vmem:[%s3492_s18 + $0x40] sm:$0xff] (%p3412_p3) }
 0x36d   : > { %v2820_v42 = vld [vmem:[%s3492_s18 + $0x48] sm:$0xff] (%p3412_p3)  ;;  %v2822_v43 = vld [vmem:[%s3492_s18 + $0x50] sm:$0xff] (%p3412_p3)  ;;  %v2824_v44 = vld [vmem:[%s3492_s18 + $0x58] sm:$0xff] (%p3412_p3) }
 0x36e   : > { %v2826_v45 = vld [vmem:[%s3492_s18 + $0x60] sm:$0xff] (%p3412_p3)  ;;  %v2828_v46 = vld [vmem:[%s3492_s18 + $0x68] sm:$0xff] (%p3412_p3) }
 0x36f   : > { %v2830_v47 = vld [vmem:[%s3492_s18 + $0x70] sm:$0xff] }
 0x370   : > { %v2832_v48 = vld [vmem:[%s3492_s18 + $0x78] sm:$0xff] }
 0x371   : > { %s2789_s25 = scalar_lea.vmem %s4697_s9, %s2991_s12 }
 0x372   : > { %2803 = vst [vmem:[%s2789_s25] sm:$0xff] %v2802_v33  ;;  %2805 = vst [vmem:[%s2789_s25 + $0x8] sm:$0xff] %v2804_v34 }
 0x373   : > { %2807 = vst [vmem:[%s2789_s25 + $0x10] sm:$0xff] %v2806_v35  ;;  %2809 = vst [vmem:[%s2789_s25 + $0x18] sm:$0xff] %v2808_v36 }
 0x374   : > { %2811 = vst [vmem:[%s2789_s25 + $0x20] sm:$0xff] %v2810_v37  ;;  %2813 = vst [vmem:[%s2789_s25 + $0x28] sm:$0xff] %v2812_v38 }
 0x375   : > { %2815 = vst [vmem:[%s2789_s25 + $0x30] sm:$0xff] %v2814_v39  ;;  %2817 = vst [vmem:[%s2789_s25 + $0x38] sm:$0xff] %v2816_v40 }
 0x376   : > { %2819 = vst [vmem:[%s2789_s25 + $0x80] sm:$0xff] %v2818_v41  ;;  %2821 = vst [vmem:[%s2789_s25 + $0x88] sm:$0xff] %v2820_v42 }
 0x377   : > { %2823 = vst [vmem:[%s2789_s25 + $0x90] sm:$0xff] %v2822_v43  ;;  %2825 = vst [vmem:[%s2789_s25 + $0x98] sm:$0xff] %v2824_v44 }
 0x378   : > { %2827 = vst [vmem:[%s2789_s25 + $0xa0] sm:$0xff] %v2826_v45  ;;  %2829 = vst [vmem:[%s2789_s25 + $0xa8] sm:$0xff] %v2828_v46 }
 0x379   : > { %2831 = vst [vmem:[%s2789_s25 + $0xb0] sm:$0xff] %v2830_v47  ;;  %2833 = vst [vmem:[%s2789_s25 + $0xb8] sm:$0xff] %v2832_v48 }
 0x37a PF: > { %s16_s23 = sadd.s32 1, %s3266_s23   ;;  %s4698_s20 = sld [smem:[#allocation15_spill]] }
 0x37b   : > { %p13_p3 = scmp.ge.s32.totalorder %s16_s23, 6   ;;  %s4699_s27 = sld [smem:[#allocation9_spill]] }
 0x37c   : > { %s4700_s16 = sld [smem:[#allocation14_spill]]  ;;  %s4705_s12 = smov %s3226_s13 }
 0x37d   : > { %s4701_s17 = sld [smem:[#allocation10_spill]]  ;;  %s4707_s14 = smov %s3234_s15 }
 0x37e   : > { %s4702_s18 = sld [smem:[#allocation13_spill]]  ;;  %s4709_s19 = smov %s3258_s21 }
 0x37f   : > { %s4703_s4 = sld [smem:[#allocation11_spill]] }
 0x380   : > { %s4704_s11 = sld [smem:[#allocation12_spill]]  ;;  %s4706_s13 = smov %s4698_s20 }
 0x381   : > { %s4708_s15 = smov %s4699_s27  ;;  %s4710_s20 = smov %s3262_s22 }
 0x382   :  { %15 = sbr.rel (!%p13_p3) target bundleno = 10 (0xa), region = 165 }
 0x385   : > { %s4711_s21 = smov %s4703_s4 }
 0x386   : > { %s4712_s22 = smov %s4704_s11 }
 0x387   :  { %2849 = vsyncpa [#allocation5], 1 }
 0x388   :  { %2851 = vsyncpa [#allocation5 + $0x1], 1 }

</bundles_post_ra>
